<compile_context>
chip_gen: v5e
topology: v5e:2x2
jax: 0.10.0
libtpu: 0.0.40
codegen_flags: <defaults>
</compile_context>

<pallas_src>
import functools

import jax
import jax.numpy as jnp
from jax import lax
from jax.experimental import pallas as pl
from jax.experimental.pallas import tpu as pltpu


def _round_up(x, m):
    return (x + m - 1) // m * m


def _pick_tile(total, candidates):
    for c in candidates:
        if total % c == 0:
            return c
    return total


def _pick_batch_tile(bp, t, hp, budget_bytes=8 << 20):
    """Largest batch tile (multiple of 8, divides Bp) whose per-tile VMEM
    footprint (xg f32 gate scratch + double-buffered bf16 hs block) stays
    under `budget_bytes`.  Bigger tiles = more MXU rows per step; >=2 tiles
    lets the 'parallel' grid axis use both v7x TensorCores."""
    for bt in (64, 32, 16, 8):
        if bp % bt:
            continue
        xg_bytes = t * bt * 4 * hp * 4
        hs_bytes = t * bt * hp * 2
        if xg_bytes + 2 * hs_bytes <= budget_bytes:
            return bt
    return 8


# ----------------------------------------------------------------------------
# Kernel A: LSTM recurrence for one batch tile (time-major rows inside tile).
# ----------------------------------------------------------------------------
def lstm_recurrence_kernel(x_ref, wih_ref, whh_ref, b_ref, hs_ref, xg_ref, *,
                           seq_len):
    """
    x_ref   : (T*Bt, E)    bf16  embedded inputs, row = t*Bt + b_local
    wih_ref : (E, 4*Hp)    bf16  (VMEM-resident, shared by all grid steps)
    whh_ref : (Hp, 4*Hp)   bf16
    b_ref   : (1, 4*Hp)    f32   b_ih + b_hh, per-gate zero padded
    hs_ref  : (T*Bt, Hp)   bf16  OUT: all hidden states for this batch tile
    xg_ref  : (T*Bt, 4*Hp) f32   scratch: hoisted input-gate projections
    """
    rows, hp = hs_ref.shape
    bt = rows // seq_len

    # (1) Input projection for every timestep in a single MXU matmul; bias
    #     broadcast exactly once (hoisted out of the recurrence).
    xg_ref[...] = (
        jnp.dot(x_ref[...], wih_ref[...], preferred_element_type=jnp.float32)
        + b_ref[...]
    )

    def sig(z):
        # sigmoid(x) = 0.5*(tanh(0.5*x)+1): a single EUP push per gate.
        return 0.5 * jnp.tanh(0.5 * z) + 0.5

    # (2) Sequential recurrence; h is carried as the bf16 shadow used by the
    #     next step's MXU matmul, c stays f32 on the VPU/EUP.
    def step(t, carry):
        h, c = carry
        r0 = pl.multiple_of(t * bt, 8)
        gates = xg_ref[pl.ds(r0, bt), :] + jnp.dot(
            h, whh_ref[...], preferred_element_type=jnp.float32)  # (Bt, 4Hp)

        # Lane-aligned per-gate slices (Hp is a multiple of 128);
        # PyTorch gate order: i, f, g, o.
        i = sig(gates[:, 0 * hp:1 * hp])
        f = sig(gates[:, 1 * hp:2 * hp])
        g = jnp.tanh(gates[:, 2 * hp:3 * hp])
        o = sig(gates[:, 3 * hp:4 * hp])

        c = f * c + i * g
        h_new = (o * jnp.tanh(c)).astype(jnp.bfloat16)
        hs_ref[pl.ds(r0, bt), :] = h_new
        return h_new, c

    h0 = jnp.zeros((bt, hp), jnp.bfloat16)
    c0 = jnp.zeros((bt, hp), jnp.float32)
    lax.fori_loop(0, seq_len, step, (h0, c0), unroll=min(seq_len, 8))


# ----------------------------------------------------------------------------
# Kernel B: tiled FC projection (hidden -> vocab), streamed over a 2-D grid.
# ----------------------------------------------------------------------------
def fc_kernel(hs_ref, wfc_ref, bfc_ref, out_ref):
    """
    hs_ref  : (tm, Hp)  bf16   batch-major hidden-state rows
    wfc_ref : (Hp, tn)  bf16   vocab column slab (double-buffered by Pallas)
    bfc_ref : (1, tn)   f32
    out_ref : (tm, tn)  f32    logits tile (lane-dense, unmasked store)
    """
    out_ref[...] = (
        jnp.dot(hs_ref[...], wfc_ref[...], preferred_element_type=jnp.float32)
        + bfc_ref[...]
    )


# ----------------------------------------------------------------------------
# Wrapper
# ----------------------------------------------------------------------------
def chatbot_forward(tokens, params):
    """ChatbotModel.forward: embedding -> LSTM (batch_first) -> Linear."""
    B, T = tokens.shape
    emb_tbl = params["embedding"]                 # (V, E)
    V, E = emb_tbl.shape
    H = params["w_hh_t"].shape[0]

    Bp = _round_up(B, 8)                          # sublane alignment
    Hp = _round_up(H, 128)                        # lane-aligned gate slices
    Vp = _round_up(V, 256)                        # 256-aligned vocab tiles
    Bt = _pick_batch_tile(Bp, T, Hp)
    nbt = Bp // Bt

    # ---- glue: embedding gather + padding + per-tile time-major layout -----
    embedded = jnp.take(emb_tbl, tokens, axis=0)              # (B, T, E) f32
    embedded = jnp.pad(embedded, ((0, Bp - B), (0, 0), (0, 0)))
    # (nbt, T*Bt, E): within a batch tile, row = t*Bt + b_local.
    x3 = (embedded.reshape(nbt, Bt, T, E)
                  .transpose(0, 2, 1, 3)
                  .reshape(nbt, T * Bt, E)
                  .astype(jnp.bfloat16))

    def pad_gates(w, rows_to):
        # w: (rows, 4*H), PyTorch gate order [i|f|g|o] -> (rows_to, 4*Hp)
        rows = w.shape[0]
        w4 = w.reshape(rows, 4, H)
        w4 = jnp.pad(w4, ((0, rows_to - rows), (0, 0), (0, Hp - H)))
        return w4.reshape(rows_to, 4 * Hp)

    w_ih = pad_gates(params["w_ih_t"], E).astype(jnp.bfloat16)       # (E, 4Hp)
    w_hh = pad_gates(params["w_hh_t"], Hp).astype(jnp.bfloat16)      # (Hp, 4Hp)
    bias = pad_gates(params["bias"], 1)                              # (1, 4Hp) f32
    w_fc = jnp.pad(params["w_fc_t"],
                   ((0, Hp - H), (0, Vp - V))).astype(jnp.bfloat16)  # (Hp, Vp)
    b_fc = jnp.pad(params["b_fc"], ((0, 0), (0, Vp - V)))            # (1, Vp) f32

    vmem_full = pl.BlockSpec(memory_space=pltpu.MemorySpace.VMEM)

    # ---- Kernel A: recurrence, grid over batch tiles ("parallel") ----------
    hs = pl.pallas_call(
        functools.partial(lstm_recurrence_kernel, seq_len=T),
        out_shape=jax.ShapeDtypeStruct((nbt, T * Bt, Hp), jnp.bfloat16),
        grid=(nbt,),
        in_specs=[
            pl.BlockSpec((None, T * Bt, E), lambda b: (b, 0, 0)),
            vmem_full,   # w_ih  (resident for the whole call)
            vmem_full,   # w_hh
            vmem_full,   # bias
        ],
        out_specs=pl.BlockSpec((None, T * Bt, Hp), lambda b: (b, 0, 0)),
        scratch_shapes=[pltpu.VMEM((T * Bt, 4 * Hp), jnp.float32)],
        compiler_params=pltpu.CompilerParams(
            dimension_semantics=("parallel",),
            vmem_limit_bytes=64 * 1024 * 1024),   # re-derived for v7x (64 MiB)
    )(x3, w_ih, w_hh, bias)

    # Reorder hidden states to batch-major so the big logits tensor needs no
    # transpose.  This is a small bf16 tensor: ~(2*H)/(4*V) of the HBM traffic
    # the removed logits transpose would have cost.
    hs_bm = (hs.reshape(nbt, T, Bt, Hp)
               .transpose(0, 2, 1, 3)
               .reshape(Bp * T, Hp))

    # ---- Kernel B: tiled FC projection, both grid axes "parallel" ----------
    M = Bp * T
    tm = _pick_tile(M, (512, 256, 128, 64, 32, 16, 8))
    tn = _pick_tile(Vp, (1024, 512, 256))

    out = pl.pallas_call(
        fc_kernel,
        out_shape=jax.ShapeDtypeStruct((M, Vp), jnp.float32),
        grid=(M // tm, Vp // tn),
        in_specs=[
            pl.BlockSpec((tm, Hp), lambda i, j: (i, 0)),
            pl.BlockSpec((Hp, tn), lambda i, j: (0, j)),
            pl.BlockSpec((1, tn), lambda i, j: (0, j)),
        ],
        out_specs=pl.BlockSpec((tm, tn), lambda i, j: (i, j)),
        compiler_params=pltpu.CompilerParams(
            dimension_semantics=("parallel", "parallel"),
            vmem_limit_bytes=64 * 1024 * 1024),
    )(hs_bm, w_fc, b_fc)

    # Batch-major already: reshape is free, then drop the padding.
    logits = out.reshape(Bp, T, Vp)[:B, :, :V]
    return logits


# ----------------------------------------------------------------------------
# Pure-JAX reference (f32) for correctness checking.
# ----------------------------------------------------------------------------
def chatbot_forward_ref(tokens, params):
    emb = jnp.take(params["embedding"], tokens, axis=0)      # (B, T, E)
    B = emb.shape[0]
    H = params["w_hh_t"].shape[0]

    def step(carry, x_t):
        h, c = carry
        gates = (x_t @ params["w_ih_t"] + h @ params["w_hh_t"]
                 + params["bias"][0])
        i, f, g, o = jnp.split(gates, 4, axis=-1)
        i, f, o = jax.nn.sigmoid(i), jax.nn.sigmoid(f), jax.nn.sigmoid(o)
        g = jnp.tanh(g)
        c = f * c + i * g
        h = o * jnp.tanh(c)
        return (h, c), h

    init = (jnp.zeros((B, H), jnp.float32), jnp.zeros((B, H), jnp.float32))
    _, hs = lax.scan(step, init, emb.transpose(1, 0, 2))     # (T, B, H)
    hs = hs.transpose(1, 0, 2)                               # (B, T, H)
    return hs @ params["w_fc_t"] + params["b_fc"][0]


def init_params(key, vocab_size, embedding_dim, hidden_size):
    ks = jax.random.split(key, 6)
    scale = 0.1
    return {
        "embedding": scale * jax.random.normal(
            ks[0], (vocab_size, embedding_dim), jnp.float32),
        # PyTorch weight_ih_l0 is (4H, E); stored transposed (E, 4H).
        "w_ih_t": scale * jax.random.normal(
            ks[1], (embedding_dim, 4 * hidden_size), jnp.float32),
        # PyTorch weight_hh_l0 is (4H, H); transposed -> (H, 4H).
        "w_hh_t": scale * jax.random.normal(
            ks[2], (hidden_size, 4 * hidden_size), jnp.float32),
        # bias = bias_ih_l0 + bias_hh_l0 as a single (1, 4H) row.
        "bias": scale * jax.random.normal(
            ks[3], (1, 4 * hidden_size), jnp.float32),
        # PyTorch fc.weight is (V, H); transposed -> (H, V).
        "w_fc_t": scale * jax.random.normal(
            ks[4], (hidden_size, vocab_size), jnp.float32),
        "b_fc": scale * jax.random.normal(
            ks[5], (1, vocab_size), jnp.float32),
    }


if __name__ == "__main__":
    vocab_size = 32
    embedding_dim = 16
    hidden_size = 32
    batch = 4
    seq = 8

    key = jax.random.PRNGKey(0)
    pkey, tkey = jax.random.split(key)
    params = init_params(pkey, vocab_size, embedding_dim, hidden_size)
    tokens = jax.random.randint(tkey, (batch, seq), 0, vocab_size,
                                dtype=jnp.int32)

    logits = jax.jit(chatbot_forward)(tokens, params)
    jax.block_until_ready(logits)
    assert logits.shape == (batch, seq, vocab_size)

    # Correctness vs f32 reference (kernel uses bf16 MXU operands; expected
    # max abs error is ~1e-3 at these scales).
    ref = chatbot_forward_ref(tokens, params)
    max_err = float(jnp.max(jnp.abs(logits - ref)))
    assert max_err < 3e-2, f"max abs error too large: {max_err}"

    print("KERNEL_OK")
</pallas_src>

<mosaic_0001>
module attributes {stable_mosaic.version = 11 : i64} {
  func.func @lstm_recurrence_kernel(%arg0: i32, %arg1: memref<1x64x16xbf16, #tpu.memory_space<vmem>>, %arg2: memref<16x512xbf16, #tpu.memory_space<vmem>>, %arg3: memref<128x512xbf16, #tpu.memory_space<vmem>>, %arg4: memref<1x512xf32, #tpu.memory_space<vmem>>, %arg5: memref<1x64x128xbf16, #tpu.memory_space<vmem>>, %arg6: memref<64x512xf32, #tpu.memory_space<vmem>>) attributes {dimension_semantics = [#tpu.dimension_semantics<parallel>], iteration_bounds = array<i64: 1>, scalar_prefetch = 0 : i64, scratch_operands = 1 : i64, tpu.core_type = #tpu.core_type<tc>, window_params = [{transform_indices = @transform_0, window_bounds = array<i64: 1, 64, 16>}, {pipeline_mode = #tpu.pipeline_mode<synchronous>, transform_indices = @transform_1, window_bounds = array<i64: 16, 512>}, {pipeline_mode = #tpu.pipeline_mode<synchronous>, transform_indices = @transform_2, window_bounds = array<i64: 128, 512>}, {pipeline_mode = #tpu.pipeline_mode<synchronous>, transform_indices = @transform_3, window_bounds = array<i64: 1, 512>}, {transform_indices = @transform_4, window_bounds = array<i64: 1, 64, 128>}]} {
    %c0 = arith.constant 0 : index
    %c0_0 = arith.constant 0 : index
    %c0_1 = arith.constant 0 : index
    %0 = vector.load %arg1[%c0, %c0_0, %c0_1] : memref<1x64x16xbf16, #tpu.memory_space<vmem>>, vector<1x64x16xbf16>
    %1 = vector.shape_cast %0 : vector<1x64x16xbf16> to vector<64x16xbf16>
    %c0_2 = arith.constant 0 : index
    %c0_3 = arith.constant 0 : index
    %2 = vector.load %arg2[%c0_2, %c0_3] : memref<16x512xbf16, #tpu.memory_space<vmem>>, vector<16x512xbf16>
    %cst = arith.constant dense<0.000000e+00> : vector<64x512xf32>
    %3 = tpu.matmul %1, %2, %cst {dimension_numbers = #tpu.dot_dimension_numbers<[1], [0], [0], [1], [0, 0, 1, 1], [], []>} : vector<64x16xbf16>, vector<16x512xbf16>, vector<64x512xf32> -> vector<64x512xf32>
    %c0_4 = arith.constant 0 : index
    %c0_5 = arith.constant 0 : index
    %4 = vector.load %arg4[%c0_4, %c0_5] : memref<1x512xf32, #tpu.memory_space<vmem>>, vector<1x512xf32>
    %5 = vector.broadcast %4 : vector<1x512xf32> to vector<64x512xf32>
    %6 = arith.addf %3, %5 : vector<64x512xf32>
    %c0_6 = arith.constant 0 : index
    %c0_7 = arith.constant 0 : index
    %7 = vector.load %arg6[%c0_6, %c0_7] : memref<64x512xf32, #tpu.memory_space<vmem>>, vector<64x512xf32>
    tpu.vector_store %arg6[%c0_6, %c0_7], %6 {strides = array<i32>} : memref<64x512xf32, #tpu.memory_space<vmem>>, vector<64x512xf32>,
    %cst_8 = arith.constant 0.000000e+00 : bf16
    %8 = vector.broadcast %cst_8 : bf16 to vector<8x128xbf16>
    %cst_9 = arith.constant 0.000000e+00 : f32
    %9 = vector.broadcast %cst_9 : f32 to vector<8x128xf32>
    %c0_i32 = arith.constant 0 : i32
    %c8_i32 = arith.constant 8 : i32
    %10 = arith.muli %c0_i32, %c8_i32 : i32
    %11 = tpu.assume_multiple %10, 8 : i32
    %12 = arith.index_cast %11 : i32 to index
    %c0_10 = arith.constant 0 : index
    %13 = vector.load %arg6[%12, %c0_10] : memref<64x512xf32, #tpu.memory_space<vmem>>, vector<8x512xf32>
    %c0_11 = arith.constant 0 : index
    %c0_12 = arith.constant 0 : index
    %14 = vector.load %arg3[%c0_11, %c0_12] : memref<128x512xbf16, #tpu.memory_space<vmem>>, vector<128x512xbf16>
    %cst_13 = arith.constant dense<0.000000e+00> : vector<8x512xf32>
    %15 = tpu.matmul %8, %14, %cst_13 {dimension_numbers = #tpu.dot_dimension_numbers<[1], [0], [0], [1], [0, 0, 1, 1], [], []>} : vector<8x128xbf16>, vector<128x512xbf16>, vector<8x512xf32> -> vector<8x512xf32>
    %16 = arith.addf %13, %15 : vector<8x512xf32>
    %17 = vector.extract_strided_slice %16 {offsets = [0, 0], sizes = [8, 128], strides = [1, 1]} : vector<8x512xf32> to vector<8x128xf32>
    %cst_14 = arith.constant 5.000000e-01 : f32
    %18 = vector.broadcast %cst_14 : f32 to vector<8x128xf32>
    %19 = arith.mulf %18, %17 : vector<8x128xf32>
    %20 = math.tanh %19 : vector<8x128xf32>
    %cst_15 = arith.constant 5.000000e-01 : f32
    %21 = vector.broadcast %cst_15 : f32 to vector<8x128xf32>
    %22 = arith.mulf %21, %20 : vector<8x128xf32>
    %cst_16 = arith.constant 5.000000e-01 : f32
    %23 = vector.broadcast %cst_16 : f32 to vector<8x128xf32>
    %24 = arith.addf %22, %23 : vector<8x128xf32>
    %25 = vector.extract_strided_slice %16 {offsets = [0, 128], sizes = [8, 128], strides = [1, 1]} : vector<8x512xf32> to vector<8x128xf32>
    %cst_17 = arith.constant 5.000000e-01 : f32
    %26 = vector.broadcast %cst_17 : f32 to vector<8x128xf32>
    %27 = arith.mulf %26, %25 : vector<8x128xf32>
    %28 = math.tanh %27 : vector<8x128xf32>
    %cst_18 = arith.constant 5.000000e-01 : f32
    %29 = vector.broadcast %cst_18 : f32 to vector<8x128xf32>
    %30 = arith.mulf %29, %28 : vector<8x128xf32>
    %cst_19 = arith.constant 5.000000e-01 : f32
    %31 = vector.broadcast %cst_19 : f32 to vector<8x128xf32>
    %32 = arith.addf %30, %31 : vector<8x128xf32>
    %33 = vector.extract_strided_slice %16 {offsets = [0, 256], sizes = [8, 128], strides = [1, 1]} : vector<8x512xf32> to vector<8x128xf32>
    %34 = math.tanh %33 : vector<8x128xf32>
    %35 = vector.extract_strided_slice %16 {offsets = [0, 384], sizes = [8, 128], strides = [1, 1]} : vector<8x512xf32> to vector<8x128xf32>
    %cst_20 = arith.constant 5.000000e-01 : f32
    %36 = vector.broadcast %cst_20 : f32 to vector<8x128xf32>
    %37 = arith.mulf %36, %35 : vector<8x128xf32>
    %38 = math.tanh %37 : vector<8x128xf32>
    %cst_21 = arith.constant 5.000000e-01 : f32
    %39 = vector.broadcast %cst_21 : f32 to vector<8x128xf32>
    %40 = arith.mulf %39, %38 : vector<8x128xf32>
    %cst_22 = arith.constant 5.000000e-01 : f32
    %41 = vector.broadcast %cst_22 : f32 to vector<8x128xf32>
    %42 = arith.addf %40, %41 : vector<8x128xf32>
    %43 = arith.mulf %32, %9 : vector<8x128xf32>
    %44 = arith.mulf %24, %34 : vector<8x128xf32>
    %45 = arith.addf %43, %44 : vector<8x128xf32>
    %46 = math.tanh %45 : vector<8x128xf32>
    %47 = arith.mulf %42, %46 : vector<8x128xf32>
    %48 = arith.truncf %47 : vector<8x128xf32> to vector<8x128xbf16>
    %c0_23 = arith.constant 0 : index
    %49 = arith.index_cast %11 : i32 to index
    %c0_24 = arith.constant 0 : index
    %50 = vector.load %arg5[%c0_23, %49, %c0_24] : memref<1x64x128xbf16, #tpu.memory_space<vmem>>, vector<1x8x128xbf16>
    %51 = vector.shape_cast %50 : vector<1x8x128xbf16> to vector<8x128xbf16>
    %52 = vector.shape_cast %48 : vector<8x128xbf16> to vector<1x8x128xbf16>
    tpu.vector_store %arg5[%c0_23, %49, %c0_24], %52 {strides = array<i32>} : memref<1x64x128xbf16, #tpu.memory_space<vmem>>, vector<1x8x128xbf16>,
    %c1_i32 = arith.constant 1 : i32
    %c8_i32_25 = arith.constant 8 : i32
    %53 = arith.muli %c1_i32, %c8_i32_25 : i32
    %54 = tpu.assume_multiple %53, 8 : i32
    %55 = arith.index_cast %54 : i32 to index
    %c0_26 = arith.constant 0 : index
    %56 = vector.load %arg6[%55, %c0_26] : memref<64x512xf32, #tpu.memory_space<vmem>>, vector<8x512xf32>
    %c0_27 = arith.constant 0 : index
    %c0_28 = arith.constant 0 : index
    %57 = vector.load %arg3[%c0_27, %c0_28] : memref<128x512xbf16, #tpu.memory_space<vmem>>, vector<128x512xbf16>
    %cst_29 = arith.constant dense<0.000000e+00> : vector<8x512xf32>
    %58 = tpu.matmul %48, %57, %cst_29 {dimension_numbers = #tpu.dot_dimension_numbers<[1], [0], [0], [1], [0, 0, 1, 1], [], []>} : vector<8x128xbf16>, vector<128x512xbf16>, vector<8x512xf32> -> vector<8x512xf32>
    %59 = arith.addf %56, %58 : vector<8x512xf32>
    %60 = vector.extract_strided_slice %59 {offsets = [0, 0], sizes = [8, 128], strides = [1, 1]} : vector<8x512xf32> to vector<8x128xf32>
    %cst_30 = arith.constant 5.000000e-01 : f32
    %61 = vector.broadcast %cst_30 : f32 to vector<8x128xf32>
    %62 = arith.mulf %61, %60 : vector<8x128xf32>
    %63 = math.tanh %62 : vector<8x128xf32>
    %cst_31 = arith.constant 5.000000e-01 : f32
    %64 = vector.broadcast %cst_31 : f32 to vector<8x128xf32>
    %65 = arith.mulf %64, %63 : vector<8x128xf32>
    %cst_32 = arith.constant 5.000000e-01 : f32
    %66 = vector.broadcast %cst_32 : f32 to vector<8x128xf32>
    %67 = arith.addf %65, %66 : vector<8x128xf32>
    %68 = vector.extract_strided_slice %59 {offsets = [0, 128], sizes = [8, 128], strides = [1, 1]} : vector<8x512xf32> to vector<8x128xf32>
    %cst_33 = arith.constant 5.000000e-01 : f32
    %69 = vector.broadcast %cst_33 : f32 to vector<8x128xf32>
    %70 = arith.mulf %69, %68 : vector<8x128xf32>
    %71 = math.tanh %70 : vector<8x128xf32>
    %cst_34 = arith.constant 5.000000e-01 : f32
    %72 = vector.broadcast %cst_34 : f32 to vector<8x128xf32>
    %73 = arith.mulf %72, %71 : vector<8x128xf32>
    %cst_35 = arith.constant 5.000000e-01 : f32
    %74 = vector.broadcast %cst_35 : f32 to vector<8x128xf32>
    %75 = arith.addf %73, %74 : vector<8x128xf32>
    %76 = vector.extract_strided_slice %59 {offsets = [0, 256], sizes = [8, 128], strides = [1, 1]} : vector<8x512xf32> to vector<8x128xf32>
    %77 = math.tanh %76 : vector<8x128xf32>
    %78 = vector.extract_strided_slice %59 {offsets = [0, 384], sizes = [8, 128], strides = [1, 1]} : vector<8x512xf32> to vector<8x128xf32>
    %cst_36 = arith.constant 5.000000e-01 : f32
    %79 = vector.broadcast %cst_36 : f32 to vector<8x128xf32>
    %80 = arith.mulf %79, %78 : vector<8x128xf32>
    %81 = math.tanh %80 : vector<8x128xf32>
    %cst_37 = arith.constant 5.000000e-01 : f32
    %82 = vector.broadcast %cst_37 : f32 to vector<8x128xf32>
    %83 = arith.mulf %82, %81 : vector<8x128xf32>
    %cst_38 = arith.constant 5.000000e-01 : f32
    %84 = vector.broadcast %cst_38 : f32 to vector<8x128xf32>
    %85 = arith.addf %83, %84 : vector<8x128xf32>
    %86 = arith.mulf %75, %45 : vector<8x128xf32>
    %87 = arith.mulf %67, %77 : vector<8x128xf32>
    %88 = arith.addf %86, %87 : vector<8x128xf32>
    %89 = math.tanh %88 : vector<8x128xf32>
    %90 = arith.mulf %85, %89 : vector<8x128xf32>
    %91 = arith.truncf %90 : vector<8x128xf32> to vector<8x128xbf16>
    %c0_39 = arith.constant 0 : index
    %92 = arith.index_cast %54 : i32 to index
    %c0_40 = arith.constant 0 : index
    %93 = vector.load %arg5[%c0_39, %92, %c0_40] : memref<1x64x128xbf16, #tpu.memory_space<vmem>>, vector<1x8x128xbf16>
    %94 = vector.shape_cast %93 : vector<1x8x128xbf16> to vector<8x128xbf16>
    %95 = vector.shape_cast %91 : vector<8x128xbf16> to vector<1x8x128xbf16>
    tpu.vector_store %arg5[%c0_39, %92, %c0_40], %95 {strides = array<i32>} : memref<1x64x128xbf16, #tpu.memory_space<vmem>>, vector<1x8x128xbf16>,
    %c2_i32 = arith.constant 2 : i32
    %c8_i32_41 = arith.constant 8 : i32
    %96 = arith.muli %c2_i32, %c8_i32_41 : i32
    %97 = tpu.assume_multiple %96, 8 : i32
    %98 = arith.index_cast %97 : i32 to index
    %c0_42 = arith.constant 0 : index
    %99 = vector.load %arg6[%98, %c0_42] : memref<64x512xf32, #tpu.memory_space<vmem>>, vector<8x512xf32>
    %c0_43 = arith.constant 0 : index
    %c0_44 = arith.constant 0 : index
    %100 = vector.load %arg3[%c0_43, %c0_44] : memref<128x512xbf16, #tpu.memory_space<vmem>>, vector<128x512xbf16>
    %cst_45 = arith.constant dense<0.000000e+00> : vector<8x512xf32>
    %101 = tpu.matmul %91, %100, %cst_45 {dimension_numbers = #tpu.dot_dimension_numbers<[1], [0], [0], [1], [0, 0, 1, 1], [], []>} : vector<8x128xbf16>, vector<128x512xbf16>, vector<8x512xf32> -> vector<8x512xf32>
    %102 = arith.addf %99, %101 : vector<8x512xf32>
    %103 = vector.extract_strided_slice %102 {offsets = [0, 0], sizes = [8, 128], strides = [1, 1]} : vector<8x512xf32> to vector<8x128xf32>
    %cst_46 = arith.constant 5.000000e-01 : f32
    %104 = vector.broadcast %cst_46 : f32 to vector<8x128xf32>
    %105 = arith.mulf %104, %103 : vector<8x128xf32>
    %106 = math.tanh %105 : vector<8x128xf32>
    %cst_47 = arith.constant 5.000000e-01 : f32
    %107 = vector.broadcast %cst_47 : f32 to vector<8x128xf32>
    %108 = arith.mulf %107, %106 : vector<8x128xf32>
    %cst_48 = arith.constant 5.000000e-01 : f32
    %109 = vector.broadcast %cst_48 : f32 to vector<8x128xf32>
    %110 = arith.addf %108, %109 : vector<8x128xf32>
    %111 = vector.extract_strided_slice %102 {offsets = [0, 128], sizes = [8, 128], strides = [1, 1]} : vector<8x512xf32> to vector<8x128xf32>
    %cst_49 = arith.constant 5.000000e-01 : f32
    %112 = vector.broadcast %cst_49 : f32 to vector<8x128xf32>
    %113 = arith.mulf %112, %111 : vector<8x128xf32>
    %114 = math.tanh %113 : vector<8x128xf32>
    %cst_50 = arith.constant 5.000000e-01 : f32
    %115 = vector.broadcast %cst_50 : f32 to vector<8x128xf32>
    %116 = arith.mulf %115, %114 : vector<8x128xf32>
    %cst_51 = arith.constant 5.000000e-01 : f32
    %117 = vector.broadcast %cst_51 : f32 to vector<8x128xf32>
    %118 = arith.addf %116, %117 : vector<8x128xf32>
    %119 = vector.extract_strided_slice %102 {offsets = [0, 256], sizes = [8, 128], strides = [1, 1]} : vector<8x512xf32> to vector<8x128xf32>
    %120 = math.tanh %119 : vector<8x128xf32>
    %121 = vector.extract_strided_slice %102 {offsets = [0, 384], sizes = [8, 128], strides = [1, 1]} : vector<8x512xf32> to vector<8x128xf32>
    %cst_52 = arith.constant 5.000000e-01 : f32
    %122 = vector.broadcast %cst_52 : f32 to vector<8x128xf32>
    %123 = arith.mulf %122, %121 : vector<8x128xf32>
    %124 = math.tanh %123 : vector<8x128xf32>
    %cst_53 = arith.constant 5.000000e-01 : f32
    %125 = vector.broadcast %cst_53 : f32 to vector<8x128xf32>
    %126 = arith.mulf %125, %124 : vector<8x128xf32>
    %cst_54 = arith.constant 5.000000e-01 : f32
    %127 = vector.broadcast %cst_54 : f32 to vector<8x128xf32>
    %128 = arith.addf %126, %127 : vector<8x128xf32>
    %129 = arith.mulf %118, %88 : vector<8x128xf32>
    %130 = arith.mulf %110, %120 : vector<8x128xf32>
    %131 = arith.addf %129, %130 : vector<8x128xf32>
    %132 = math.tanh %131 : vector<8x128xf32>
    %133 = arith.mulf %128, %132 : vector<8x128xf32>
    %134 = arith.truncf %133 : vector<8x128xf32> to vector<8x128xbf16>
    %c0_55 = arith.constant 0 : index
    %135 = arith.index_cast %97 : i32 to index
    %c0_56 = arith.constant 0 : index
    %136 = vector.load %arg5[%c0_55, %135, %c0_56] : memref<1x64x128xbf16, #tpu.memory_space<vmem>>, vector<1x8x128xbf16>
    %137 = vector.shape_cast %136 : vector<1x8x128xbf16> to vector<8x128xbf16>
    %138 = vector.shape_cast %134 : vector<8x128xbf16> to vector<1x8x128xbf16>
    tpu.vector_store %arg5[%c0_55, %135, %c0_56], %138 {strides = array<i32>} : memref<1x64x128xbf16, #tpu.memory_space<vmem>>, vector<1x8x128xbf16>,
    %c3_i32 = arith.constant 3 : i32
    %c8_i32_57 = arith.constant 8 : i32
    %139 = arith.muli %c3_i32, %c8_i32_57 : i32
    %140 = tpu.assume_multiple %139, 8 : i32
    %141 = arith.index_cast %140 : i32 to index
    %c0_58 = arith.constant 0 : index
    %142 = vector.load %arg6[%141, %c0_58] : memref<64x512xf32, #tpu.memory_space<vmem>>, vector<8x512xf32>
    %c0_59 = arith.constant 0 : index
    %c0_60 = arith.constant 0 : index
    %143 = vector.load %arg3[%c0_59, %c0_60] : memref<128x512xbf16, #tpu.memory_space<vmem>>, vector<128x512xbf16>
    %cst_61 = arith.constant dense<0.000000e+00> : vector<8x512xf32>
    %144 = tpu.matmul %134, %143, %cst_61 {dimension_numbers = #tpu.dot_dimension_numbers<[1], [0], [0], [1], [0, 0, 1, 1], [], []>} : vector<8x128xbf16>, vector<128x512xbf16>, vector<8x512xf32> -> vector<8x512xf32>
    %145 = arith.addf %142, %144 : vector<8x512xf32>
    %146 = vector.extract_strided_slice %145 {offsets = [0, 0], sizes = [8, 128], strides = [1, 1]} : vector<8x512xf32> to vector<8x128xf32>
    %cst_62 = arith.constant 5.000000e-01 : f32
    %147 = vector.broadcast %cst_62 : f32 to vector<8x128xf32>
    %148 = arith.mulf %147, %146 : vector<8x128xf32>
    %149 = math.tanh %148 : vector<8x128xf32>
    %cst_63 = arith.constant 5.000000e-01 : f32
    %150 = vector.broadcast %cst_63 : f32 to vector<8x128xf32>
    %151 = arith.mulf %150, %149 : vector<8x128xf32>
    %cst_64 = arith.constant 5.000000e-01 : f32
    %152 = vector.broadcast %cst_64 : f32 to vector<8x128xf32>
    %153 = arith.addf %151, %152 : vector<8x128xf32>
    %154 = vector.extract_strided_slice %145 {offsets = [0, 128], sizes = [8, 128], strides = [1, 1]} : vector<8x512xf32> to vector<8x128xf32>
    %cst_65 = arith.constant 5.000000e-01 : f32
    %155 = vector.broadcast %cst_65 : f32 to vector<8x128xf32>
    %156 = arith.mulf %155, %154 : vector<8x128xf32>
    %157 = math.tanh %156 : vector<8x128xf32>
    %cst_66 = arith.constant 5.000000e-01 : f32
    %158 = vector.broadcast %cst_66 : f32 to vector<8x128xf32>
    %159 = arith.mulf %158, %157 : vector<8x128xf32>
    %cst_67 = arith.constant 5.000000e-01 : f32
    %160 = vector.broadcast %cst_67 : f32 to vector<8x128xf32>
    %161 = arith.addf %159, %160 : vector<8x128xf32>
    %162 = vector.extract_strided_slice %145 {offsets = [0, 256], sizes = [8, 128], strides = [1, 1]} : vector<8x512xf32> to vector<8x128xf32>
    %163 = math.tanh %162 : vector<8x128xf32>
    %164 = vector.extract_strided_slice %145 {offsets = [0, 384], sizes = [8, 128], strides = [1, 1]} : vector<8x512xf32> to vector<8x128xf32>
    %cst_68 = arith.constant 5.000000e-01 : f32
    %165 = vector.broadcast %cst_68 : f32 to vector<8x128xf32>
    %166 = arith.mulf %165, %164 : vector<8x128xf32>
    %167 = math.tanh %166 : vector<8x128xf32>
    %cst_69 = arith.constant 5.000000e-01 : f32
    %168 = vector.broadcast %cst_69 : f32 to vector<8x128xf32>
    %169 = arith.mulf %168, %167 : vector<8x128xf32>
    %cst_70 = arith.constant 5.000000e-01 : f32
    %170 = vector.broadcast %cst_70 : f32 to vector<8x128xf32>
    %171 = arith.addf %169, %170 : vector<8x128xf32>
    %172 = arith.mulf %161, %131 : vector<8x128xf32>
    %173 = arith.mulf %153, %163 : vector<8x128xf32>
    %174 = arith.addf %172, %173 : vector<8x128xf32>
    %175 = math.tanh %174 : vector<8x128xf32>
    %176 = arith.mulf %171, %175 : vector<8x128xf32>
    %177 = arith.truncf %176 : vector<8x128xf32> to vector<8x128xbf16>
    %c0_71 = arith.constant 0 : index
    %178 = arith.index_cast %140 : i32 to index
    %c0_72 = arith.constant 0 : index
    %179 = vector.load %arg5[%c0_71, %178, %c0_72] : memref<1x64x128xbf16, #tpu.memory_space<vmem>>, vector<1x8x128xbf16>
    %180 = vector.shape_cast %179 : vector<1x8x128xbf16> to vector<8x128xbf16>
    %181 = vector.shape_cast %177 : vector<8x128xbf16> to vector<1x8x128xbf16>
    tpu.vector_store %arg5[%c0_71, %178, %c0_72], %181 {strides = array<i32>} : memref<1x64x128xbf16, #tpu.memory_space<vmem>>, vector<1x8x128xbf16>,
    %c4_i32 = arith.constant 4 : i32
    %c8_i32_73 = arith.constant 8 : i32
    %182 = arith.muli %c4_i32, %c8_i32_73 : i32
    %183 = tpu.assume_multiple %182, 8 : i32
    %184 = arith.index_cast %183 : i32 to index
    %c0_74 = arith.constant 0 : index
    %185 = vector.load %arg6[%184, %c0_74] : memref<64x512xf32, #tpu.memory_space<vmem>>, vector<8x512xf32>
    %c0_75 = arith.constant 0 : index
    %c0_76 = arith.constant 0 : index
    %186 = vector.load %arg3[%c0_75, %c0_76] : memref<128x512xbf16, #tpu.memory_space<vmem>>, vector<128x512xbf16>
    %cst_77 = arith.constant dense<0.000000e+00> : vector<8x512xf32>
    %187 = tpu.matmul %177, %186, %cst_77 {dimension_numbers = #tpu.dot_dimension_numbers<[1], [0], [0], [1], [0, 0, 1, 1], [], []>} : vector<8x128xbf16>, vector<128x512xbf16>, vector<8x512xf32> -> vector<8x512xf32>
    %188 = arith.addf %185, %187 : vector<8x512xf32>
    %189 = vector.extract_strided_slice %188 {offsets = [0, 0], sizes = [8, 128], strides = [1, 1]} : vector<8x512xf32> to vector<8x128xf32>
    %cst_78 = arith.constant 5.000000e-01 : f32
    %190 = vector.broadcast %cst_78 : f32 to vector<8x128xf32>
    %191 = arith.mulf %190, %189 : vector<8x128xf32>
    %192 = math.tanh %191 : vector<8x128xf32>
    %cst_79 = arith.constant 5.000000e-01 : f32
    %193 = vector.broadcast %cst_79 : f32 to vector<8x128xf32>
    %194 = arith.mulf %193, %192 : vector<8x128xf32>
    %cst_80 = arith.constant 5.000000e-01 : f32
    %195 = vector.broadcast %cst_80 : f32 to vector<8x128xf32>
    %196 = arith.addf %194, %195 : vector<8x128xf32>
    %197 = vector.extract_strided_slice %188 {offsets = [0, 128], sizes = [8, 128], strides = [1, 1]} : vector<8x512xf32> to vector<8x128xf32>
    %cst_81 = arith.constant 5.000000e-01 : f32
    %198 = vector.broadcast %cst_81 : f32 to vector<8x128xf32>
    %199 = arith.mulf %198, %197 : vector<8x128xf32>
    %200 = math.tanh %199 : vector<8x128xf32>
    %cst_82 = arith.constant 5.000000e-01 : f32
    %201 = vector.broadcast %cst_82 : f32 to vector<8x128xf32>
    %202 = arith.mulf %201, %200 : vector<8x128xf32>
    %cst_83 = arith.constant 5.000000e-01 : f32
    %203 = vector.broadcast %cst_83 : f32 to vector<8x128xf32>
    %204 = arith.addf %202, %203 : vector<8x128xf32>
    %205 = vector.extract_strided_slice %188 {offsets = [0, 256], sizes = [8, 128], strides = [1, 1]} : vector<8x512xf32> to vector<8x128xf32>
    %206 = math.tanh %205 : vector<8x128xf32>
    %207 = vector.extract_strided_slice %188 {offsets = [0, 384], sizes = [8, 128], strides = [1, 1]} : vector<8x512xf32> to vector<8x128xf32>
    %cst_84 = arith.constant 5.000000e-01 : f32
    %208 = vector.broadcast %cst_84 : f32 to vector<8x128xf32>
    %209 = arith.mulf %208, %207 : vector<8x128xf32>
    %210 = math.tanh %209 : vector<8x128xf32>
    %cst_85 = arith.constant 5.000000e-01 : f32
    %211 = vector.broadcast %cst_85 : f32 to vector<8x128xf32>
    %212 = arith.mulf %211, %210 : vector<8x128xf32>
    %cst_86 = arith.constant 5.000000e-01 : f32
    %213 = vector.broadcast %cst_86 : f32 to vector<8x128xf32>
    %214 = arith.addf %212, %213 : vector<8x128xf32>
    %215 = arith.mulf %204, %174 : vector<8x128xf32>
    %216 = arith.mulf %196, %206 : vector<8x128xf32>
    %217 = arith.addf %215, %216 : vector<8x128xf32>
    %218 = math.tanh %217 : vector<8x128xf32>
    %219 = arith.mulf %214, %218 : vector<8x128xf32>
    %220 = arith.truncf %219 : vector<8x128xf32> to vector<8x128xbf16>
    %c0_87 = arith.constant 0 : index
    %221 = arith.index_cast %183 : i32 to index
    %c0_88 = arith.constant 0 : index
    %222 = vector.load %arg5[%c0_87, %221, %c0_88] : memref<1x64x128xbf16, #tpu.memory_space<vmem>>, vector<1x8x128xbf16>
    %223 = vector.shape_cast %222 : vector<1x8x128xbf16> to vector<8x128xbf16>
    %224 = vector.shape_cast %220 : vector<8x128xbf16> to vector<1x8x128xbf16>
    tpu.vector_store %arg5[%c0_87, %221, %c0_88], %224 {strides = array<i32>} : memref<1x64x128xbf16, #tpu.memory_space<vmem>>, vector<1x8x128xbf16>,
    %c5_i32 = arith.constant 5 : i32
    %c8_i32_89 = arith.constant 8 : i32
    %225 = arith.muli %c5_i32, %c8_i32_89 : i32
    %226 = tpu.assume_multiple %225, 8 : i32
    %227 = arith.index_cast %226 : i32 to index
    %c0_90 = arith.constant 0 : index
    %228 = vector.load %arg6[%227, %c0_90] : memref<64x512xf32, #tpu.memory_space<vmem>>, vector<8x512xf32>
    %c0_91 = arith.constant 0 : index
    %c0_92 = arith.constant 0 : index
    %229 = vector.load %arg3[%c0_91, %c0_92] : memref<128x512xbf16, #tpu.memory_space<vmem>>, vector<128x512xbf16>
    %cst_93 = arith.constant dense<0.000000e+00> : vector<8x512xf32>
    %230 = tpu.matmul %220, %229, %cst_93 {dimension_numbers = #tpu.dot_dimension_numbers<[1], [0], [0], [1], [0, 0, 1, 1], [], []>} : vector<8x128xbf16>, vector<128x512xbf16>, vector<8x512xf32> -> vector<8x512xf32>
    %231 = arith.addf %228, %230 : vector<8x512xf32>
    %232 = vector.extract_strided_slice %231 {offsets = [0, 0], sizes = [8, 128], strides = [1, 1]} : vector<8x512xf32> to vector<8x128xf32>
    %cst_94 = arith.constant 5.000000e-01 : f32
    %233 = vector.broadcast %cst_94 : f32 to vector<8x128xf32>
    %234 = arith.mulf %233, %232 : vector<8x128xf32>
    %235 = math.tanh %234 : vector<8x128xf32>
    %cst_95 = arith.constant 5.000000e-01 : f32
    %236 = vector.broadcast %cst_95 : f32 to vector<8x128xf32>
    %237 = arith.mulf %236, %235 : vector<8x128xf32>
    %cst_96 = arith.constant 5.000000e-01 : f32
    %238 = vector.broadcast %cst_96 : f32 to vector<8x128xf32>
    %239 = arith.addf %237, %238 : vector<8x128xf32>
    %240 = vector.extract_strided_slice %231 {offsets = [0, 128], sizes = [8, 128], strides = [1, 1]} : vector<8x512xf32> to vector<8x128xf32>
    %cst_97 = arith.constant 5.000000e-01 : f32
    %241 = vector.broadcast %cst_97 : f32 to vector<8x128xf32>
    %242 = arith.mulf %241, %240 : vector<8x128xf32>
    %243 = math.tanh %242 : vector<8x128xf32>
    %cst_98 = arith.constant 5.000000e-01 : f32
    %244 = vector.broadcast %cst_98 : f32 to vector<8x128xf32>
    %245 = arith.mulf %244, %243 : vector<8x128xf32>
    %cst_99 = arith.constant 5.000000e-01 : f32
    %246 = vector.broadcast %cst_99 : f32 to vector<8x128xf32>
    %247 = arith.addf %245, %246 : vector<8x128xf32>
    %248 = vector.extract_strided_slice %231 {offsets = [0, 256], sizes = [8, 128], strides = [1, 1]} : vector<8x512xf32> to vector<8x128xf32>
    %249 = math.tanh %248 : vector<8x128xf32>
    %250 = vector.extract_strided_slice %231 {offsets = [0, 384], sizes = [8, 128], strides = [1, 1]} : vector<8x512xf32> to vector<8x128xf32>
    %cst_100 = arith.constant 5.000000e-01 : f32
    %251 = vector.broadcast %cst_100 : f32 to vector<8x128xf32>
    %252 = arith.mulf %251, %250 : vector<8x128xf32>
    %253 = math.tanh %252 : vector<8x128xf32>
    %cst_101 = arith.constant 5.000000e-01 : f32
    %254 = vector.broadcast %cst_101 : f32 to vector<8x128xf32>
    %255 = arith.mulf %254, %253 : vector<8x128xf32>
    %cst_102 = arith.constant 5.000000e-01 : f32
    %256 = vector.broadcast %cst_102 : f32 to vector<8x128xf32>
    %257 = arith.addf %255, %256 : vector<8x128xf32>
    %258 = arith.mulf %247, %217 : vector<8x128xf32>
    %259 = arith.mulf %239, %249 : vector<8x128xf32>
    %260 = arith.addf %258, %259 : vector<8x128xf32>
    %261 = math.tanh %260 : vector<8x128xf32>
    %262 = arith.mulf %257, %261 : vector<8x128xf32>
    %263 = arith.truncf %262 : vector<8x128xf32> to vector<8x128xbf16>
    %c0_103 = arith.constant 0 : index
    %264 = arith.index_cast %226 : i32 to index
    %c0_104 = arith.constant 0 : index
    %265 = vector.load %arg5[%c0_103, %264, %c0_104] : memref<1x64x128xbf16, #tpu.memory_space<vmem>>, vector<1x8x128xbf16>
    %266 = vector.shape_cast %265 : vector<1x8x128xbf16> to vector<8x128xbf16>
    %267 = vector.shape_cast %263 : vector<8x128xbf16> to vector<1x8x128xbf16>
    tpu.vector_store %arg5[%c0_103, %264, %c0_104], %267 {strides = array<i32>} : memref<1x64x128xbf16, #tpu.memory_space<vmem>>, vector<1x8x128xbf16>,
    %c6_i32 = arith.constant 6 : i32
    %c8_i32_105 = arith.constant 8 : i32
    %268 = arith.muli %c6_i32, %c8_i32_105 : i32
    %269 = tpu.assume_multiple %268, 8 : i32
    %270 = arith.index_cast %269 : i32 to index
    %c0_106 = arith.constant 0 : index
    %271 = vector.load %arg6[%270, %c0_106] : memref<64x512xf32, #tpu.memory_space<vmem>>, vector<8x512xf32>
    %c0_107 = arith.constant 0 : index
    %c0_108 = arith.constant 0 : index
    %272 = vector.load %arg3[%c0_107, %c0_108] : memref<128x512xbf16, #tpu.memory_space<vmem>>, vector<128x512xbf16>
    %cst_109 = arith.constant dense<0.000000e+00> : vector<8x512xf32>
    %273 = tpu.matmul %263, %272, %cst_109 {dimension_numbers = #tpu.dot_dimension_numbers<[1], [0], [0], [1], [0, 0, 1, 1], [], []>} : vector<8x128xbf16>, vector<128x512xbf16>, vector<8x512xf32> -> vector<8x512xf32>
    %274 = arith.addf %271, %273 : vector<8x512xf32>
    %275 = vector.extract_strided_slice %274 {offsets = [0, 0], sizes = [8, 128], strides = [1, 1]} : vector<8x512xf32> to vector<8x128xf32>
    %cst_110 = arith.constant 5.000000e-01 : f32
    %276 = vector.broadcast %cst_110 : f32 to vector<8x128xf32>
    %277 = arith.mulf %276, %275 : vector<8x128xf32>
    %278 = math.tanh %277 : vector<8x128xf32>
    %cst_111 = arith.constant 5.000000e-01 : f32
    %279 = vector.broadcast %cst_111 : f32 to vector<8x128xf32>
    %280 = arith.mulf %279, %278 : vector<8x128xf32>
    %cst_112 = arith.constant 5.000000e-01 : f32
    %281 = vector.broadcast %cst_112 : f32 to vector<8x128xf32>
    %282 = arith.addf %280, %281 : vector<8x128xf32>
    %283 = vector.extract_strided_slice %274 {offsets = [0, 128], sizes = [8, 128], strides = [1, 1]} : vector<8x512xf32> to vector<8x128xf32>
    %cst_113 = arith.constant 5.000000e-01 : f32
    %284 = vector.broadcast %cst_113 : f32 to vector<8x128xf32>
    %285 = arith.mulf %284, %283 : vector<8x128xf32>
    %286 = math.tanh %285 : vector<8x128xf32>
    %cst_114 = arith.constant 5.000000e-01 : f32
    %287 = vector.broadcast %cst_114 : f32 to vector<8x128xf32>
    %288 = arith.mulf %287, %286 : vector<8x128xf32>
    %cst_115 = arith.constant 5.000000e-01 : f32
    %289 = vector.broadcast %cst_115 : f32 to vector<8x128xf32>
    %290 = arith.addf %288, %289 : vector<8x128xf32>
    %291 = vector.extract_strided_slice %274 {offsets = [0, 256], sizes = [8, 128], strides = [1, 1]} : vector<8x512xf32> to vector<8x128xf32>
    %292 = math.tanh %291 : vector<8x128xf32>
    %293 = vector.extract_strided_slice %274 {offsets = [0, 384], sizes = [8, 128], strides = [1, 1]} : vector<8x512xf32> to vector<8x128xf32>
    %cst_116 = arith.constant 5.000000e-01 : f32
    %294 = vector.broadcast %cst_116 : f32 to vector<8x128xf32>
    %295 = arith.mulf %294, %293 : vector<8x128xf32>
    %296 = math.tanh %295 : vector<8x128xf32>
    %cst_117 = arith.constant 5.000000e-01 : f32
    %297 = vector.broadcast %cst_117 : f32 to vector<8x128xf32>
    %298 = arith.mulf %297, %296 : vector<8x128xf32>
    %cst_118 = arith.constant 5.000000e-01 : f32
    %299 = vector.broadcast %cst_118 : f32 to vector<8x128xf32>
    %300 = arith.addf %298, %299 : vector<8x128xf32>
    %301 = arith.mulf %290, %260 : vector<8x128xf32>
    %302 = arith.mulf %282, %292 : vector<8x128xf32>
    %303 = arith.addf %301, %302 : vector<8x128xf32>
    %304 = math.tanh %303 : vector<8x128xf32>
    %305 = arith.mulf %300, %304 : vector<8x128xf32>
    %306 = arith.truncf %305 : vector<8x128xf32> to vector<8x128xbf16>
    %c0_119 = arith.constant 0 : index
    %307 = arith.index_cast %269 : i32 to index
    %c0_120 = arith.constant 0 : index
    %308 = vector.load %arg5[%c0_119, %307, %c0_120] : memref<1x64x128xbf16, #tpu.memory_space<vmem>>, vector<1x8x128xbf16>
    %309 = vector.shape_cast %308 : vector<1x8x128xbf16> to vector<8x128xbf16>
    %310 = vector.shape_cast %306 : vector<8x128xbf16> to vector<1x8x128xbf16>
    tpu.vector_store %arg5[%c0_119, %307, %c0_120], %310 {strides = array<i32>} : memref<1x64x128xbf16, #tpu.memory_space<vmem>>, vector<1x8x128xbf16>,
    %c7_i32 = arith.constant 7 : i32
    %c8_i32_121 = arith.constant 8 : i32
    %311 = arith.muli %c7_i32, %c8_i32_121 : i32
    %312 = tpu.assume_multiple %311, 8 : i32
    %313 = arith.index_cast %312 : i32 to index
    %c0_122 = arith.constant 0 : index
    %314 = vector.load %arg6[%313, %c0_122] : memref<64x512xf32, #tpu.memory_space<vmem>>, vector<8x512xf32>
    %c0_123 = arith.constant 0 : index
    %c0_124 = arith.constant 0 : index
    %315 = vector.load %arg3[%c0_123, %c0_124] : memref<128x512xbf16, #tpu.memory_space<vmem>>, vector<128x512xbf16>
    %cst_125 = arith.constant dense<0.000000e+00> : vector<8x512xf32>
    %316 = tpu.matmul %306, %315, %cst_125 {dimension_numbers = #tpu.dot_dimension_numbers<[1], [0], [0], [1], [0, 0, 1, 1], [], []>} : vector<8x128xbf16>, vector<128x512xbf16>, vector<8x512xf32> -> vector<8x512xf32>
    %317 = arith.addf %314, %316 : vector<8x512xf32>
    %318 = vector.extract_strided_slice %317 {offsets = [0, 0], sizes = [8, 128], strides = [1, 1]} : vector<8x512xf32> to vector<8x128xf32>
    %cst_126 = arith.constant 5.000000e-01 : f32
    %319 = vector.broadcast %cst_126 : f32 to vector<8x128xf32>
    %320 = arith.mulf %319, %318 : vector<8x128xf32>
    %321 = math.tanh %320 : vector<8x128xf32>
    %cst_127 = arith.constant 5.000000e-01 : f32
    %322 = vector.broadcast %cst_127 : f32 to vector<8x128xf32>
    %323 = arith.mulf %322, %321 : vector<8x128xf32>
    %cst_128 = arith.constant 5.000000e-01 : f32
    %324 = vector.broadcast %cst_128 : f32 to vector<8x128xf32>
    %325 = arith.addf %323, %324 : vector<8x128xf32>
    %326 = vector.extract_strided_slice %317 {offsets = [0, 128], sizes = [8, 128], strides = [1, 1]} : vector<8x512xf32> to vector<8x128xf32>
    %cst_129 = arith.constant 5.000000e-01 : f32
    %327 = vector.broadcast %cst_129 : f32 to vector<8x128xf32>
    %328 = arith.mulf %327, %326 : vector<8x128xf32>
    %329 = math.tanh %328 : vector<8x128xf32>
    %cst_130 = arith.constant 5.000000e-01 : f32
    %330 = vector.broadcast %cst_130 : f32 to vector<8x128xf32>
    %331 = arith.mulf %330, %329 : vector<8x128xf32>
    %cst_131 = arith.constant 5.000000e-01 : f32
    %332 = vector.broadcast %cst_131 : f32 to vector<8x128xf32>
    %333 = arith.addf %331, %332 : vector<8x128xf32>
    %334 = vector.extract_strided_slice %317 {offsets = [0, 256], sizes = [8, 128], strides = [1, 1]} : vector<8x512xf32> to vector<8x128xf32>
    %335 = math.tanh %334 : vector<8x128xf32>
    %336 = vector.extract_strided_slice %317 {offsets = [0, 384], sizes = [8, 128], strides = [1, 1]} : vector<8x512xf32> to vector<8x128xf32>
    %cst_132 = arith.constant 5.000000e-01 : f32
    %337 = vector.broadcast %cst_132 : f32 to vector<8x128xf32>
    %338 = arith.mulf %337, %336 : vector<8x128xf32>
    %339 = math.tanh %338 : vector<8x128xf32>
    %cst_133 = arith.constant 5.000000e-01 : f32
    %340 = vector.broadcast %cst_133 : f32 to vector<8x128xf32>
    %341 = arith.mulf %340, %339 : vector<8x128xf32>
    %cst_134 = arith.constant 5.000000e-01 : f32
    %342 = vector.broadcast %cst_134 : f32 to vector<8x128xf32>
    %343 = arith.addf %341, %342 : vector<8x128xf32>
    %344 = arith.mulf %333, %303 : vector<8x128xf32>
    %345 = arith.mulf %325, %335 : vector<8x128xf32>
    %346 = arith.addf %344, %345 : vector<8x128xf32>
    %347 = math.tanh %346 : vector<8x128xf32>
    %348 = arith.mulf %343, %347 : vector<8x128xf32>
    %349 = arith.truncf %348 : vector<8x128xf32> to vector<8x128xbf16>
    %c0_135 = arith.constant 0 : index
    %350 = arith.index_cast %312 : i32 to index
    %c0_136 = arith.constant 0 : index
    %351 = vector.load %arg5[%c0_135, %350, %c0_136] : memref<1x64x128xbf16, #tpu.memory_space<vmem>>, vector<1x8x128xbf16>
    %352 = vector.shape_cast %351 : vector<1x8x128xbf16> to vector<8x128xbf16>
    %353 = vector.shape_cast %349 : vector<8x128xbf16> to vector<1x8x128xbf16>
    tpu.vector_store %arg5[%c0_135, %350, %c0_136], %353 {strides = array<i32>} : memref<1x64x128xbf16, #tpu.memory_space<vmem>>, vector<1x8x128xbf16>,
    %c8_i32_137 = arith.constant 8 : i32
    return
  }
  func.func @transform_0(%arg0: i32) -> (i32, i32, i32) {
    %c0_i32 = arith.constant 0 : i32
    %c0_i32_0 = arith.constant 0 : i32
    %c0_i32_1 = arith.constant 0 : i32
    return %arg0, %c0_i32, %c0_i32_0 : i32, i32, i32
  }
  func.func @transform_1(%arg0: i32) -> (i32, i32) {
    %c0_i32 = arith.constant 0 : i32
    %c0_i32_0 = arith.constant 0 : i32
    %c0_i32_1 = arith.constant 0 : i32
    return %c0_i32, %c0_i32_0 : i32, i32
  }
  func.func @transform_2(%arg0: i32) -> (i32, i32) {
    %c0_i32 = arith.constant 0 : i32
    %c0_i32_0 = arith.constant 0 : i32
    %c0_i32_1 = arith.constant 0 : i32
    return %c0_i32, %c0_i32_0 : i32, i32
  }
  func.func @transform_3(%arg0: i32) -> (i32, i32) {
    %c0_i32 = arith.constant 0 : i32
    %c0_i32_0 = arith.constant 0 : i32
    %c0_i32_1 = arith.constant 0 : i32
    return %c0_i32, %c0_i32_0 : i32, i32
  }
  func.func @transform_4(%arg0: i32) -> (i32, i32, i32) {
    %c0_i32 = arith.constant 0 : i32
    %c0_i32_0 = arith.constant 0 : i32
    %c0_i32_1 = arith.constant 0 : i32
    return %arg0, %c0_i32, %c0_i32_0 : i32, i32, i32
  }
}

module attributes {stable_mosaic.version = 11 : i64} {
  func.func @fc_kernel(%arg0: i32, %arg1: i32, %arg2: memref<64x128xbf16, #tpu.memory_space<vmem>>, %arg3: memref<128x256xbf16, #tpu.memory_space<vmem>>, %arg4: memref<1x256xf32, #tpu.memory_space<vmem>>, %arg5: memref<64x256xf32, #tpu.memory_space<vmem>>) attributes {dimension_semantics = [#tpu.dimension_semantics<parallel>, #tpu.dimension_semantics<parallel>], iteration_bounds = array<i64: 1, 1>, scalar_prefetch = 0 : i64, scratch_operands = 0 : i64, tpu.core_type = #tpu.core_type<tc>, window_params = [{transform_indices = @transform_0, window_bounds = array<i64: 64, 128>}, {transform_indices = @transform_1, window_bounds = array<i64: 128, 256>}, {transform_indices = @transform_2, window_bounds = array<i64: 1, 256>}, {transform_indices = @transform_3, window_bounds = array<i64: 64, 256>}]} {
    %c0 = arith.constant 0 : index
    %c0_0 = arith.constant 0 : index
    %0 = vector.load %arg2[%c0, %c0_0] : memref<64x128xbf16, #tpu.memory_space<vmem>>, vector<64x128xbf16>
    %c0_1 = arith.constant 0 : index
    %c0_2 = arith.constant 0 : index
    %1 = vector.load %arg3[%c0_1, %c0_2] : memref<128x256xbf16, #tpu.memory_space<vmem>>, vector<128x256xbf16>
    %cst = arith.constant dense<0.000000e+00> : vector<64x256xf32>
    %2 = tpu.matmul %0, %1, %cst {dimension_numbers = #tpu.dot_dimension_numbers<[1], [0], [0], [1], [0, 0, 1, 1], [], []>} : vector<64x128xbf16>, vector<128x256xbf16>, vector<64x256xf32> -> vector<64x256xf32>
    %c0_3 = arith.constant 0 : index
    %c0_4 = arith.constant 0 : index
    %3 = vector.load %arg4[%c0_3, %c0_4] : memref<1x256xf32, #tpu.memory_space<vmem>>, vector<1x256xf32>
    %4 = vector.broadcast %3 : vector<1x256xf32> to vector<64x256xf32>
    %5 = arith.addf %2, %4 : vector<64x256xf32>
    %c0_5 = arith.constant 0 : index
    %c0_6 = arith.constant 0 : index
    %6 = vector.load %arg5[%c0_5, %c0_6] : memref<64x256xf32, #tpu.memory_space<vmem>>, vector<64x256xf32>
    tpu.vector_store %arg5[%c0_5, %c0_6], %5 {strides = array<i32>} : memref<64x256xf32, #tpu.memory_space<vmem>>, vector<64x256xf32>,
    return
  }
  func.func @transform_0(%arg0: i32, %arg1: i32) -> (i32, i32) {
    %c0_i32 = arith.constant 0 : i32
    %c0_i32_0 = arith.constant 0 : i32
    return %arg0, %c0_i32 : i32, i32
  }
  func.func @transform_1(%arg0: i32, %arg1: i32) -> (i32, i32) {
    %c0_i32 = arith.constant 0 : i32
    %c0_i32_0 = arith.constant 0 : i32
    return %c0_i32, %arg1 : i32, i32
  }
  func.func @transform_2(%arg0: i32, %arg1: i32) -> (i32, i32) {
    %c0_i32 = arith.constant 0 : i32
    %c0_i32_0 = arith.constant 0 : i32
    return %c0_i32, %arg1 : i32, i32
  }
  func.func @transform_3(%arg0: i32, %arg1: i32) -> (i32, i32) {
    %c0_i32 = arith.constant 0 : i32
    return %arg0, %arg1 : i32, i32
  }
}

</mosaic_0001>

<bundles_post_ra>
// kernel: chatbot_forward.3
= control target key start
LH: loop header
LB: loop body
LE: loop exit
PB: predicated region body
PF: predicated region fallthrough
CT: control target
= control target key end

     0   :  { %s521_s1 = inlined_call_operand.vmem [shape: bf16[128,256], index: 1, kind: input, shape index: {}]   ;;  %s522_s0 = inlined_call_operand.vmem [shape: bf16[64,128], index: 0, kind: input, shape index: {}]   ;;  %s523_s2 = inlined_call_operand.vmem [shape: f32[1,256], index: 2, kind: input, shape index: {}]   ;;  %s524_s3 = inlined_call_operand.vmem [shape: f32[64,256], index: 3, kind: output, shape index: {}]  }
   0x1   :  { %v300_v0 = vld [vmem:[%s521_s1 + $0x70] sm:$0xf]  ;;  %v325_v1 = vld [vmem:[%s521_s1 + $0x74] sm:$0xf0]  ;;  %v324_v2 = vld [vmem:[%s521_s1 + $0x74] sm:$0xf] }
   0x2   :  { %v301_v3 = vor.u32 %v325_v1, %v300_v0  ;;  %v302_v4 = vld [vmem:[%s521_s1 + $0x78] sm:$0xf0]  ;;  %v292_v5 = vld [vmem:[%s521_s1 + $0x60] sm:$0xf]  ;;  %v323_v6 = vld [vmem:[%s521_s1 + $0x64] sm:$0xf0] }
   0x3   :  { %v305_v7 = vor.u32 %v324_v2, %v302_v4  ;;  %v322_v8 = vld [vmem:[%s521_s1 + $0x64] sm:$0xf]  ;;  %v294_v9 = vld [vmem:[%s521_s1 + $0x68] sm:$0xf0]  ;;  %v293_v10 = vor.u32 %v323_v6, %v292_v5  ;;  %v284_v12 = vld [vmem:[%s521_s1 + $0x50] sm:$0xf] }
   0x4   :  { %148 = vmatpush.bf16.msra.mxu0 %v301_v3  ;;  %326 = vmatpush.bf16.msra.mxu2 %v301_v3  ;;  %v297_v11 = vor.u32 %v322_v8, %v294_v9  ;;  %v321_v13 = vld [vmem:[%s521_s1 + $0x54] sm:$0xf0]  ;;  %v320_v14 = vld [vmem:[%s521_s1 + $0x54] sm:$0xf]  ;;  %v286_v15 = vld [vmem:[%s521_s1 + $0x58] sm:$0xf0] }
   0x5   :  { %177 = vmatpush.bf16.msra.mxu1 %v305_v7  ;;  %334 = vmatpush.bf16.msra.mxu3 %v305_v7  ;;  %v285_v16 = vor.u32 %v321_v13, %v284_v12  ;;  %v289_v17 = vor.u32 %v320_v14, %v286_v15  ;;  %v276_v18 = vld [vmem:[%s521_s1 + $0x40] sm:$0xf]  ;;  %v319_v19 = vld [vmem:[%s521_s1 + $0x44] sm:$0xf0]  ;;  %v318_v20 = vld [vmem:[%s521_s1 + $0x44] sm:$0xf] }
   0x6   :  { %v278_v21 = vld [vmem:[%s521_s1 + $0x48] sm:$0xf0]  ;;  %v277_v22 = vor.u32 %v319_v19, %v276_v18  ;;  %v268_v24 = vld [vmem:[%s521_s1 + $0x30] sm:$0xf]  ;;  %v317_v25 = vld [vmem:[%s521_s1 + $0x34] sm:$0xf0] }
   0x7   :  { %v281_v23 = vor.u32 %v318_v20, %v278_v21  ;;  %v316_v26 = vld [vmem:[%s521_s1 + $0x34] sm:$0xf]  ;;  %v270_v27 = vld [vmem:[%s521_s1 + $0x38] sm:$0xf0]  ;;  %v269_v28 = vor.u32 %v317_v25, %v268_v24  ;;  %v260_v30 = vld [vmem:[%s521_s1 + $0x20] sm:$0xf] }
   0x8   :  { %149 = vmatpush.bf16.msra.mxu0 %v293_v10  ;;  %327 = vmatpush.bf16.msra.mxu2 %v293_v10  ;;  %v273_v29 = vor.u32 %v316_v26, %v270_v27  ;;  %v315_v31 = vld [vmem:[%s521_s1 + $0x24] sm:$0xf0]  ;;  %v314_v32 = vld [vmem:[%s521_s1 + $0x24] sm:$0xf]  ;;  %v262_v33 = vld [vmem:[%s521_s1 + $0x28] sm:$0xf0] }
   0x9   :  { %178 = vmatpush.bf16.msra.mxu1 %v297_v11  ;;  %335 = vmatpush.bf16.msra.mxu3 %v297_v11  ;;  %v261_v34 = vor.u32 %v315_v31, %v260_v30  ;;  %v265_v35 = vor.u32 %v314_v32, %v262_v33  ;;  %v252_v36 = vld [vmem:[%s521_s1 + $0x10] sm:$0xf]  ;;  %v313_v37 = vld [vmem:[%s521_s1 + $0x14] sm:$0xf0]  ;;  %v312_v38 = vld [vmem:[%s521_s1 + $0x14] sm:$0xf] }
   0xa   :  { %v254_v39 = vld [vmem:[%s521_s1 + $0x18] sm:$0xf0]  ;;  %v253_v40 = vor.u32 %v313_v37, %v252_v36  ;;  %v244_v42 = vld [vmem:[%s521_s1] sm:$0xf]  ;;  %v311_v43 = vld [vmem:[%s521_s1 + $0x4] sm:$0xf0] }
   0xb   :  { %v257_v41 = vor.u32 %v312_v38, %v254_v39  ;;  %v310_v44 = vld [vmem:[%s521_s1 + $0x4] sm:$0xf]  ;;  %v246_v45 = vld [vmem:[%s521_s1 + $0x8] sm:$0xf0]  ;;  %v245_v46 = vor.u32 %v311_v43, %v244_v42  ;;  %v308_v49 = vld [vmem:[%s522_s0 + $0x10] sm:$0xff] }
   0xc   :  { %150 = vmatpush.bf16.msra.mxu0 %v285_v16  ;;  %328 = vmatpush.bf16.msra.mxu2 %v285_v16  ;;  %v249_v47 = vor.u32 %v310_v44, %v246_v45  ;;  %v306_v48 = vld [vmem:[%s522_s0] sm:$0xff]  ;;  %v307_v50 = vld [vmem:[%s522_s0 + $0x8] sm:$0xff]  ;;  %v309_v51 = vld [vmem:[%s522_s0 + $0x18] sm:$0xff] }
   0xd   :  { %179 = vmatpush.bf16.msra.mxu1 %v289_v17  ;;  %336 = vmatpush.bf16.msra.mxu3 %v289_v17  ;;  %v38_v52 = vld [vmem:[%s523_s2] sm:$0x3] }
   0xe   :  { %v40_v53 = vperm.slane %v38_v52, 0  ;;  %v41_v54 = vperm.slane %v38_v52, 1 }
  0x10   :  { %151 = vmatpush.bf16.msra.mxu0 %v277_v22  ;;  %329 = vmatpush.bf16.msra.mxu2 %v277_v22 }
  0x11   :  { %180 = vmatpush.bf16.msra.mxu1 %v281_v23  ;;  %337 = vmatpush.bf16.msra.mxu3 %v281_v23 }
  0x14   :  { %152 = vmatpush.bf16.msra.mxu0 %v269_v28  ;;  %330 = vmatpush.bf16.msra.mxu2 %v269_v28 }
  0x15   :  { %181 = vmatpush.bf16.msra.mxu1 %v273_v29  ;;  %338 = vmatpush.bf16.msra.mxu3 %v273_v29 }
  0x18   :  { %153 = vmatpush.bf16.msra.mxu0 %v261_v34  ;;  %331 = vmatpush.bf16.msra.mxu2 %v261_v34 }
  0x19   :  { %182 = vmatpush.bf16.msra.mxu1 %v265_v35  ;;  %339 = vmatpush.bf16.msra.mxu3 %v265_v35 }
  0x1c   :  { %154 = vmatpush.bf16.msra.mxu0 %v253_v40  ;;  %332 = vmatpush.bf16.msra.mxu2 %v253_v40 }
  0x1d   :  { %183 = vmatpush.bf16.msra.mxu1 %v257_v41  ;;  %340 = vmatpush.bf16.msra.mxu3 %v257_v41 }
  0x20   :  { %155 = vmatpush.bf16.msra.mxu0 %v245_v46  ;;  %333 = vmatpush.bf16.msra.mxu2 %v245_v46 }
  0x21   :  { %184 = vmatpush.bf16.msra.mxu1 %v249_v47  ;;  %341 = vmatpush.bf16.msra.mxu3 %v249_v47 }
  0x23   :  { %156 = vmatmul.bf16.vlgmr.msra.gmra.mxu0 %v306_v48  ;;  %166 = vmatmul.bf16.vlgmr.msra.gmra.mxu2 %v308_v49 }
  0x24   :  { %185 = vmatmul.bf16.vlgmr.msra.gmra.mxu1 %v306_v48  ;;  %195 = vmatmul.bf16.vlgmr.msra.gmra.mxu3 %v308_v49 }
  0x33   :  { %161 = vmatmul.bf16.gmra.mxu0 %v307_v50  ;;  %171 = vmatmul.bf16.gmra.mxu2 %v309_v51 }
  0x34   :  { %190 = vmatmul.bf16.gmra.mxu1 %v307_v50  ;;  %200 = vmatmul.bf16.gmra.mxu3 %v309_v51 }
  0xa0   :  { %v157_v55 = vpop.f32.mrf.mxu0 }
  0xa1   :  { %v158_v56 = vadd.f32 %v157_v55, %v40_v53  ;;  %v186_v57 = vpop.f32.mrf.mxu1 }
  0xa2   :  { %v187_v58 = vadd.f32 %v186_v57, %v41_v54 }
  0xa3   :  { %206 = vst [vmem:[%s524_s3] sm:$0xff] %v158_v56 }
  0xa4   :  { %207 = vst [vmem:[%s524_s3 + $0x8] sm:$0xff] %v187_v58 }
  0xa6   :  { %v167_v59 = vpop.f32.mrf.mxu2 }
  0xa7   :  { %v168_v60 = vadd.f32 %v167_v59, %v40_v53  ;;  %v196_v61 = vpop.f32.mrf.mxu3 }
  0xa8   :  { %v197_v62 = vadd.f32 %v196_v61, %v41_v54  ;;  %v159_v63 = vpop.f32.mrf.mxu0 }
  0xa9   :  { %214 = vst [vmem:[%s524_s3 + $0x40] sm:$0xff] %v168_v60  ;;  %v160_v0 = vadd.f32 %v159_v63, %v40_v53  ;;  %v188_v1 = vpop.f32.mrf.mxu1 }
  0xaa   :  { %215 = vst [vmem:[%s524_s3 + $0x48] sm:$0xff] %v197_v62  ;;  %v189_v2 = vadd.f32 %v188_v1, %v41_v54 }
  0xab   :  { %208 = vst [vmem:[%s524_s3 + $0x10] sm:$0xff] %v160_v0 }
  0xac   :  { %209 = vst [vmem:[%s524_s3 + $0x18] sm:$0xff] %v189_v2 }
  0xae   :  { %v169_v3 = vpop.f32.mrf.mxu2 }
  0xaf   :  { %v170_v4 = vadd.f32 %v169_v3, %v40_v53  ;;  %v198_v5 = vpop.f32.mrf.mxu3 }
  0xb0   :  { %v199_v6 = vadd.f32 %v198_v5, %v41_v54  ;;  %v162_v7 = vpop.f32.mrf.mxu0 }
  0xb1   :  { %216 = vst [vmem:[%s524_s3 + $0x50] sm:$0xff] %v170_v4  ;;  %v163_v8 = vadd.f32 %v162_v7, %v40_v53  ;;  %v191_v9 = vpop.f32.mrf.mxu1 }
  0xb2   :  { %217 = vst [vmem:[%s524_s3 + $0x58] sm:$0xff] %v199_v6  ;;  %v192_v10 = vadd.f32 %v191_v9, %v41_v54 }
  0xb3   :  { %210 = vst [vmem:[%s524_s3 + $0x20] sm:$0xff] %v163_v8 }
  0xb4   :  { %211 = vst [vmem:[%s524_s3 + $0x28] sm:$0xff] %v192_v10 }
  0xb6   :  { %v172_v11 = vpop.f32.mrf.mxu2 }
  0xb7   :  { %v173_v12 = vadd.f32 %v172_v11, %v40_v53  ;;  %v201_v13 = vpop.f32.mrf.mxu3 }
  0xb8   :  { %v202_v14 = vadd.f32 %v201_v13, %v41_v54  ;;  %v164_v15 = vpop.f32.mrf.mxu0 }
  0xb9   :  { %218 = vst [vmem:[%s524_s3 + $0x60] sm:$0xff] %v173_v12  ;;  %v165_v16 = vadd.f32 %v164_v15, %v40_v53  ;;  %v193_v17 = vpop.f32.mrf.mxu1 }
  0xba   :  { %219 = vst [vmem:[%s524_s3 + $0x68] sm:$0xff] %v202_v14  ;;  %v194_v18 = vadd.f32 %v193_v17, %v41_v54 }
  0xbb   :  { %212 = vst [vmem:[%s524_s3 + $0x30] sm:$0xff] %v165_v16 }
  0xbc   :  { %213 = vst [vmem:[%s524_s3 + $0x38] sm:$0xff] %v194_v18 }
  0xbe   :  { %v174_v19 = vpop.f32.mrf.mxu2 }
  0xbf   :  { %v175_v20 = vadd.f32 %v174_v19, %v40_v53  ;;  %v203_v21 = vpop.f32.mrf.mxu3 }
  0xc0   :  { %v204_v22 = vadd.f32 %v203_v21, %v41_v54 }
  0xc1   :  { %220 = vst [vmem:[%s524_s3 + $0x70] sm:$0xff] %v175_v20 }
  0xc2   :  { %221 = vst [vmem:[%s524_s3 + $0x78] sm:$0xff] %v204_v22 }

// kernel: chatbot_forward.2
= control target key start
LH: loop header
LB: loop body
LE: loop exit
PB: predicated region body
PF: predicated region fallthrough
CT: control target
= control target key end

     0   :  { %vm80_vm0 = vcmask 130048   ;;  %s5684_s1 = inlined_call_operand.vmem [shape: bf16[16,512], index: 1, kind: input, shape index: {}]   ;;  %s5685_s0 = inlined_call_operand.vmem [shape: bf16[1,64,16], index: 0, kind: input, shape index: {}]   ;;  %s5686_s2 = inlined_call_operand.vmem [shape: bf16[128,512], index: 2, kind: input, shape index: {}]   ;;  %s5687_s3 = inlined_call_operand.vmem [shape: f32[1,512], index: 3, kind: input, shape index: {}]   ;;  %s5688_s4 = inlined_call_operand.vmem [shape: bf16[1,64,128], index: 4, kind: output, shape index: {}]  }
   0x1   :  { %v2477_v0 = vld [vmem:[%s5684_s1] sm:$0xf]  ;;  %v3544_v1 = vld [vmem:[%s5684_s1 + $0xc] sm:$0xf0]  ;;  %v3542_v2 = vld [vmem:[%s5684_s1 + $0x4] sm:$0xf] }
   0x2   :  { %v2478_v3 = vor.u32 %v3544_v1, %v2477_v0  ;;  %v2479_v4 = vld [vmem:[%s5684_s1 + $0x10] sm:$0xf0]  ;;  %v2485_v5 = vld [vmem:[%s5684_s1 + $0x8] sm:$0xf]  ;;  %v3545_v6 = vld [vmem:[%s5684_s1 + $0x14] sm:$0xf0] }
   0x3   :  { %v2482_v7 = vor.u32 %v3542_v2, %v2479_v4  ;;  %v2486_v8 = vor.u32 %v3545_v6, %v2485_v5  ;;  %v3543_v9 = vld [vmem:[%s5684_s1 + $0xc] sm:$0xf]  ;;  %v2487_v10 = vld [vmem:[%s5684_s1 + $0x18] sm:$0xf0]  ;;  %v3538_v11 = vld [vmem:[%s5685_s0] sm:$0xff] }
   0x4   :  { %100 = vmatpush.bf16.msra.mxu0 %v2478_v3  ;;  %v2490_v12 = vor.u32 %v3543_v9, %v2487_v10  ;;  %v2621_v13 = vld [vmem:[%s5686_s2 + $0xe0] sm:$0xf]  ;;  %v3576_v14 = vld [vmem:[%s5686_s2 + $0xec] sm:$0xf0]  ;;  %v3574_v15 = vld [vmem:[%s5686_s2 + $0xe4] sm:$0xf] }
   0x5   :  { %129 = vmatpush.bf16.msra.mxu1 %v2482_v7  ;;  %158 = vmatpush.bf16.msra.mxu2 %v2486_v8  ;;  %v2622_v16 = vor.u32 %v3576_v14, %v2621_v13  ;;  %v2623_v17 = vld [vmem:[%s5686_s2 + $0xf0] sm:$0xf0]  ;;  %v2629_v18 = vld [vmem:[%s5686_s2 + $0xe8] sm:$0xf]  ;;  %v3577_v19 = vld [vmem:[%s5686_s2 + $0xf4] sm:$0xf0] }
   0x6   :  { %187 = vmatpush.bf16.msra.mxu3 %v2490_v12  ;;  %v2626_v20 = vor.u32 %v3574_v15, %v2623_v17  ;;  %v2630_v21 = vor.u32 %v3577_v19, %v2629_v18  ;;  %v3575_v22 = vld [vmem:[%s5686_s2 + $0xec] sm:$0xf]  ;;  %v2631_v23 = vld [vmem:[%s5686_s2 + $0xf8] sm:$0xf0]  ;;  %v2605_v24 = vld [vmem:[%s5686_s2 + $0xc0] sm:$0xf] }
   0x7   :  { %2491 = vmatmul.msk.bf16.vlgmr.msra.gmra.mxu0 %vm80_vm0, %v3538_v11  ;;  %v2634_v25 = vor.u32 %v3575_v22, %v2631_v23  ;;  %v3572_v26 = vld [vmem:[%s5686_s2 + $0xcc] sm:$0xf0]  ;;  %v3570_v27 = vld [vmem:[%s5686_s2 + $0xc4] sm:$0xf]  ;;  %v2607_v28 = vld [vmem:[%s5686_s2 + $0xd0] sm:$0xf0] }
   0x8   :  { %2495 = vmatmul.msk.bf16.vlgmr.msra.gmra.mxu1 %vm80_vm0, %v3538_v11  ;;  %2499 = vmatmul.msk.bf16.vlgmr.msra.gmra.mxu2 %vm80_vm0, %v3538_v11  ;;  %v2613_v29 = vld [vmem:[%s5686_s2 + $0xc8] sm:$0xf]  ;;  %v3573_v30 = vld [vmem:[%s5686_s2 + $0xd4] sm:$0xf0]  ;;  %v3571_v31 = vld [vmem:[%s5686_s2 + $0xcc] sm:$0xf]  ;;  %v2606_v32 = vor.u32 %v3572_v26, %v2605_v24  ;;  %v2610_v34 = vor.u32 %v3570_v27, %v2607_v28 }
   0x9   :  { %2503 = vmatmul.msk.bf16.vlgmr.msra.gmra.mxu3 %vm80_vm0, %v3538_v11  ;;  %440 = vmatpush.bf16.msrb.mxu0 %v2622_v16  ;;  %v2615_v33 = vld [vmem:[%s5686_s2 + $0xd8] sm:$0xf0]  ;;  %v2614_v35 = vor.u32 %v3573_v30, %v2613_v29  ;;  %v2589_v36 = vld [vmem:[%s5686_s2 + $0xa0] sm:$0xf]  ;;  %v3568_v37 = vld [vmem:[%s5686_s2 + $0xac] sm:$0xf0] }
   0xa   :  { %453 = vmatpush.bf16.msrb.mxu1 %v2626_v20  ;;  %466 = vmatpush.bf16.msrb.mxu2 %v2630_v21  ;;  %v3566_v38 = vld [vmem:[%s5686_s2 + $0xa4] sm:$0xf]  ;;  %v2618_v39 = vor.u32 %v3571_v31, %v2615_v33  ;;  %v2591_v40 = vld [vmem:[%s5686_s2 + $0xb0] sm:$0xf0]  ;;  %v2597_v41 = vld [vmem:[%s5686_s2 + $0xa8] sm:$0xf]  ;;  %v2590_v45 = vor.u32 %v3568_v37, %v2589_v36 }
   0xb   :  { %479 = vmatpush.bf16.msrb.mxu3 %v2634_v25  ;;  %v3569_v42 = vld [vmem:[%s5686_s2 + $0xb4] sm:$0xf0]  ;;  %v3567_v43 = vld [vmem:[%s5686_s2 + $0xac] sm:$0xf]  ;;  %v2599_v44 = vld [vmem:[%s5686_s2 + $0xb8] sm:$0xf0]  ;;  %v2594_v46 = vor.u32 %v3566_v38, %v2591_v40 }
   0xc   :  { %v2598_v47 = vor.u32 %v3569_v42, %v2597_v41  ;;  %v2573_v48 = vld [vmem:[%s5686_s2 + $0x80] sm:$0xf]  ;;  %v3564_v49 = vld [vmem:[%s5686_s2 + $0x8c] sm:$0xf0]  ;;  %v3562_v50 = vld [vmem:[%s5686_s2 + $0x84] sm:$0xf]  ;;  %v2602_v51 = vor.u32 %v3567_v43, %v2599_v44 }
   0xd   :  { %441 = vmatpush.bf16.msrb.mxu0 %v2606_v32  ;;  %v2575_v52 = vld [vmem:[%s5686_s2 + $0x90] sm:$0xf0]  ;;  %v2581_v53 = vld [vmem:[%s5686_s2 + $0x88] sm:$0xf]  ;;  %v3565_v54 = vld [vmem:[%s5686_s2 + $0x94] sm:$0xf0]  ;;  %v2574_v58 = vor.u32 %v3564_v49, %v2573_v48 }
   0xe   :  { %454 = vmatpush.bf16.msrb.mxu1 %v2610_v34  ;;  %467 = vmatpush.bf16.msrb.mxu2 %v2614_v35  ;;  %v3563_v55 = vld [vmem:[%s5686_s2 + $0x8c] sm:$0xf]  ;;  %v2583_v56 = vld [vmem:[%s5686_s2 + $0x98] sm:$0xf0]  ;;  %v2578_v59 = vor.u32 %v3562_v50, %v2575_v52  ;;  %v2582_v60 = vor.u32 %v3565_v54, %v2581_v53  ;;  %v2557_v61 = vld [vmem:[%s5686_s2 + $0x60] sm:$0xf] }
   0xf   :  { %480 = vmatpush.bf16.msrb.mxu3 %v2618_v39  ;;  %v3539_v57 = vld [vmem:[%s5685_s0 + $0x8] sm:$0xff]  ;;  %v3560_v62 = vld [vmem:[%s5686_s2 + $0x6c] sm:$0xf0]  ;;  %v3558_v63 = vld [vmem:[%s5686_s2 + $0x64] sm:$0xf]  ;;  %v2586_v0 = vor.u32 %v3563_v55, %v2583_v56  ;;  %v3883_v48 = vmov 0  }
  0x10   :  { %v2559_v1 = vld [vmem:[%s5686_s2 + $0x70] sm:$0xf0]  ;;  %v2565_v2 = vld [vmem:[%s5686_s2 + $0x68] sm:$0xf]  ;;  %v3561_v3 = vld [vmem:[%s5686_s2 + $0x74] sm:$0xf0]  ;;  %v2558_v6 = vor.u32 %v3560_v62, %v2557_v61 }
  0x11   :  { %442 = vmatpush.bf16.msrb.mxu0 %v2590_v45  ;;  %v3559_v4 = vld [vmem:[%s5686_s2 + $0x6c] sm:$0xf]  ;;  %v2567_v5 = vld [vmem:[%s5686_s2 + $0x78] sm:$0xf0]  ;;  %v2562_v7 = vor.u32 %v3558_v63, %v2559_v1  ;;  %v2566_v8 = vor.u32 %v3561_v3, %v2565_v2  ;;  %v2541_v9 = vld [vmem:[%s5686_s2 + $0x40] sm:$0xf] }
  0x12   :  { %455 = vmatpush.bf16.msrb.mxu1 %v2594_v46  ;;  %468 = vmatpush.bf16.msrb.mxu2 %v2598_v47  ;;  %v3556_v10 = vld [vmem:[%s5686_s2 + $0x4c] sm:$0xf0]  ;;  %v3554_v11 = vld [vmem:[%s5686_s2 + $0x44] sm:$0xf]  ;;  %v2570_v12 = vor.u32 %v3559_v4, %v2567_v5  ;;  %v2543_v13 = vld [vmem:[%s5686_s2 + $0x50] sm:$0xf0] }
  0x13   :  { %481 = vmatpush.bf16.msrb.mxu3 %v2602_v51  ;;  %v2549_v14 = vld [vmem:[%s5686_s2 + $0x48] sm:$0xf]  ;;  %v3557_v15 = vld [vmem:[%s5686_s2 + $0x54] sm:$0xf0]  ;;  %v3555_v16 = vld [vmem:[%s5686_s2 + $0x4c] sm:$0xf]  ;;  %v2542_v18 = vor.u32 %v3556_v10, %v2541_v9  ;;  %v2546_v19 = vor.u32 %v3554_v11, %v2543_v13 }
  0x14   :  { %v2551_v17 = vld [vmem:[%s5686_s2 + $0x58] sm:$0xf0]  ;;  %v2550_v20 = vor.u32 %v3557_v15, %v2549_v14  ;;  %v2525_v21 = vld [vmem:[%s5686_s2 + $0x20] sm:$0xf]  ;;  %v3552_v22 = vld [vmem:[%s5686_s2 + $0x2c] sm:$0xf0] }
  0x15   :  { %443 = vmatpush.bf16.msrb.mxu0 %v2574_v58  ;;  %v3550_v23 = vld [vmem:[%s5686_s2 + $0x24] sm:$0xf]  ;;  %v2554_v24 = vor.u32 %v3555_v16, %v2551_v17  ;;  %v2527_v25 = vld [vmem:[%s5686_s2 + $0x30] sm:$0xf0]  ;;  %v2533_v26 = vld [vmem:[%s5686_s2 + $0x28] sm:$0xf]  ;;  %v2526_v30 = vor.u32 %v3552_v22, %v2525_v21 }
  0x16   :  { %456 = vmatpush.bf16.msrb.mxu1 %v2578_v59  ;;  %469 = vmatpush.bf16.msrb.mxu2 %v2582_v60  ;;  %v3553_v27 = vld [vmem:[%s5686_s2 + $0x34] sm:$0xf0]  ;;  %v3551_v28 = vld [vmem:[%s5686_s2 + $0x2c] sm:$0xf]  ;;  %v2535_v29 = vld [vmem:[%s5686_s2 + $0x38] sm:$0xf0]  ;;  %v2530_v31 = vor.u32 %v3550_v23, %v2527_v25 }
  0x17   :  { %2492 = vmatmul.msk.bf16.gmra.mxu0 %vm80_vm0, %v3539_v57  ;;  %482 = vmatpush.bf16.msrb.mxu3 %v2586_v0  ;;  %v2534_v32 = vor.u32 %v3553_v27, %v2533_v26  ;;  %v2509_v33 = vld [vmem:[%s5686_s2] sm:$0xf]  ;;  %v3548_v34 = vld [vmem:[%s5686_s2 + $0xc] sm:$0xf0]  ;;  %v3546_v35 = vld [vmem:[%s5686_s2 + $0x4] sm:$0xf]  ;;  %v2538_v36 = vor.u32 %v3551_v28, %v2535_v29 }
  0x18   :  { %2496 = vmatmul.msk.bf16.gmra.mxu1 %vm80_vm0, %v3539_v57  ;;  %2500 = vmatmul.msk.bf16.gmra.mxu2 %vm80_vm0, %v3539_v57  ;;  %v2511_v37 = vld [vmem:[%s5686_s2 + $0x10] sm:$0xf0]  ;;  %v2517_v38 = vld [vmem:[%s5686_s2 + $0x8] sm:$0xf]  ;;  %v3549_v39 = vld [vmem:[%s5686_s2 + $0x14] sm:$0xf0]  ;;  %v2510_v42 = vor.u32 %v3548_v34, %v2509_v33 }
  0x19   :  { %2504 = vmatmul.msk.bf16.gmra.mxu3 %vm80_vm0, %v3539_v57  ;;  %444 = vmatpush.bf16.msrb.mxu0 %v2558_v6  ;;  %v3547_v40 = vld [vmem:[%s5686_s2 + $0xc] sm:$0xf]  ;;  %v2519_v41 = vld [vmem:[%s5686_s2 + $0x18] sm:$0xf0]  ;;  %v2514_v43 = vor.u32 %v3546_v35, %v2511_v37  ;;  %v2518_v44 = vor.u32 %v3549_v39, %v2517_v38  ;;  %v3540_v45 = vld [vmem:[%s5685_s0 + $0x10] sm:$0xff] }
  0x1a   :  { %457 = vmatpush.bf16.msrb.mxu1 %v2562_v7  ;;  %470 = vmatpush.bf16.msrb.mxu2 %v2566_v8  ;;  %v2522_v46 = vor.u32 %v3547_v40, %v2519_v41  ;;  %v3541_v47 = vld [vmem:[%s5685_s0 + $0x18] sm:$0xff]  ;;  %v30_v51 = vld [vmem:[%s5687_s3] sm:$0xf]  ;;  %v3608_v16 = vld [vmem:[%s5686_s2 + $0xec] sm:$0xf0] }
  0x1b   :  { %483 = vmatpush.bf16.msrb.mxu3 %v2570_v12  ;;  %v4160_v52 = vperm.slane %v30_v51, 0  ;;  %v4164_v54 = vperm.slane %v30_v51, 1  ;;  %v4174_v60 = vperm.slane %v30_v51, 2  ;;  %v4176_v61 = vperm.slane %v30_v51, 3  ;;  %v2749_v15 = vld [vmem:[%s5686_s2 + $0xe0] sm:$0xf] }
  0x1c   :  { %v3606_v17 = vld [vmem:[%s5686_s2 + $0xe4] sm:$0xf]  ;;  %v2750_v21 = vor.u32 %v3608_v16, %v2749_v15  ;;  %v2751_v22 = vld [vmem:[%s5686_s2 + $0xf0] sm:$0xf0]  ;;  %v2757_v23 = vld [vmem:[%s5686_s2 + $0xe8] sm:$0xf] }
  0x1d   :  { %445 = vmatpush.bf16.msrb.mxu0 %v2542_v18  ;;  %v2754_v28 = vor.u32 %v3606_v17, %v2751_v22  ;;  %v2733_v34 = vld [vmem:[%s5686_s2 + $0xc0] sm:$0xf]  ;;  %v3604_v35 = vld [vmem:[%s5686_s2 + $0xcc] sm:$0xf0]  ;;  %v2735_v38 = vld [vmem:[%s5686_s2 + $0xd0] sm:$0xf0] }
  0x1e   :  { %458 = vmatpush.bf16.msrb.mxu1 %v2546_v19  ;;  %471 = vmatpush.bf16.msrb.mxu2 %v2550_v20  ;;  %v2734_v37 = vor.u32 %v3604_v35, %v2733_v34  ;;  %v2741_v39 = vld [vmem:[%s5686_s2 + $0xc8] sm:$0xf]  ;;  %v3605_v40 = vld [vmem:[%s5686_s2 + $0xd4] sm:$0xf0]  ;;  %v3598_v51 = vld [vmem:[%s5686_s2 + $0xa4] sm:$0xf] }
  0x1f   :  { %484 = vmatpush.bf16.msrb.mxu3 %v2554_v24  ;;  %v3609_v24 = vld [vmem:[%s5686_s2 + $0xf4] sm:$0xf0]  ;;  %v3599_v16 = vld [vmem:[%s5686_s2 + $0xac] sm:$0xf]  ;;  %v2727_v17 = vld [vmem:[%s5686_s2 + $0xb8] sm:$0xf0] }
  0x20   :  { %v2758_v29 = vor.u32 %v3609_v24, %v2757_v23  ;;  %v3596_v22 = vld [vmem:[%s5686_s2 + $0x8c] sm:$0xf0]  ;;  %v3594_v23 = vld [vmem:[%s5686_s2 + $0x84] sm:$0xf]  ;;  %v2711_v34 = vld [vmem:[%s5686_s2 + $0x98] sm:$0xf0] }
  0x21   :  { %446 = vmatpush.bf16.msrb.mxu0 %v2526_v30  ;;  %v3607_v30 = vld [vmem:[%s5686_s2 + $0xec] sm:$0xf] }
  0x22   :  { %459 = vmatpush.bf16.msrb.mxu1 %v2530_v31  ;;  %472 = vmatpush.bf16.msrb.mxu2 %v2534_v32  ;;  %v2759_v31 = vld [vmem:[%s5686_s2 + $0xf8] sm:$0xf0] }
  0x23   :  { %485 = vmatpush.bf16.msrb.mxu3 %v2538_v36  ;;  %v2762_v33 = vor.u32 %v3607_v30, %v2759_v31  ;;  %v3602_v36 = vld [vmem:[%s5686_s2 + $0xc4] sm:$0xf] }
  0x24   :  { %v2738_v41 = vor.u32 %v3602_v36, %v2735_v38  ;;  %v3592_v38 = vld [vmem:[%s5686_s2 + $0x6c] sm:$0xf0] }
  0x25   :  { %447 = vmatpush.bf16.msrb.mxu0 %v2510_v42  ;;  %v2742_v42 = vor.u32 %v3605_v40, %v2741_v39  ;;  %v3590_v39 = vld [vmem:[%s5686_s2 + $0x64] sm:$0xf] }
  0x26   :  { %460 = vmatpush.bf16.msrb.mxu1 %v2514_v43  ;;  %473 = vmatpush.bf16.msrb.mxu2 %v2518_v44  ;;  %v3603_v43 = vld [vmem:[%s5686_s2 + $0xcc] sm:$0xf]  ;;  %v2743_v44 = vld [vmem:[%s5686_s2 + $0xd8] sm:$0xf0] }
  0x27   :  { %2493 = vmatmul.msk.bf16.gmra.mxu0 %vm80_vm0, %v3540_v45  ;;  %486 = vmatpush.bf16.msrb.mxu3 %v2522_v46 }
  0x28   :  { %2497 = vmatmul.msk.bf16.gmra.mxu1 %vm80_vm0, %v3540_v45  ;;  %2501 = vmatmul.msk.bf16.gmra.mxu2 %vm80_vm0, %v3540_v45 }
  0x29   :  { %2505 = vmatmul.msk.bf16.gmra.mxu3 %vm80_vm0, %v3540_v45  ;;  %715 = vmatpush.bf16.msra.mxu0 %v2750_v21  ;;  %v2746_v45 = vor.u32 %v3603_v43, %v2743_v44  ;;  %v2701_v21 = vld [vmem:[%s5686_s2 + $0x80] sm:$0xf]  ;;  %v2687_v44 = vld [vmem:[%s5686_s2 + $0x70] sm:$0xf0] }
  0x2a   :  { %728 = vmatpush.bf16.msra.mxu1 %v2754_v28  ;;  %741 = vmatpush.bf16.msra.mxu2 %v2758_v29  ;;  %v2702_v24 = vor.u32 %v3596_v22, %v2701_v21  ;;  %v2709_v28 = vld [vmem:[%s5686_s2 + $0x88] sm:$0xf]  ;;  %v3597_v29 = vld [vmem:[%s5686_s2 + $0x94] sm:$0xf0] }
  0x2b   :  { %754 = vmatpush.bf16.msra.mxu3 %v2762_v33  ;;  %v2710_v31 = vor.u32 %v3597_v29, %v2709_v28  ;;  %v3595_v33 = vld [vmem:[%s5686_s2 + $0x8c] sm:$0xf]  ;;  %v3589_v21 = vld [vmem:[%s5686_s2 + $0x54] sm:$0xf0] }
  0x2c   :  { %v2714_v35 = vor.u32 %v3595_v33, %v2711_v34  ;;  %v3582_v33 = vld [vmem:[%s5686_s2 + $0x24] sm:$0xf] }
  0x2d   :  { %716 = vmatpush.bf16.msra.mxu0 %v2734_v37  ;;  %v2685_v37 = vld [vmem:[%s5686_s2 + $0x60] sm:$0xf] }
  0x2e   :  { %729 = vmatpush.bf16.msra.mxu1 %v2738_v41  ;;  %742 = vmatpush.bf16.msra.mxu2 %v2742_v42  ;;  %v2686_v43 = vor.u32 %v3592_v38, %v2685_v37  ;;  %v2655_v38 = vld [vmem:[%s5686_s2 + $0x30] sm:$0xf0] }
  0x2f   :  { %755 = vmatpush.bf16.msra.mxu3 %v2746_v45  ;;  %v2693_v45 = vld [vmem:[%s5686_s2 + $0x68] sm:$0xf] }
  0x37   :  { %2494 = vmatmul.msk.bf16.gmra.mxu0 %vm80_vm0, %v3541_v47 }
  0x38   :  { %2498 = vmatmul.msk.bf16.gmra.mxu1 %vm80_vm0, %v3541_v47  ;;  %2502 = vmatmul.msk.bf16.gmra.mxu2 %vm80_vm0, %v3541_v47 }
  0x39   :  { %2506 = vmatmul.msk.bf16.gmra.mxu3 %vm80_vm0, %v3541_v47  ;;  %v2717_v47 = vld [vmem:[%s5686_s2 + $0xa0] sm:$0xf] }
  0x47   :  { %448 = vmatmul.bf16.vlgmr.msrb.gmra.mxu0 %v3883_v48 }
  0x48   :  { %461 = vmatmul.bf16.vlgmr.msrb.gmra.mxu1 %v3883_v48  ;;  %474 = vmatmul.bf16.vlgmr.msrb.gmra.mxu2 %v3883_v48 }
  0x49   :  { %487 = vmatmul.bf16.vlgmr.msrb.gmra.mxu3 %v3883_v48  ;;  %v3600_v48 = vld [vmem:[%s5686_s2 + $0xac] sm:$0xf0] }
  0x84   :  { %v4153_v49 = vpop.f32.mrf.mxu0 }
  0x85   :  { %v4155_v50 = vpop.f32.mrf.mxu1 }
  0x8b   :  { %v4162_v53 = vpop.f32.mrf.mxu2 }
  0x8c   :  { %v4166_v55 = vpop.f32.mrf.mxu3  ;;  %v104_v56 = vpop.f32.mrf.mxu0 }
  0x8d   :  { %v4169_v57 = vadd.f32 %v104_v56, %v4160_v52  ;;  %v133_v58 = vpop.f32.mrf.mxu1 }
  0x8e   :  { %v4172_v59 = vadd.f32 %v133_v58, %v4164_v54 }
  0x93   :  { %v162_v62 = vpop.f32.mrf.mxu2 }
  0x94   :  { %v4179_v63 = vadd.f32 %v162_v62, %v4174_v60  ;;  %v191_v0 = vpop.f32.mrf.mxu3  ;;  %v107_v1 = vpop.f32.mrf.mxu0 }
  0x95   :  { %v4182_v2 = vadd.f32 %v191_v0, %v4176_v61  ;;  %v4185_v3 = vadd.f32 %v107_v1, %v4160_v52  ;;  %v136_v4 = vpop.f32.mrf.mxu1  ;;  %v2718_v0 = vor.u32 %v3600_v48, %v2717_v47  ;;  %v2719_v1 = vld [vmem:[%s5686_s2 + $0xb0] sm:$0xf0] }
  0x96   :  { %v4188_v5 = vadd.f32 %v136_v4, %v4164_v54  ;;  %v2725_v4 = vld [vmem:[%s5686_s2 + $0xa8] sm:$0xf] }
  0x97   :  { %717 = vmatpush.bf16.msra.mxu0 %v2718_v0  ;;  %v3591_v0 = vld [vmem:[%s5686_s2 + $0x6c] sm:$0xf] }
  0x9b   :  { %v165_v6 = vpop.f32.mrf.mxu2  ;;  %718 = vmatpush.bf16.msra.mxu0 %v2702_v24  ;;  %v3587_v24 = vld [vmem:[%s5686_s2 + $0x4c] sm:$0xf] }
  0x9c   :  { %v4191_v7 = vadd.f32 %v165_v6, %v4174_v60  ;;  %v194_v8 = vpop.f32.mrf.mxu3  ;;  %v109_v9 = vpop.f32.mrf.mxu0  ;;  %v3601_v6 = vld [vmem:[%s5686_s2 + $0xb4] sm:$0xf0] }
  0x9d   :  { %v4194_v10 = vadd.f32 %v194_v8, %v4176_v61  ;;  %v4197_v11 = vadd.f32 %v109_v9, %v4160_v52  ;;  %v138_v12 = vpop.f32.mrf.mxu1  ;;  %v2726_v15 = vor.u32 %v3601_v6, %v2725_v4 }
  0x9e   :  { %v4200_v13 = vadd.f32 %v138_v12, %v4164_v54 }
  0x9f   :  { %743 = vmatpush.bf16.msra.mxu2 %v2726_v15  ;;  %719 = vmatpush.bf16.msra.mxu0 %v2686_v43  ;;  %v3586_v15 = vld [vmem:[%s5686_s2 + $0x44] sm:$0xf] }
  0xa3   :  { %v167_v14 = vpop.f32.mrf.mxu2  ;;  %744 = vmatpush.bf16.msra.mxu2 %v2710_v31  ;;  %v3584_v31 = vld [vmem:[%s5686_s2 + $0x2c] sm:$0xf0] }
  0xa4   :  { %v4212_v18 = vadd.f32 %v167_v14, %v4174_v60  ;;  %v196_v19 = vpop.f32.mrf.mxu3  ;;  %v112_v20 = vpop.f32.mrf.mxu0  ;;  %v2722_v14 = vor.u32 %v3598_v51, %v2719_v1  ;;  %v2695_v1 = vld [vmem:[%s5686_s2 + $0x78] sm:$0xf0] }
  0xa5   :  { %v4224_v25 = vadd.f32 %v196_v19, %v4176_v61  ;;  %v4227_v26 = vadd.f32 %v112_v20, %v4160_v52  ;;  %v141_v27 = vpop.f32.mrf.mxu1  ;;  %v2730_v20 = vor.u32 %v3599_v16, %v2727_v17  ;;  %v2698_v6 = vor.u32 %v3591_v0, %v2695_v1  ;;  %v2671_v17 = vld [vmem:[%s5686_s2 + $0x50] sm:$0xf0]  ;;  %v2637_v1 = vld [vmem:[%s5686_s2] sm:$0xf] }
  0xa6   :  { %v4236_v32 = vadd.f32 %v141_v27, %v4164_v54  ;;  %730 = vmatpush.bf16.msra.mxu1 %v2722_v14  ;;  %v2703_v27 = vld [vmem:[%s5686_s2 + $0x90] sm:$0xf0]  ;;  %v3588_v14 = vld [vmem:[%s5686_s2 + $0x4c] sm:$0xf0]  ;;  %v2674_v22 = vor.u32 %v3586_v15, %v2671_v17  ;;  %v3581_v17 = vld [vmem:[%s5686_s2 + $0x14] sm:$0xf0] }
  0xa7   :  { %756 = vmatpush.bf16.msra.mxu3 %v2730_v20  ;;  %v2706_v30 = vor.u32 %v3594_v23, %v2703_v27  ;;  %v2677_v20 = vld [vmem:[%s5686_s2 + $0x48] sm:$0xf]  ;;  %v2679_v27 = vld [vmem:[%s5686_s2 + $0x58] sm:$0xf0]  ;;  %v2639_v15 = vld [vmem:[%s5686_s2 + $0x10] sm:$0xf0] }
  0xa8   :  { %v2678_v23 = vor.u32 %v3589_v21, %v2677_v20  ;;  %v2682_v28 = vor.u32 %v3587_v24, %v2679_v27  ;;  %v103_v27 = vadd.f32 %v4153_v49, %v4160_v52 }
  0xaa   :  { %731 = vmatpush.bf16.msra.mxu1 %v2706_v30  ;;  %v2653_v30 = vld [vmem:[%s5686_s2 + $0x20] sm:$0xf] }
  0xab   :  { %v170_v46 = vpop.f32.mrf.mxu2  ;;  %757 = vmatpush.bf16.msra.mxu3 %v2714_v35  ;;  %v2654_v37 = vor.u32 %v3584_v31, %v2653_v30 }
  0xac   :  { %v4272_v56 = vadd.f32 %v170_v46, %v4174_v60  ;;  %v199_v58 = vpop.f32.mrf.mxu3  ;;  %v114_v62 = vpop.f32.mrf.mxu0  ;;  %v3593_v46 = vld [vmem:[%s5686_s2 + $0x74] sm:$0xf0] }
  0xad   :  { %v4284_v8 = vadd.f32 %v199_v58, %v4176_v61  ;;  %v4287_v9 = vadd.f32 %v114_v62, %v4160_v52  ;;  %v143_v12 = vpop.f32.mrf.mxu1  ;;  %v2690_v58 = vor.u32 %v3590_v39, %v2687_v44  ;;  %v2694_v62 = vor.u32 %v3593_v46, %v2693_v45  ;;  %v2661_v39 = vld [vmem:[%s5686_s2 + $0x28] sm:$0xf] }
  0xae   :  { %v4296_v19 = vadd.f32 %v143_v12, %v4164_v54  ;;  %v2669_v12 = vld [vmem:[%s5686_s2 + $0x40] sm:$0xf]  ;;  %v2658_v45 = vor.u32 %v3582_v33, %v2655_v38 }
  0xaf   :  { %732 = vmatpush.bf16.msra.mxu1 %v2690_v58  ;;  %745 = vmatpush.bf16.msra.mxu2 %v2694_v62  ;;  %v2670_v16 = vor.u32 %v3588_v14, %v2669_v12  ;;  %v2663_v58 = vld [vmem:[%s5686_s2 + $0x38] sm:$0xf0]  ;;  %v3578_v12 = vld [vmem:[%s5686_s2 + $0x4] sm:$0xf] }
  0xb0   :  { %758 = vmatpush.bf16.msra.mxu3 %v2698_v6  ;;  %v3580_v6 = vld [vmem:[%s5686_s2 + $0xc] sm:$0xf0]  ;;  %v2642_v20 = vor.u32 %v3578_v12, %v2639_v15 }
  0xb1   :  { %720 = vmatpush.bf16.msra.mxu0 %v2670_v16  ;;  %v2638_v14 = vor.u32 %v3580_v6, %v2637_v1  ;;  %v2645_v16 = vld [vmem:[%s5686_s2 + $0x8] sm:$0xf] }
  0xb2   :  { %v2646_v21 = vor.u32 %v3581_v17, %v2645_v16 }
  0xb3   :  { %v172_v36 = vpop.f32.mrf.mxu2  ;;  %733 = vmatpush.bf16.msra.mxu1 %v2674_v22  ;;  %746 = vmatpush.bf16.msra.mxu2 %v2678_v23  ;;  %v3579_v22 = vld [vmem:[%s5686_s2 + $0xc] sm:$0xf]  ;;  %v2647_v23 = vld [vmem:[%s5686_s2 + $0x18] sm:$0xf0] }
  0xb4   :  { %v4332_v40 = vadd.f32 %v172_v36, %v4174_v60  ;;  %v201_v41 = vpop.f32.mrf.mxu3  ;;  %v117_v42 = vpop.f32.mrf.mxu0  ;;  %759 = vmatpush.bf16.msra.mxu3 %v2682_v28  ;;  %v2650_v24 = vor.u32 %v3579_v22, %v2647_v23 }
  0xb5   :  { %v4344_v47 = vadd.f32 %v201_v41, %v4176_v61  ;;  %v4347_v48 = vadd.f32 %v117_v42, %v4160_v52  ;;  %v146_v51 = vpop.f32.mrf.mxu1  ;;  %v3585_v41 = vld [vmem:[%s5686_s2 + $0x34] sm:$0xf0]  ;;  %721 = vmatpush.bf16.msra.mxu0 %v2654_v37 }
  0xb6   :  { %v4356_v4 = vadd.f32 %v146_v51, %v4164_v54  ;;  %v2662_v46 = vor.u32 %v3585_v41, %v2661_v39  ;;  %v3583_v51 = vld [vmem:[%s5686_s2 + $0x2c] sm:$0xf] }
  0xb7   :  { %v2666_v0 = vor.u32 %v3583_v51, %v2663_v58  ;;  %734 = vmatpush.bf16.msra.mxu1 %v2658_v45 }
  0xb8   :  { %747 = vmatpush.bf16.msra.mxu2 %v2662_v46 }
  0xb9   :  { %760 = vmatpush.bf16.msra.mxu3 %v2666_v0  ;;  %722 = vmatpush.bf16.msra.mxu0 %v2638_v14 }
  0xbb   :  { %v175_v29 = vpop.f32.mrf.mxu2  ;;  %735 = vmatpush.bf16.msra.mxu1 %v2642_v20 }
  0xbc   :  { %v4392_v34 = vadd.f32 %v175_v29, %v4174_v60  ;;  %v204_v35 = vpop.f32.mrf.mxu3  ;;  %v119_v36 = vpop.f32.mrf.mxu0  ;;  %748 = vmatpush.bf16.msra.mxu2 %v2646_v21  ;;  %v132_v29 = vadd.f32 %v4155_v50, %v4164_v54  ;;  %v190_v50 = vadd.f32 %v4166_v55, %v4176_v61 }
  0xbd   :  { %v4404_v42 = vadd.f32 %v204_v35, %v4176_v61  ;;  %v4407_v43 = vadd.f32 %v119_v36, %v4160_v52  ;;  %v148_v44 = vpop.f32.mrf.mxu1  ;;  %761 = vmatpush.bf16.msra.mxu3 %v2650_v24  ;;  %v161_v52 = vadd.f32 %v4162_v53, %v4174_v60 }
  0xbe   :  { %v4416_v62 = vadd.f32 %v148_v44, %v4164_v54 }
  0xc3   :  { %v177_v28 = vpop.f32.mrf.mxu2 }
  0xc4   :  { %v4447_v30 = vadd.f32 %v177_v28, %v4174_v60  ;;  %v206_v31 = vpop.f32.mrf.mxu3  ;;  %v449_v33 = vpop.f32.mrf.mxu0  ;;  %v2878_v28 = vld [vmem:[%s5686_s2 + $0xe0] sm:$0xf] }
  0xc5   :  { %v4450_v35 = vadd.f32 %v206_v31, %v4176_v61  ;;  %v492_v36 = vadd.f32 %v449_v33, %v103_v27  ;;  %v462_v37 = vpop.f32.mrf.mxu1  ;;  %v3638_v31 = vld [vmem:[%s5686_s2 + $0xe4] sm:$0xf] }
  0xc6   :  { %v493_v38 = vadd.f32 %v462_v37, %v132_v29  ;;  %v3640_v29 = vld [vmem:[%s5686_s2 + $0xec] sm:$0xf0]  ;;  %v2886_v37 = vld [vmem:[%s5686_s2 + $0xe8] sm:$0xf] }
  0xc7   :  { %v496_v39 = vmul.f32 0.5, %v492_v36  ;;  %v2879_v33 = vor.u32 %v3640_v29, %v2878_v28  ;;  %v2880_v36 = vld [vmem:[%s5686_s2 + $0xf0] sm:$0xf0]  ;;  %v2830_v29 = vld [vmem:[%s5686_s2 + $0x80] sm:$0xf] }
  0xc8   :  { %v500_v49 = vmul.f32 0.5, %v493_v38  ;;  %v3641_v38 = vld [vmem:[%s5686_s2 + $0xf4] sm:$0xf0] }
  0xc9   :  { %3803 = vtanh.f32 %v496_v39  ;;  %v2883_v39 = vor.u32 %v3638_v31, %v2880_v36  ;;  %991 = vmatpush.bf16.msrb.mxu0 %v2879_v33  ;;  %v3628_v31 = vld [vmem:[%s5686_s2 + $0x8c] sm:$0xf0]  ;;  %v3626_v33 = vld [vmem:[%s5686_s2 + $0x84] sm:$0xf] }
  0xca   :  { %3805 = vtanh.f32 %v500_v49  ;;  %v2887_v49 = vor.u32 %v3641_v38, %v2886_v37  ;;  %v2831_v36 = vor.u32 %v3628_v31, %v2830_v29  ;;  %v2832_v37 = vld [vmem:[%s5686_s2 + $0x90] sm:$0xf0]  ;;  %v2838_v38 = vld [vmem:[%s5686_s2 + $0x88] sm:$0xf]  ;;  %v2782_v31 = vld [vmem:[%s5686_s2 + $0x20] sm:$0xf] }
  0xcb   :  { %v475_v54 = vpop.f32.mrf.mxu2  ;;  %1004 = vmatpush.bf16.msrb.mxu1 %v2883_v39  ;;  %v3629_v39 = vld [vmem:[%s5686_s2 + $0x94] sm:$0xf0] }
  0xcc   :  { %v494_v41 = vadd.f32 %v475_v54, %v161_v52  ;;  %v488_v44 = vpop.f32.mrf.mxu3  ;;  %v451_v45 = vpop.f32.mrf.mxu0  ;;  %v3639_v52 = vld [vmem:[%s5686_s2 + $0xec] sm:$0xf]  ;;  %1017 = vmatpush.bf16.msrb.mxu2 %v2887_v49  ;;  %v2835_v49 = vor.u32 %v3626_v33, %v2832_v37  ;;  %v3616_v33 = vld [vmem:[%s5686_s2 + $0x2c] sm:$0xf0] }
  0xcd   :  { %v495_v46 = vadd.f32 %v488_v44, %v190_v50  ;;  %v464_v51 = vpop.f32.mrf.mxu1  ;;  %v2888_v50 = vld [vmem:[%s5686_s2 + $0xf8] sm:$0xf0]  ;;  %v3636_v44 = vld [vmem:[%s5686_s2 + $0xcc] sm:$0xf0]  ;;  %v3634_v45 = vld [vmem:[%s5686_s2 + $0xc4] sm:$0xf]  ;;  %v2783_v37 = vor.u32 %v3616_v33, %v2782_v31 }
  0xce   :  { %3807 = vtanh.f32 %v494_v41  ;;  %v2891_v54 = vor.u32 %v3639_v52, %v2888_v50  ;;  %v2862_v41 = vld [vmem:[%s5686_s2 + $0xc0] sm:$0xf]  ;;  %v2864_v51 = vld [vmem:[%s5686_s2 + $0xd0] sm:$0xf0]  ;;  %v2839_v52 = vor.u32 %v3629_v39, %v2838_v38  ;;  %v3627_v50 = vld [vmem:[%s5686_s2 + $0x8c] sm:$0xf] }
  0xcf   :  { %v3804_v58 = vpop.eup %3803  ;;  %v505_v0 = vmul.f32 0.5, %v495_v46  ;;  %v2863_v46 = vor.u32 %v3636_v44, %v2862_v41  ;;  %v2814_v44 = vld [vmem:[%s5686_s2 + $0x60] sm:$0xf]  ;;  %v2784_v38 = vld [vmem:[%s5686_s2 + $0x30] sm:$0xf0] }
  0xd0   :  { %v3806_v1 = vpop.eup %3805  ;;  %v498_v6 = vmul.f32 0.5, %v3804_v58  ;;  %1030 = vmatpush.bf16.msrb.mxu3 %v2891_v54  ;;  %v2870_v58 = vld [vmem:[%s5686_s2 + $0xc8] sm:$0xf]  ;;  %v2840_v54 = vld [vmem:[%s5686_s2 + $0x98] sm:$0xf0] }
  0xd1   :  { %v502_v12 = vmul.f32 0.5, %v3806_v1  ;;  %3809 = vtanh.f32 %v505_v0  ;;  %v3637_v0 = vld [vmem:[%s5686_s2 + $0xd4] sm:$0xf0]  ;;  %v2867_v1 = vor.u32 %v3634_v45, %v2864_v51  ;;  %992 = vmatpush.bf16.msrb.mxu0 %v2863_v46  ;;  %v2843_v41 = vor.u32 %v3627_v50, %v2840_v54  ;;  %v3624_v45 = vld [vmem:[%s5686_s2 + $0x6c] sm:$0xf0] }
  0xd2   :  { %v499_v14 = vadd.f32 0.5, %v498_v6  ;;  %v2871_v6 = vor.u32 %v3637_v0, %v2870_v58  ;;  %v3622_v46 = vld [vmem:[%s5686_s2 + $0x64] sm:$0xf]  ;;  %v2815_v51 = vor.u32 %v3624_v45, %v2814_v44  ;;  %v2816_v58 = vld [vmem:[%s5686_s2 + $0x70] sm:$0xf0] }
  0xd3   :  { %v503_v15 = vadd.f32 0.5, %v502_v12  ;;  %v477_v53 = vpop.f32.mrf.mxu2  ;;  %v3635_v12 = vld [vmem:[%s5686_s2 + $0xcc] sm:$0xf]  ;;  %1005 = vmatpush.bf16.msrb.mxu1 %v2867_v1  ;;  %v2822_v0 = vld [vmem:[%s5686_s2 + $0x68] sm:$0xf] }
  0xd4   :  { %v3808_v60 = vpop.eup %3807  ;;  %v490_v16 = vpop.f32.mrf.mxu3  ;;  %1018 = vmatpush.bf16.msrb.mxu2 %v2871_v6  ;;  %v2846_v53 = vld [vmem:[%s5686_s2 + $0xa0] sm:$0xf]  ;;  %v3625_v1 = vld [vmem:[%s5686_s2 + $0x74] sm:$0xf0]  ;;  %v2819_v6 = vor.u32 %v3622_v46, %v2816_v58  ;;  %v2790_v39 = vld [vmem:[%s5686_s2 + $0x28] sm:$0xf] }
  0xd5   :  { %v509_v17 = vmul.f32 0.0, %v503_v15  ;;  %v510_v55 = vmul.f32 %v3808_v60, %v499_v14  ;;  %v2872_v14 = vld [vmem:[%s5686_s2 + $0xd8] sm:$0xf0]  ;;  %v3632_v60 = vld [vmem:[%s5686_s2 + $0xac] sm:$0xf0] }
  0xd6   :  { %v2875_v15 = vor.u32 %v3635_v12, %v2872_v14  ;;  %v3630_v16 = vld [vmem:[%s5686_s2 + $0xa4] sm:$0xf]  ;;  %v2823_v12 = vor.u32 %v3625_v1, %v2822_v0  ;;  %v3623_v14 = vld [vmem:[%s5686_s2 + $0x6c] sm:$0xf]  ;;  %v2766_v45 = vld [vmem:[%s5686_s2] sm:$0xf] }
  0xd7   :  { %v3810_v61 = vpop.eup %3809  ;;  %v4456_v20 = vadd.f32 %v510_v55, %v509_v17  ;;  %v2847_v17 = vor.u32 %v3632_v60, %v2846_v53  ;;  %v2848_v55 = vld [vmem:[%s5686_s2 + $0xb0] sm:$0xf0]  ;;  %v2798_v60 = vld [vmem:[%s5686_s2 + $0x40] sm:$0xf]  ;;  %v3615_v54 = vld [vmem:[%s5686_s2 + $0x2c] sm:$0xf] }
  0xd8   :  { %v507_v21 = vmul.f32 0.5, %v3810_v61  ;;  %1031 = vmatpush.bf16.msrb.mxu3 %v2875_v15  ;;  %v2854_v61 = vld [vmem:[%s5686_s2 + $0xa8] sm:$0xf]  ;;  %v2824_v15 = vld [vmem:[%s5686_s2 + $0x78] sm:$0xf0] }
  0xd9   :  { %3811 = vtanh.f32 %v4456_v20  ;;  %993 = vmatpush.bf16.msrb.mxu0 %v2847_v17  ;;  %v2827_v53 = vor.u32 %v3623_v14, %v2824_v15  ;;  %v3618_v17 = vld [vmem:[%s5686_s2 + $0x44] sm:$0xf]  ;;  %v3612_v46 = vld [vmem:[%s5686_s2 + $0xc] sm:$0xf0]  ;;  %v2768_v0 = vld [vmem:[%s5686_s2 + $0x10] sm:$0xf0] }
  0xda   :  { %v508_v22 = vadd.f32 0.5, %v507_v21  ;;  %v3633_v21 = vld [vmem:[%s5686_s2 + $0xb4] sm:$0xf0]  ;;  %v2767_v58 = vor.u32 %v3612_v46, %v2766_v45  ;;  %v2774_v1 = vld [vmem:[%s5686_s2 + $0x8] sm:$0xf] }
  0xdb   :  { %v3611_v15 = vld [vmem:[%s5686_s2 + $0xc] sm:$0xf] }
  0xdd   :  { %994 = vmatpush.bf16.msrb.mxu0 %v2831_v36  ;;  %v3614_v36 = vld [vmem:[%s5686_s2 + $0x24] sm:$0xf] }
  0xdf   :  { %v3812_v23 = vpop.eup %3811 }
  0xe0   :  { %v513_v24 = vmul.f32 %v3812_v23, %v508_v22  ;;  %v2851_v22 = vor.u32 %v3630_v16, %v2848_v55  ;;  %v2855_v23 = vor.u32 %v3633_v21, %v2854_v61  ;;  %v3620_v16 = vld [vmem:[%s5686_s2 + $0x4c] sm:$0xf0]  ;;  %v2800_v61 = vld [vmem:[%s5686_s2 + $0x50] sm:$0xf0]  ;;  %v2806_v21 = vld [vmem:[%s5686_s2 + $0x48] sm:$0xf] }
  0xe1   :  { %995 = vmatpush.bf16.msrb.mxu0 %v2815_v51  ;;  %v2799_v55 = vor.u32 %v3620_v16, %v2798_v60  ;;  %v3610_v51 = vld [vmem:[%s5686_s2 + $0x4] sm:$0xf] }
  0xe2   :  { %v514_v27 = vpack.c.bf16 %v513_v24, %v513_v24  ;;  %v3631_v24 = vld [vmem:[%s5686_s2 + $0xac] sm:$0xf]  ;;  %1006 = vmatpush.bf16.msrb.mxu1 %v2851_v22  ;;  %1019 = vmatpush.bf16.msrb.mxu2 %v2855_v23  ;;  %v3621_v22 = vld [vmem:[%s5686_s2 + $0x54] sm:$0xf0]  ;;  %v2803_v23 = vor.u32 %v3618_v17, %v2800_v61 }
  0xe4   :  { %515 = vst [vmem:[%s5688_s4] sm:$0xf] %v514_v27  ;;  %723 = vmatmul.bf16.vlgmr.msra.gmra.mxu0 %v514_v27  ;;  %736 = vmatmul.bf16.vlgmr.msra.gmra.mxu1 %v514_v27 }
  0xe5   :  { %749 = vmatmul.bf16.vlgmr.msra.gmra.mxu2 %v514_v27  ;;  %762 = vmatmul.bf16.vlgmr.msra.gmra.mxu3 %v514_v27  ;;  %v2856_v27 = vld [vmem:[%s5686_s2 + $0xb8] sm:$0xf0] }
  0xe6   :  { %v2859_v28 = vor.u32 %v3631_v24, %v2856_v27  ;;  %1007 = vmatpush.bf16.msrb.mxu1 %v2835_v49  ;;  %1020 = vmatpush.bf16.msrb.mxu2 %v2839_v52  ;;  %v2807_v24 = vor.u32 %v3621_v22, %v2806_v21  ;;  %v3619_v27 = vld [vmem:[%s5686_s2 + $0x4c] sm:$0xf]  ;;  %v3617_v49 = vld [vmem:[%s5686_s2 + $0x34] sm:$0xf0]  ;;  %v2787_v52 = vor.u32 %v3614_v36, %v2784_v38 }
  0xe7   :  { %996 = vmatpush.bf16.msrb.mxu0 %v2799_v55  ;;  %v2791_v50 = vor.u32 %v3617_v49, %v2790_v39 }
  0xe8   :  { %1032 = vmatpush.bf16.msrb.mxu3 %v2859_v28  ;;  %v2808_v28 = vld [vmem:[%s5686_s2 + $0x58] sm:$0xf0] }
  0xe9   :  { %v2811_v29 = vor.u32 %v3619_v27, %v2808_v28 }
  0xea   :  { %1008 = vmatpush.bf16.msrb.mxu1 %v2819_v6  ;;  %1021 = vmatpush.bf16.msrb.mxu2 %v2823_v12  ;;  %v3613_v6 = vld [vmem:[%s5686_s2 + $0x14] sm:$0xf0]  ;;  %v2771_v12 = vor.u32 %v3610_v51, %v2768_v0  ;;  %v3672_v0 = vld [vmem:[%s5686_s2 + $0xec] sm:$0xf0] }
  0xeb   :  { %997 = vmatpush.bf16.msrb.mxu0 %v2783_v37  ;;  %v2775_v14 = vor.u32 %v3613_v6, %v2774_v1  ;;  %v3670_v1 = vld [vmem:[%s5686_s2 + $0xe4] sm:$0xf] }
  0xec   :  { %1033 = vmatpush.bf16.msrb.mxu3 %v2843_v41  ;;  %v2792_v41 = vld [vmem:[%s5686_s2 + $0x38] sm:$0xf0] }
  0xed   :  { %v2795_v44 = vor.u32 %v3615_v54, %v2792_v41 }
  0xee   :  { %1009 = vmatpush.bf16.msrb.mxu1 %v2803_v23  ;;  %1022 = vmatpush.bf16.msrb.mxu2 %v2807_v24 }
  0xef   :  { %998 = vmatpush.bf16.msrb.mxu0 %v2767_v58 }
  0xf0   :  { %1034 = vmatpush.bf16.msrb.mxu3 %v2827_v53  ;;  %v2776_v53 = vld [vmem:[%s5686_s2 + $0x18] sm:$0xf0] }
  0xf1   :  { %v2779_v60 = vor.u32 %v3611_v15, %v2776_v53  ;;  %v3673_v15 = vld [vmem:[%s5686_s2 + $0xf4] sm:$0xf0] }
  0xf2   :  { %1010 = vmatpush.bf16.msrb.mxu1 %v2787_v52  ;;  %1023 = vmatpush.bf16.msrb.mxu2 %v2791_v50 }
  0xf4   :  { %1035 = vmatpush.bf16.msrb.mxu3 %v2811_v29 }
  0xf6   :  { %1011 = vmatpush.bf16.msrb.mxu1 %v2771_v12  ;;  %1024 = vmatpush.bf16.msrb.mxu2 %v2775_v14  ;;  %v3009_v12 = vld [vmem:[%s5686_s2 + $0xf0] sm:$0xf0]  ;;  %v3015_v14 = vld [vmem:[%s5686_s2 + $0xe8] sm:$0xf] }
  0xf7   :  { %v3012_v53 = vor.u32 %v3670_v1, %v3009_v12  ;;  %v2967_v1 = vld [vmem:[%s5686_s2 + $0x88] sm:$0xf] }
  0xf8   :  { %1036 = vmatpush.bf16.msrb.mxu3 %v2795_v44 }
  0xfa   :  { %1280 = vmatpush.bf16.msra.mxu1 %v3012_v53  ;;  %v2969_v53 = vld [vmem:[%s5686_s2 + $0x98] sm:$0xf0] }
  0xfc   :  { %1037 = vmatpush.bf16.msrb.mxu3 %v2779_v60  ;;  %v3016_v60 = vor.u32 %v3673_v15, %v3015_v14  ;;  %v3659_v15 = vld [vmem:[%s5686_s2 + $0x8c] sm:$0xf] }
  0xfe   :  { %1293 = vmatpush.bf16.msra.mxu2 %v3016_v60  ;;  %v2972_v60 = vor.u32 %v3659_v15, %v2969_v53  ;;  %v2895_v15 = vld [vmem:[%s5686_s2] sm:$0xf]  ;;  %v3644_v53 = vld [vmem:[%s5686_s2 + $0xc] sm:$0xf0] }
 0x161   :  { %v724_v16 = vpop.f32.mrf.mxu0  ;;  %v737_v17 = vpop.f32.mrf.mxu1 }
 0x162   :  { %v767_v55 = vadd.f32 %v724_v16, %v4169_v57  ;;  %v768_v61 = vadd.f32 %v737_v17, %v4172_v59  ;;  %v3671_v16 = vld [vmem:[%s5686_s2 + $0xec] sm:$0xf]  ;;  %v3017_v17 = vld [vmem:[%s5686_s2 + $0xf8] sm:$0xf0] }
 0x164   :  { %v771_v21 = vmul.f32 0.5, %v767_v55  ;;  %v775_v22 = vmul.f32 0.5, %v768_v61  ;;  %v3020_v55 = vor.u32 %v3671_v16, %v3017_v17  ;;  %v2991_v61 = vld [vmem:[%s5686_s2 + $0xc0] sm:$0xf]  ;;  %v3656_v17 = vld [vmem:[%s5686_s2 + $0x6c] sm:$0xf0] }
 0x165   :  { %v2943_v16 = vld [vmem:[%s5686_s2 + $0x60] sm:$0xf] }
 0x166   :  { %3813 = vtanh.f32 %v771_v21  ;;  %v3668_v21 = vld [vmem:[%s5686_s2 + $0xcc] sm:$0xf0]  ;;  %1306 = vmatpush.bf16.msra.mxu3 %v3020_v55  ;;  %v3654_v55 = vld [vmem:[%s5686_s2 + $0x64] sm:$0xf] }
 0x167   :  { %3815 = vtanh.f32 %v775_v22  ;;  %v3666_v22 = vld [vmem:[%s5686_s2 + $0xc4] sm:$0xf] }
 0x168   :  { %v750_v23 = vpop.f32.mrf.mxu2  ;;  %v763_v24 = vpop.f32.mrf.mxu3 }
 0x169   :  { %v769_v27 = vadd.f32 %v750_v23, %v4179_v63  ;;  %v770_v28 = vadd.f32 %v763_v24, %v4182_v2  ;;  %v726_v29 = vpop.f32.mrf.mxu0  ;;  %v739_v31 = vpop.f32.mrf.mxu1  ;;  %v2992_v23 = vor.u32 %v3668_v21, %v2991_v61  ;;  %v2993_v24 = vld [vmem:[%s5686_s2 + $0xd0] sm:$0xf0]  ;;  %v2944_v61 = vor.u32 %v3656_v17, %v2943_v16 }
 0x16a   :  { %v2996_v29 = vor.u32 %v3666_v22, %v2993_v24  ;;  %v2945_v21 = vld [vmem:[%s5686_s2 + $0x70] sm:$0xf0]  ;;  %v2951_v22 = vld [vmem:[%s5686_s2 + $0x68] sm:$0xf]  ;;  %v2896_v16 = vor.u32 %v3644_v53, %v2895_v15  ;;  %v3704_v15 = vld [vmem:[%s5686_s2 + $0xec] sm:$0xf0] }
 0x16b   :  { %3817 = vtanh.f32 %v769_v27  ;;  %v780_v33 = vmul.f32 0.5, %v770_v28  ;;  %v2999_v27 = vld [vmem:[%s5686_s2 + $0xc8] sm:$0xf]  ;;  %v3669_v28 = vld [vmem:[%s5686_s2 + $0xd4] sm:$0xf0]  ;;  %v2948_v24 = vor.u32 %v3654_v55, %v2945_v21 }
 0x16c   :  { %v3814_v36 = vpop.eup %3813  ;;  %v3000_v31 = vor.u32 %v3669_v28, %v2999_v27  ;;  %1281 = vmatpush.bf16.msra.mxu1 %v2996_v29  ;;  %v3655_v28 = vld [vmem:[%s5686_s2 + $0x6c] sm:$0xf]  ;;  %v2953_v29 = vld [vmem:[%s5686_s2 + $0x78] sm:$0xf0]  ;;  %v2897_v17 = vld [vmem:[%s5686_s2 + $0x10] sm:$0xf0] }
 0x16d   :  { %v3816_v37 = vpop.eup %3815  ;;  %v773_v38 = vmul.f32 0.5, %v3814_v36  ;;  %3819 = vtanh.f32 %v780_v33  ;;  %v3667_v33 = vld [vmem:[%s5686_s2 + $0xcc] sm:$0xf]  ;;  %v3001_v36 = vld [vmem:[%s5686_s2 + $0xd8] sm:$0xf0] }
 0x16e   :  { %v777_v57 = vmul.f32 0.5, %v3816_v37  ;;  %v3004_v37 = vor.u32 %v3667_v33, %v3001_v36  ;;  %1294 = vmatpush.bf16.msra.mxu2 %v3000_v31  ;;  %v2956_v31 = vor.u32 %v3655_v28, %v2953_v29  ;;  %v2927_v33 = vld [vmem:[%s5686_s2 + $0x40] sm:$0xf]  ;;  %v3652_v36 = vld [vmem:[%s5686_s2 + $0x4c] sm:$0xf0] }
 0x16f   :  { %v774_v59 = vadd.f32 0.5, %v773_v38  ;;  %v2975_v38 = vld [vmem:[%s5686_s2 + $0xa0] sm:$0xf]  ;;  %v2903_v55 = vld [vmem:[%s5686_s2 + $0x8] sm:$0xf] }
 0x170   :  { %v778_v39 = vadd.f32 0.5, %v777_v57  ;;  %v752_v49 = vpop.f32.mrf.mxu2  ;;  %v765_v52 = vpop.f32.mrf.mxu3  ;;  %v3664_v57 = vld [vmem:[%s5686_s2 + $0xac] sm:$0xf0]  ;;  %1307 = vmatpush.bf16.msra.mxu3 %v3004_v37  ;;  %v3650_v37 = vld [vmem:[%s5686_s2 + $0x44] sm:$0xf] }
 0x171   :  { %v3818_v50 = vpop.eup %3817  ;;  %v2977_v49 = vld [vmem:[%s5686_s2 + $0xb0] sm:$0xf0]  ;;  %v2983_v52 = vld [vmem:[%s5686_s2 + $0xa8] sm:$0xf]  ;;  %v3702_v53 = vld [vmem:[%s5686_s2 + $0xe4] sm:$0xf] }
 0x172   :  { %v784_v54 = vmul.f32 %v778_v39, %v4456_v20  ;;  %v785_v41 = vmul.f32 %v3818_v50, %v774_v59  ;;  %v3007_v20 = vld [vmem:[%s5686_s2 + $0xe0] sm:$0xf]  ;;  %v3662_v59 = vld [vmem:[%s5686_s2 + $0xa4] sm:$0xf]  ;;  %v2976_v39 = vor.u32 %v3664_v57, %v2975_v38  ;;  %v3665_v50 = vld [vmem:[%s5686_s2 + $0xb4] sm:$0xf0]  ;;  %v2928_v38 = vor.u32 %v3652_v36, %v2927_v33 }
 0x173   :  { %v3820_v63 = vpop.eup %3819  ;;  %v3008_v6 = vor.u32 %v3672_v0, %v3007_v20  ;;  %v2961_v0 = vld [vmem:[%s5686_s2 + $0x90] sm:$0xf0] }
 0x174   :  { %v4659_v44 = vadd.f32 %v785_v41, %v784_v54  ;;  %v782_v2 = vmul.f32 0.5, %v3820_v63  ;;  %v2980_v54 = vor.u32 %v3662_v59, %v2977_v49  ;;  %v2984_v41 = vor.u32 %v3665_v50, %v2983_v52  ;;  %v3663_v63 = vld [vmem:[%s5686_s2 + $0xac] sm:$0xf]  ;;  %v2929_v57 = vld [vmem:[%s5686_s2 + $0x50] sm:$0xf0] }
 0x175   :  { %1267 = vmatpush.bf16.msra.mxu0 %v3008_v6  ;;  %v3661_v6 = vld [vmem:[%s5686_s2 + $0x94] sm:$0xf0]  ;;  %v2935_v59 = vld [vmem:[%s5686_s2 + $0x48] sm:$0xf]  ;;  %v2932_v49 = vor.u32 %v3650_v37, %v2929_v57  ;;  %v3651_v50 = vld [vmem:[%s5686_s2 + $0x4c] sm:$0xf] }
 0x176   :  { %3821 = vtanh.f32 %v4659_v44  ;;  %v783_v45 = vadd.f32 0.5, %v782_v2  ;;  %v2985_v2 = vld [vmem:[%s5686_s2 + $0xb8] sm:$0xf0]  ;;  %1282 = vmatpush.bf16.msra.mxu1 %v2980_v54  ;;  %1295 = vmatpush.bf16.msra.mxu2 %v2984_v41  ;;  %v2968_v14 = vor.u32 %v3661_v6, %v2967_v1  ;;  %v3647_v6 = vld [vmem:[%s5686_s2 + $0x2c] sm:$0xf] }
 0x177   :  { %v2937_v54 = vld [vmem:[%s5686_s2 + $0x58] sm:$0xf0] }
 0x178   :  { %v2940_v41 = vor.u32 %v3651_v50, %v2937_v54 }
 0x179   :  { %1268 = vmatpush.bf16.msra.mxu0 %v2992_v23  ;;  %v3657_v23 = vld [vmem:[%s5686_s2 + $0x74] sm:$0xf0] }
 0x17a   :  { %1296 = vmatpush.bf16.msra.mxu2 %v2968_v14  ;;  %v2952_v27 = vor.u32 %v3657_v23, %v2951_v22  ;;  %v3643_v23 = vld [vmem:[%s5686_s2 + $0xc] sm:$0xf] }
 0x17c   :  { %v3822_v46 = vpop.eup %3821 }
 0x17d   :  { %v788_v51 = vmul.f32 %v3822_v46, %v783_v45  ;;  %1269 = vmatpush.bf16.msra.mxu0 %v2976_v39  ;;  %v2988_v45 = vor.u32 %v3663_v63, %v2985_v2  ;;  %v2959_v46 = vld [vmem:[%s5686_s2 + $0x80] sm:$0xf]  ;;  %v3653_v39 = vld [vmem:[%s5686_s2 + $0x54] sm:$0xf0]  ;;  %v3648_v2 = vld [vmem:[%s5686_s2 + $0x2c] sm:$0xf0] }
 0x17e   :  { %1297 = vmatpush.bf16.msra.mxu2 %v2952_v27  ;;  %v2936_v52 = vor.u32 %v3653_v39, %v2935_v59  ;;  %v2911_v63 = vld [vmem:[%s5686_s2 + $0x20] sm:$0xf] }
 0x17f   :  { %v789_v58 = vpack.c.bf16 %v788_v51, %v788_v51  ;;  %v3660_v51 = vld [vmem:[%s5686_s2 + $0x8c] sm:$0xf0]  ;;  %1308 = vmatpush.bf16.msra.mxu3 %v2988_v45  ;;  %v3646_v45 = vld [vmem:[%s5686_s2 + $0x24] sm:$0xf] }
 0x180   :  { %v2960_v20 = vor.u32 %v3660_v51, %v2959_v46  ;;  %v2912_v46 = vor.u32 %v3648_v2, %v2911_v63  ;;  %v2913_v51 = vld [vmem:[%s5686_s2 + $0x30] sm:$0xf0] }
 0x181   :  { %2763 = vst [vmem:[%s5688_s4 + $0x4] sm:$0xf] %v789_v58  ;;  %999 = vmatmul.bf16.vlgmr.msrb.gmra.mxu0 %v789_v58  ;;  %1012 = vmatmul.bf16.vlgmr.msrb.gmra.mxu1 %v789_v58 }
 0x182   :  { %1025 = vmatmul.bf16.vlgmr.msrb.gmra.mxu2 %v789_v58  ;;  %1038 = vmatmul.bf16.vlgmr.msrb.gmra.mxu3 %v789_v58  ;;  %v3658_v58 = vld [vmem:[%s5686_s2 + $0x84] sm:$0xf] }
 0x183   :  { %v2964_v12 = vor.u32 %v3658_v58, %v2961_v0  ;;  %1270 = vmatpush.bf16.msra.mxu0 %v2960_v20  ;;  %1309 = vmatpush.bf16.msra.mxu3 %v2972_v60  ;;  %v2919_v58 = vld [vmem:[%s5686_s2 + $0x28] sm:$0xf]  ;;  %v3649_v20 = vld [vmem:[%s5686_s2 + $0x34] sm:$0xf0]  ;;  %v2916_v0 = vor.u32 %v3646_v45, %v2913_v51  ;;  %v3642_v60 = vld [vmem:[%s5686_s2 + $0x4] sm:$0xf] }
 0x184   :  { %1298 = vmatpush.bf16.msra.mxu2 %v2936_v52  ;;  %v2920_v1 = vor.u32 %v3649_v20, %v2919_v58  ;;  %v2900_v21 = vor.u32 %v3642_v60, %v2897_v17  ;;  %v3144_v17 = vld [vmem:[%s5686_s2 + $0xe8] sm:$0xf] }
 0x185   :  { %1283 = vmatpush.bf16.msra.mxu1 %v2964_v12  ;;  %v2921_v12 = vld [vmem:[%s5686_s2 + $0x38] sm:$0xf0] }
 0x186   :  { %v2924_v14 = vor.u32 %v3647_v6, %v2921_v12 }
 0x187   :  { %1271 = vmatpush.bf16.msra.mxu0 %v2944_v61  ;;  %1310 = vmatpush.bf16.msra.mxu3 %v2956_v31  ;;  %v3645_v61 = vld [vmem:[%s5686_s2 + $0x14] sm:$0xf0] }
 0x188   :  { %1299 = vmatpush.bf16.msra.mxu2 %v2920_v1  ;;  %v2904_v22 = vor.u32 %v3645_v61, %v2903_v55  ;;  %v3705_v55 = vld [vmem:[%s5686_s2 + $0xf4] sm:$0xf0] }
 0x189   :  { %1284 = vmatpush.bf16.msra.mxu1 %v2948_v24  ;;  %v2905_v24 = vld [vmem:[%s5686_s2 + $0x18] sm:$0xf0] }
 0x18a   :  { %v2908_v27 = vor.u32 %v3643_v23, %v2905_v24  ;;  %v3146_v23 = vld [vmem:[%s5686_s2 + $0xf8] sm:$0xf0] }
 0x18b   :  { %1272 = vmatpush.bf16.msra.mxu0 %v2928_v38  ;;  %1311 = vmatpush.bf16.msra.mxu3 %v2940_v41 }
 0x18c   :  { %1300 = vmatpush.bf16.msra.mxu2 %v2904_v22  ;;  %v3703_v22 = vld [vmem:[%s5686_s2 + $0xec] sm:$0xf] }
 0x18d   :  { %1285 = vmatpush.bf16.msra.mxu1 %v2932_v49  ;;  %v3149_v24 = vor.u32 %v3703_v22, %v3146_v23  ;;  %v3074_v22 = vld [vmem:[%s5686_s2 + $0x70] sm:$0xf0]  ;;  %v3080_v23 = vld [vmem:[%s5686_s2 + $0x68] sm:$0xf] }
 0x18f   :  { %1273 = vmatpush.bf16.msra.mxu0 %v2912_v46  ;;  %1312 = vmatpush.bf16.msra.mxu3 %v2924_v14 }
 0x191   :  { %1286 = vmatpush.bf16.msra.mxu1 %v2916_v0 }
 0x193   :  { %1274 = vmatpush.bf16.msra.mxu0 %v2896_v16  ;;  %1313 = vmatpush.bf16.msra.mxu3 %v2908_v27  ;;  %v3138_v16 = vld [vmem:[%s5686_s2 + $0xf0] sm:$0xf0]  ;;  %v3120_v27 = vld [vmem:[%s5686_s2 + $0xc0] sm:$0xf] }
 0x194   :  { %v3141_v61 = vor.u32 %v3702_v53, %v3138_v16  ;;  %v3691_v53 = vld [vmem:[%s5686_s2 + $0x8c] sm:$0xf] }
 0x195   :  { %1287 = vmatpush.bf16.msra.mxu1 %v2900_v21  ;;  %v3145_v21 = vor.u32 %v3705_v55, %v3144_v17  ;;  %v3072_v17 = vld [vmem:[%s5686_s2 + $0x60] sm:$0xf]  ;;  %v3688_v55 = vld [vmem:[%s5686_s2 + $0x6c] sm:$0xf0] }
 0x197   :  { %1569 = vmatpush.bf16.msrb.mxu2 %v3145_v21  ;;  %1582 = vmatpush.bf16.msrb.mxu3 %v3149_v24  ;;  %v3073_v21 = vor.u32 %v3688_v55, %v3072_v17  ;;  %v3689_v24 = vld [vmem:[%s5686_s2 + $0x74] sm:$0xf0] }
 0x199   :  { %1556 = vmatpush.bf16.msrb.mxu1 %v3141_v61  ;;  %v3686_v61 = vld [vmem:[%s5686_s2 + $0x64] sm:$0xf] }
 0x1fe   :  { %v1000_v28 = vpop.f32.mrf.mxu0  ;;  %v1013_v29 = vpop.f32.mrf.mxu1 }
 0x1ff   :  { %v1043_v31 = vadd.f32 %v1000_v28, %v4185_v3  ;;  %v1044_v33 = vadd.f32 %v1013_v29, %v4188_v5  ;;  %v3700_v28 = vld [vmem:[%s5686_s2 + $0xcc] sm:$0xf0]  ;;  %v3698_v29 = vld [vmem:[%s5686_s2 + $0xc4] sm:$0xf] }
 0x201   :  { %v1047_v36 = vmul.f32 0.5, %v1043_v31  ;;  %v1051_v37 = vmul.f32 0.5, %v1044_v33  ;;  %v3121_v31 = vor.u32 %v3700_v28, %v3120_v27  ;;  %v3122_v33 = vld [vmem:[%s5686_s2 + $0xd0] sm:$0xf0]  ;;  %v3077_v27 = vor.u32 %v3686_v61, %v3074_v22  ;;  %v3675_v61 = vld [vmem:[%s5686_s2 + $0xc] sm:$0xf] }
 0x202   :  { %v3081_v28 = vor.u32 %v3689_v24, %v3080_v23 }
 0x203   :  { %3823 = vtanh.f32 %v1047_v36  ;;  %v3128_v36 = vld [vmem:[%s5686_s2 + $0xc8] sm:$0xf] }
 0x204   :  { %3825 = vtanh.f32 %v1051_v37  ;;  %v3701_v37 = vld [vmem:[%s5686_s2 + $0xd4] sm:$0xf0] }
 0x205   :  { %v1026_v38 = vpop.f32.mrf.mxu2  ;;  %v1039_v57 = vpop.f32.mrf.mxu3 }
 0x206   :  { %v1045_v59 = vadd.f32 %v1026_v38, %v4191_v7  ;;  %v1046_v39 = vadd.f32 %v1039_v57, %v4194_v10  ;;  %v1002_v49 = vpop.f32.mrf.mxu0  ;;  %v1015_v52 = vpop.f32.mrf.mxu1  ;;  %v3125_v38 = vor.u32 %v3698_v29, %v3122_v33  ;;  %v3129_v57 = vor.u32 %v3701_v37, %v3128_v36  ;;  %v3687_v29 = vld [vmem:[%s5686_s2 + $0x6c] sm:$0xf]  ;;  %v3056_v36 = vld [vmem:[%s5686_s2 + $0x40] sm:$0xf]  ;;  %v3684_v37 = vld [vmem:[%s5686_s2 + $0x4c] sm:$0xf0] }
 0x207   :  { %v3104_v52 = vld [vmem:[%s5686_s2 + $0xa0] sm:$0xf] }
 0x208   :  { %3827 = vtanh.f32 %v1045_v59  ;;  %v1056_v50 = vmul.f32 0.5, %v1046_v39  ;;  %v3699_v59 = vld [vmem:[%s5686_s2 + $0xcc] sm:$0xf]  ;;  %v3130_v39 = vld [vmem:[%s5686_s2 + $0xd8] sm:$0xf0]  ;;  %1557 = vmatpush.bf16.msrb.mxu1 %v3125_v38  ;;  %1570 = vmatpush.bf16.msrb.mxu2 %v3129_v57  ;;  %v3057_v57 = vor.u32 %v3684_v37, %v3056_v36 }
 0x209   :  { %v3824_v54 = vpop.eup %3823  ;;  %v3133_v49 = vor.u32 %v3699_v59, %v3130_v39  ;;  %v3682_v38 = vld [vmem:[%s5686_s2 + $0x44] sm:$0xf]  ;;  %v3058_v59 = vld [vmem:[%s5686_s2 + $0x50] sm:$0xf0]  ;;  %v3064_v39 = vld [vmem:[%s5686_s2 + $0x48] sm:$0xf] }
 0x20a   :  { %v3826_v41 = vpop.eup %3825  ;;  %v1049_v63 = vmul.f32 0.5, %v3824_v54  ;;  %3829 = vtanh.f32 %v1056_v50  ;;  %v3696_v50 = vld [vmem:[%s5686_s2 + $0xac] sm:$0xf0]  ;;  %v3694_v54 = vld [vmem:[%s5686_s2 + $0xa4] sm:$0xf] }
 0x20b   :  { %v1053_v3 = vmul.f32 0.5, %v3826_v41  ;;  %1583 = vmatpush.bf16.msrb.mxu3 %v3133_v49  ;;  %v3105_v41 = vor.u32 %v3696_v50, %v3104_v52  ;;  %v3685_v49 = vld [vmem:[%s5686_s2 + $0x54] sm:$0xf0]  ;;  %v3061_v52 = vor.u32 %v3682_v38, %v3058_v59 }
 0x20c   :  { %v1050_v5 = vadd.f32 0.5, %v1049_v63  ;;  %v3106_v63 = vld [vmem:[%s5686_s2 + $0xb0] sm:$0xf0]  ;;  %v3065_v50 = vor.u32 %v3685_v49, %v3064_v39 }
 0x20d   :  { %v1054_v2 = vadd.f32 0.5, %v1053_v3  ;;  %v1028_v45 = vpop.f32.mrf.mxu2  ;;  %v1041_v46 = vpop.f32.mrf.mxu3  ;;  %v3112_v3 = vld [vmem:[%s5686_s2 + $0xa8] sm:$0xf] }
 0x20e   :  { %v3828_v51 = vpop.eup %3827  ;;  %v3695_v46 = vld [vmem:[%s5686_s2 + $0xac] sm:$0xf] }
 0x20f   :  { %v1060_v58 = vmul.f32 %v1054_v2, %v4659_v44  ;;  %v1061_v20 = vmul.f32 %v3828_v51, %v1050_v5  ;;  %v3136_v44 = vld [vmem:[%s5686_s2 + $0xe0] sm:$0xf]  ;;  %v3697_v5 = vld [vmem:[%s5686_s2 + $0xb4] sm:$0xf0]  ;;  %v3109_v2 = vor.u32 %v3694_v54, %v3106_v63  ;;  %v3114_v51 = vld [vmem:[%s5686_s2 + $0xb8] sm:$0xf0] }
 0x210   :  { %v3830_v7 = vpop.eup %3829  ;;  %v3137_v60 = vor.u32 %v3704_v15, %v3136_v44  ;;  %v3113_v45 = vor.u32 %v3697_v5, %v3112_v3  ;;  %v3683_v54 = vld [vmem:[%s5686_s2 + $0x4c] sm:$0xf]  ;;  %v3040_v3 = vld [vmem:[%s5686_s2 + $0x20] sm:$0xf]  ;;  %v3680_v5 = vld [vmem:[%s5686_s2 + $0x2c] sm:$0xf0] }
 0x211   :  { %v4862_v0 = vadd.f32 %v1061_v20, %v1060_v58  ;;  %v1058_v10 = vmul.f32 0.5, %v3830_v7  ;;  %v3117_v58 = vor.u32 %v3695_v46, %v3114_v51  ;;  %1558 = vmatpush.bf16.msrb.mxu1 %v3109_v2  ;;  %v3088_v20 = vld [vmem:[%s5686_s2 + $0x80] sm:$0xf]  ;;  %v3692_v7 = vld [vmem:[%s5686_s2 + $0x8c] sm:$0xf0] }
 0x212   :  { %1543 = vmatpush.bf16.msrb.mxu0 %v3137_v60  ;;  %1571 = vmatpush.bf16.msrb.mxu2 %v3113_v45  ;;  %v3098_v60 = vld [vmem:[%s5686_s2 + $0x98] sm:$0xf0]  ;;  %v3678_v2 = vld [vmem:[%s5686_s2 + $0x24] sm:$0xf]  ;;  %v3041_v45 = vor.u32 %v3680_v5, %v3040_v3  ;;  %v3042_v46 = vld [vmem:[%s5686_s2 + $0x30] sm:$0xf0] }
 0x213   :  { %3831 = vtanh.f32 %v4862_v0  ;;  %v1059_v1 = vadd.f32 0.5, %v1058_v10  ;;  %v3690_v10 = vld [vmem:[%s5686_s2 + $0x84] sm:$0xf]  ;;  %1584 = vmatpush.bf16.msrb.mxu3 %v3117_v58  ;;  %v3101_v16 = vor.u32 %v3691_v53, %v3098_v60  ;;  %v3048_v51 = vld [vmem:[%s5686_s2 + $0x28] sm:$0xf] }
 0x214   :  { %v3681_v58 = vld [vmem:[%s5686_s2 + $0x34] sm:$0xf0]  ;;  %v3026_v53 = vld [vmem:[%s5686_s2 + $0x10] sm:$0xf0]  ;;  %v3032_v60 = vld [vmem:[%s5686_s2 + $0x8] sm:$0xf] }
 0x216   :  { %1544 = vmatpush.bf16.msrb.mxu0 %v3121_v31  ;;  %v3082_v31 = vld [vmem:[%s5686_s2 + $0x78] sm:$0xf0] }
 0x217   :  { %1585 = vmatpush.bf16.msrb.mxu3 %v3101_v16  ;;  %v3085_v33 = vor.u32 %v3687_v29, %v3082_v31  ;;  %v3677_v16 = vld [vmem:[%s5686_s2 + $0x14] sm:$0xf0] }
 0x218   :  { %v3033_v55 = vor.u32 %v3677_v16, %v3032_v60  ;;  %v3275_v60 = vld [vmem:[%s5686_s2 + $0xf8] sm:$0xf0] }
 0x219   :  { %v3832_v6 = vpop.eup %3831 }
 0x21a   :  { %v1064_v12 = vmul.f32 %v3832_v6, %v1059_v1  ;;  %1545 = vmatpush.bf16.msrb.mxu0 %v3105_v41  ;;  %v3089_v1 = vor.u32 %v3692_v7, %v3088_v20  ;;  %v3090_v6 = vld [vmem:[%s5686_s2 + $0x90] sm:$0xf0]  ;;  %v3066_v41 = vld [vmem:[%s5686_s2 + $0x58] sm:$0xf0]  ;;  %v3045_v20 = vor.u32 %v3678_v2, %v3042_v46  ;;  %v3049_v7 = vor.u32 %v3681_v58, %v3048_v51 }
 0x21b   :  { %v3093_v44 = vor.u32 %v3690_v10, %v3090_v6  ;;  %1586 = vmatpush.bf16.msrb.mxu3 %v3085_v33  ;;  %v3069_v63 = vor.u32 %v3683_v54, %v3066_v41  ;;  %v3679_v10 = vld [vmem:[%s5686_s2 + $0x2c] sm:$0xf] }
 0x21c   :  { %v1065_v14 = vpack.c.bf16 %v1064_v12, %v1064_v12  ;;  %v3096_v12 = vld [vmem:[%s5686_s2 + $0x88] sm:$0xf] }
 0x21d   :  { %1559 = vmatpush.bf16.msrb.mxu1 %v3093_v44  ;;  %v3674_v44 = vld [vmem:[%s5686_s2 + $0x4] sm:$0xf] }
 0x21e   :  { %2892 = vst [vmem:[%s5688_s4 + $0x8] sm:$0xf] %v1065_v14  ;;  %1275 = vmatmul.bf16.vlgmr.msra.gmra.mxu0 %v1065_v14  ;;  %1288 = vmatmul.bf16.vlgmr.msra.gmra.mxu1 %v1065_v14  ;;  %v3029_v17 = vor.u32 %v3674_v44, %v3026_v53  ;;  %v3735_v53 = vld [vmem:[%s5686_s2 + $0xec] sm:$0xf] }
 0x21f   :  { %1301 = vmatmul.bf16.vlgmr.msra.gmra.mxu2 %v1065_v14  ;;  %1314 = vmatmul.bf16.vlgmr.msra.gmra.mxu3 %v1065_v14  ;;  %v3693_v14 = vld [vmem:[%s5686_s2 + $0x94] sm:$0xf0]  ;;  %v3278_v16 = vor.u32 %v3735_v53, %v3275_v60  ;;  %v3719_v60 = vld [vmem:[%s5686_s2 + $0x6c] sm:$0xf] }
 0x220   :  { %v3097_v15 = vor.u32 %v3693_v14, %v3096_v12  ;;  %1546 = vmatpush.bf16.msrb.mxu0 %v3089_v1  ;;  %1587 = vmatpush.bf16.msrb.mxu3 %v3069_v63  ;;  %v3050_v1 = vld [vmem:[%s5686_s2 + $0x38] sm:$0xf0]  ;;  %v3024_v12 = vld [vmem:[%s5686_s2] sm:$0xf]  ;;  %v3676_v14 = vld [vmem:[%s5686_s2 + $0xc] sm:$0xf0] }
 0x221   :  { %1560 = vmatpush.bf16.msrb.mxu1 %v3077_v27  ;;  %v3053_v6 = vor.u32 %v3679_v10, %v3050_v1  ;;  %v3734_v10 = vld [vmem:[%s5686_s2 + $0xe4] sm:$0xf] }
 0x222   :  { %1572 = vmatpush.bf16.msrb.mxu2 %v3097_v15  ;;  %v3025_v15 = vor.u32 %v3676_v14, %v3024_v12  ;;  %v3273_v12 = vld [vmem:[%s5686_s2 + $0xe8] sm:$0xf]  ;;  %v3737_v14 = vld [vmem:[%s5686_s2 + $0xf4] sm:$0xf0] }
 0x224   :  { %1547 = vmatpush.bf16.msrb.mxu0 %v3073_v21  ;;  %1588 = vmatpush.bf16.msrb.mxu3 %v3053_v6  ;;  %v3034_v21 = vld [vmem:[%s5686_s2 + $0x18] sm:$0xf0]  ;;  %v3267_v6 = vld [vmem:[%s5686_s2 + $0xf0] sm:$0xf0] }
 0x225   :  { %1561 = vmatpush.bf16.msrb.mxu1 %v3061_v52  ;;  %v3037_v22 = vor.u32 %v3675_v61, %v3034_v21  ;;  %v3270_v44 = vor.u32 %v3734_v10, %v3267_v6  ;;  %v3730_v61 = vld [vmem:[%s5686_s2 + $0xc4] sm:$0xf]  ;;  %v3720_v10 = vld [vmem:[%s5686_s2 + $0x6c] sm:$0xf0] }
 0x226   :  { %1573 = vmatpush.bf16.msrb.mxu2 %v3081_v28 }
 0x228   :  { %1548 = vmatpush.bf16.msrb.mxu0 %v3057_v57  ;;  %1589 = vmatpush.bf16.msrb.mxu3 %v3037_v22  ;;  %v3251_v22 = vld [vmem:[%s5686_s2 + $0xd0] sm:$0xf0] }
 0x229   :  { %1562 = vmatpush.bf16.msrb.mxu1 %v3045_v20 }
 0x22a   :  { %1574 = vmatpush.bf16.msrb.mxu2 %v3065_v50 }
 0x22c   :  { %1549 = vmatpush.bf16.msrb.mxu0 %v3041_v45  ;;  %1858 = vmatpush.bf16.msra.mxu3 %v3278_v16  ;;  %v3211_v16 = vld [vmem:[%s5686_s2 + $0x78] sm:$0xf0] }
 0x22d   :  { %1563 = vmatpush.bf16.msrb.mxu1 %v3029_v17  ;;  %v3249_v17 = vld [vmem:[%s5686_s2 + $0xc0] sm:$0xf] }
 0x22e   :  { %1575 = vmatpush.bf16.msrb.mxu2 %v3049_v7  ;;  %v3736_v7 = vld [vmem:[%s5686_s2 + $0xec] sm:$0xf0] }
 0x230   :  { %1550 = vmatpush.bf16.msrb.mxu0 %v3025_v15  ;;  %v3274_v15 = vor.u32 %v3737_v14, %v3273_v12  ;;  %v3203_v12 = vld [vmem:[%s5686_s2 + $0x70] sm:$0xf0]  ;;  %v3209_v14 = vld [vmem:[%s5686_s2 + $0x68] sm:$0xf] }
 0x231   :  { %1832 = vmatpush.bf16.msra.mxu1 %v3270_v44  ;;  %v3721_v44 = vld [vmem:[%s5686_s2 + $0x74] sm:$0xf0] }
 0x232   :  { %1576 = vmatpush.bf16.msrb.mxu2 %v3033_v55  ;;  %v3732_v55 = vld [vmem:[%s5686_s2 + $0xcc] sm:$0xf0]  ;;  %v3210_v53 = vor.u32 %v3721_v44, %v3209_v14 }
 0x233   :  { %v3250_v21 = vor.u32 %v3732_v55, %v3249_v17  ;;  %v3214_v17 = vor.u32 %v3719_v60, %v3211_v16  ;;  %v3185_v55 = vld [vmem:[%s5686_s2 + $0x40] sm:$0xf] }
 0x236   :  { %1845 = vmatpush.bf16.msra.mxu2 %v3274_v15 }
 0x29b   :  { %v1276_v23 = vpop.f32.mrf.mxu0  ;;  %v1289_v24 = vpop.f32.mrf.mxu1 }
 0x29c   :  { %v1319_v27 = vadd.f32 %v1276_v23, %v4197_v11  ;;  %v1320_v28 = vadd.f32 %v1289_v24, %v4200_v13  ;;  %v3257_v23 = vld [vmem:[%s5686_s2 + $0xc8] sm:$0xf]  ;;  %v3733_v24 = vld [vmem:[%s5686_s2 + $0xd4] sm:$0xf0] }
 0x29e   :  { %v1323_v29 = vmul.f32 0.5, %v1319_v27  ;;  %v1327_v31 = vmul.f32 0.5, %v1320_v28  ;;  %v3254_v27 = vor.u32 %v3730_v61, %v3251_v22  ;;  %v3258_v28 = vor.u32 %v3733_v24, %v3257_v23  ;;  %v3716_v61 = vld [vmem:[%s5686_s2 + $0x4c] sm:$0xf0]  ;;  %v3187_v23 = vld [vmem:[%s5686_s2 + $0x50] sm:$0xf0] }
 0x29f   :  { %v3186_v22 = vor.u32 %v3716_v61, %v3185_v55  ;;  %v3193_v24 = vld [vmem:[%s5686_s2 + $0x48] sm:$0xf] }
 0x2a0   :  { %3833 = vtanh.f32 %v1323_v29  ;;  %v3731_v29 = vld [vmem:[%s5686_s2 + $0xcc] sm:$0xf]  ;;  %1833 = vmatpush.bf16.msra.mxu1 %v3254_v27  ;;  %1846 = vmatpush.bf16.msra.mxu2 %v3258_v28  ;;  %v3717_v27 = vld [vmem:[%s5686_s2 + $0x54] sm:$0xf0] }
 0x2a1   :  { %3835 = vtanh.f32 %v1327_v31  ;;  %v3259_v31 = vld [vmem:[%s5686_s2 + $0xd8] sm:$0xf0] }
 0x2a2   :  { %v1302_v33 = vpop.f32.mrf.mxu2  ;;  %v1315_v36 = vpop.f32.mrf.mxu3 }
 0x2a3   :  { %v1321_v37 = vadd.f32 %v1302_v33, %v4212_v18  ;;  %v1322_v38 = vadd.f32 %v1315_v36, %v4224_v25  ;;  %v1278_v57 = vpop.f32.mrf.mxu0  ;;  %v1291_v59 = vpop.f32.mrf.mxu1  ;;  %v3262_v33 = vor.u32 %v3731_v29, %v3259_v31  ;;  %v3233_v36 = vld [vmem:[%s5686_s2 + $0xa0] sm:$0xf]  ;;  %v3194_v29 = vor.u32 %v3717_v27, %v3193_v24  ;;  %v3715_v31 = vld [vmem:[%s5686_s2 + $0x4c] sm:$0xf] }
 0x2a4   :  { %v3235_v59 = vld [vmem:[%s5686_s2 + $0xb0] sm:$0xf0] }
 0x2a5   :  { %3837 = vtanh.f32 %v1321_v37  ;;  %v1332_v39 = vmul.f32 0.5, %v1322_v38  ;;  %v3728_v37 = vld [vmem:[%s5686_s2 + $0xac] sm:$0xf0]  ;;  %v3726_v38 = vld [vmem:[%s5686_s2 + $0xa4] sm:$0xf]  ;;  %1859 = vmatpush.bf16.msra.mxu3 %v3262_v33 }
 0x2a6   :  { %v3834_v49 = vpop.eup %3833  ;;  %v3234_v57 = vor.u32 %v3728_v37, %v3233_v36  ;;  %v3195_v33 = vld [vmem:[%s5686_s2 + $0x58] sm:$0xf0]  ;;  %v3169_v37 = vld [vmem:[%s5686_s2 + $0x20] sm:$0xf] }
 0x2a7   :  { %v3836_v52 = vpop.eup %3835  ;;  %v1325_v50 = vmul.f32 0.5, %v3834_v49  ;;  %3839 = vtanh.f32 %v1332_v39  ;;  %v3241_v39 = vld [vmem:[%s5686_s2 + $0xa8] sm:$0xf]  ;;  %v3729_v49 = vld [vmem:[%s5686_s2 + $0xb4] sm:$0xf0]  ;;  %v3198_v36 = vor.u32 %v3715_v31, %v3195_v33 }
 0x2a8   :  { %v1329_v11 = vmul.f32 0.5, %v3836_v52  ;;  %v3238_v52 = vor.u32 %v3726_v38, %v3235_v59  ;;  %v3712_v38 = vld [vmem:[%s5686_s2 + $0x2c] sm:$0xf0] }
 0x2a9   :  { %v1326_v13 = vadd.f32 0.5, %v1325_v50  ;;  %v3242_v50 = vor.u32 %v3729_v49, %v3241_v39  ;;  %v3170_v59 = vor.u32 %v3712_v38, %v3169_v37  ;;  %v3171_v39 = vld [vmem:[%s5686_s2 + $0x30] sm:$0xf0]  ;;  %v3177_v49 = vld [vmem:[%s5686_s2 + $0x28] sm:$0xf] }
 0x2aa   :  { %v1330_v54 = vadd.f32 0.5, %v1329_v11  ;;  %v1304_v41 = vpop.f32.mrf.mxu2  ;;  %v1317_v63 = vpop.f32.mrf.mxu3  ;;  %v3727_v11 = vld [vmem:[%s5686_s2 + $0xac] sm:$0xf]  ;;  %1834 = vmatpush.bf16.msra.mxu1 %v3238_v52  ;;  %v3713_v52 = vld [vmem:[%s5686_s2 + $0x34] sm:$0xf0] }
 0x2ab   :  { %v3838_v3 = vpop.eup %3837  ;;  %1847 = vmatpush.bf16.msra.mxu2 %v3242_v50  ;;  %v3217_v41 = vld [vmem:[%s5686_s2 + $0x80] sm:$0xf]  ;;  %v3724_v63 = vld [vmem:[%s5686_s2 + $0x8c] sm:$0xf0] }
 0x2ac   :  { %v1336_v5 = vmul.f32 %v1330_v54, %v4862_v0  ;;  %v1337_v2 = vmul.f32 %v3838_v3, %v1326_v13  ;;  %v3265_v0 = vld [vmem:[%s5686_s2 + $0xe0] sm:$0xf]  ;;  %v3243_v13 = vld [vmem:[%s5686_s2 + $0xb8] sm:$0xf0]  ;;  %v3722_v3 = vld [vmem:[%s5686_s2 + $0x84] sm:$0xf] }
 0x2ad   :  { %v3840_v18 = vpop.eup %3839  ;;  %v3266_v1 = vor.u32 %v3736_v7, %v3265_v0  ;;  %v3246_v54 = vor.u32 %v3727_v11, %v3243_v13  ;;  %v3201_v7 = vld [vmem:[%s5686_s2 + $0x60] sm:$0xf]  ;;  %v3178_v11 = vor.u32 %v3713_v52, %v3177_v49  ;;  %v3711_v13 = vld [vmem:[%s5686_s2 + $0x2c] sm:$0xf]  ;;  %v3766_v49 = vld [vmem:[%s5686_s2 + $0xe4] sm:$0xf] }
 0x2ae   :  { %v5065_v45 = vadd.f32 %v1337_v2, %v1336_v5  ;;  %v1334_v25 = vmul.f32 0.5, %v3840_v18  ;;  %v3218_v5 = vor.u32 %v3724_v63, %v3217_v41  ;;  %v3219_v2 = vld [vmem:[%s5686_s2 + $0x90] sm:$0xf0]  ;;  %v3225_v18 = vld [vmem:[%s5686_s2 + $0x88] sm:$0xf]  ;;  %v3202_v6 = vor.u32 %v3720_v10, %v3201_v7 }
 0x2af   :  { %1819 = vmatpush.bf16.msra.mxu0 %v3266_v1  ;;  %1860 = vmatpush.bf16.msra.mxu3 %v3246_v54  ;;  %v3718_v1 = vld [vmem:[%s5686_s2 + $0x64] sm:$0xf]  ;;  %v3179_v54 = vld [vmem:[%s5686_s2 + $0x38] sm:$0xf0]  ;;  %v3153_v63 = vld [vmem:[%s5686_s2] sm:$0xf] }
 0x2b0   :  { %3841 = vtanh.f32 %v5065_v45  ;;  %v1335_v46 = vadd.f32 0.5, %v1334_v25  ;;  %v3725_v25 = vld [vmem:[%s5686_s2 + $0x94] sm:$0xf0]  ;;  %v3206_v15 = vor.u32 %v3718_v1, %v3203_v12  ;;  %v3182_v41 = vor.u32 %v3711_v13, %v3179_v54 }
 0x2b1   :  { %v3769_v13 = vld [vmem:[%s5686_s2 + $0xf4] sm:$0xf0] }
 0x2b3   :  { %1820 = vmatpush.bf16.msra.mxu0 %v3250_v21  ;;  %v3714_v21 = vld [vmem:[%s5686_s2 + $0x44] sm:$0xf] }
 0x2b4   :  { %v3190_v28 = vor.u32 %v3714_v21, %v3187_v23 }
 0x2b6   :  { %v3842_v51 = vpop.eup %3841 }
 0x2b7   :  { %v1340_v58 = vmul.f32 %v3842_v51, %v1335_v46  ;;  %1821 = vmatpush.bf16.msra.mxu0 %v3234_v57  ;;  %v3222_v46 = vor.u32 %v3722_v3, %v3219_v2  ;;  %v3226_v51 = vor.u32 %v3725_v25, %v3225_v18  ;;  %v3710_v57 = vld [vmem:[%s5686_s2 + $0x24] sm:$0xf]  ;;  %v3708_v3 = vld [vmem:[%s5686_s2 + $0xc] sm:$0xf0]  ;;  %v3155_v18 = vld [vmem:[%s5686_s2 + $0x10] sm:$0xf0] }
 0x2b8   :  { %v3174_v50 = vor.u32 %v3710_v57, %v3171_v39  ;;  %v3154_v2 = vor.u32 %v3708_v3, %v3153_v63  ;;  %v3161_v25 = vld [vmem:[%s5686_s2 + $0x8] sm:$0xf]  ;;  %v3768_v39 = vld [vmem:[%s5686_s2 + $0xec] sm:$0xf0]  ;;  %v3767_v63 = vld [vmem:[%s5686_s2 + $0xec] sm:$0xf] }
 0x2b9   :  { %v1341_v20 = vpack.c.bf16 %v1340_v58, %v1340_v58  ;;  %v3723_v58 = vld [vmem:[%s5686_s2 + $0x8c] sm:$0xf]  ;;  %1835 = vmatpush.bf16.msra.mxu1 %v3222_v46  ;;  %1848 = vmatpush.bf16.msra.mxu2 %v3226_v51  ;;  %v3709_v46 = vld [vmem:[%s5686_s2 + $0x14] sm:$0xf0]  ;;  %v3404_v3 = vld [vmem:[%s5686_s2 + $0xf8] sm:$0xf0] }
 0x2bb   :  { %3021 = vst [vmem:[%s5688_s4 + $0xc] sm:$0xf] %v1341_v20  ;;  %1551 = vmatmul.bf16.vlgmr.msrb.gmra.mxu0 %v1341_v20  ;;  %1564 = vmatmul.bf16.vlgmr.msrb.gmra.mxu1 %v1341_v20 }
 0x2bc   :  { %1577 = vmatmul.bf16.vlgmr.msrb.gmra.mxu2 %v1341_v20  ;;  %1590 = vmatmul.bf16.vlgmr.msrb.gmra.mxu3 %v1341_v20  ;;  %v3227_v20 = vld [vmem:[%s5686_s2 + $0x98] sm:$0xf0] }
 0x2bd   :  { %1822 = vmatpush.bf16.msra.mxu0 %v3218_v5  ;;  %v3230_v0 = vor.u32 %v3723_v58, %v3227_v20  ;;  %1836 = vmatpush.bf16.msra.mxu1 %v3206_v15  ;;  %v3706_v5 = vld [vmem:[%s5686_s2 + $0x4] sm:$0xf]  ;;  %v3162_v58 = vor.u32 %v3709_v46, %v3161_v25  ;;  %v3707_v20 = vld [vmem:[%s5686_s2 + $0xc] sm:$0xf] }
 0x2be   :  { %1849 = vmatpush.bf16.msra.mxu2 %v3210_v53  ;;  %v3158_v51 = vor.u32 %v3706_v5, %v3155_v18  ;;  %v3407_v5 = vor.u32 %v3767_v63, %v3404_v3  ;;  %v3764_v18 = vld [vmem:[%s5686_s2 + $0xcc] sm:$0xf0]  ;;  %v3762_v25 = vld [vmem:[%s5686_s2 + $0xc4] sm:$0xf]  ;;  %v3314_v63 = vld [vmem:[%s5686_s2 + $0x40] sm:$0xf] }
 0x2bf   :  { %1861 = vmatpush.bf16.msra.mxu3 %v3230_v0  ;;  %v3163_v0 = vld [vmem:[%s5686_s2 + $0x18] sm:$0xf0]  ;;  %v3748_v3 = vld [vmem:[%s5686_s2 + $0x4c] sm:$0xf0] }
 0x2c0   :  { %v3166_v7 = vor.u32 %v3707_v20, %v3163_v0  ;;  %v3765_v20 = vld [vmem:[%s5686_s2 + $0xd4] sm:$0xf0] }
 0x2c1   :  { %1823 = vmatpush.bf16.msra.mxu0 %v3202_v6  ;;  %1837 = vmatpush.bf16.msra.mxu1 %v3190_v28 }
 0x2c2   :  { %1850 = vmatpush.bf16.msra.mxu2 %v3194_v29 }
 0x2c3   :  { %1862 = vmatpush.bf16.msra.mxu3 %v3214_v17 }
 0x2c5   :  { %1824 = vmatpush.bf16.msra.mxu0 %v3186_v22  ;;  %1838 = vmatpush.bf16.msra.mxu1 %v3174_v50  ;;  %v3396_v50 = vld [vmem:[%s5686_s2 + $0xf0] sm:$0xf0] }
 0x2c6   :  { %1851 = vmatpush.bf16.msra.mxu2 %v3178_v11  ;;  %v3402_v11 = vld [vmem:[%s5686_s2 + $0xe8] sm:$0xf]  ;;  %v3399_v54 = vor.u32 %v3766_v49, %v3396_v50 }
 0x2c7   :  { %1863 = vmatpush.bf16.msra.mxu3 %v3198_v36  ;;  %v3338_v49 = vld [vmem:[%s5686_s2 + $0x68] sm:$0xf] }
 0x2c9   :  { %1825 = vmatpush.bf16.msra.mxu0 %v3170_v59  ;;  %1839 = vmatpush.bf16.msra.mxu1 %v3158_v51  ;;  %v3380_v51 = vld [vmem:[%s5686_s2 + $0xd0] sm:$0xf0] }
 0x2ca   :  { %1852 = vmatpush.bf16.msra.mxu2 %v3162_v58  ;;  %v3386_v58 = vld [vmem:[%s5686_s2 + $0xc8] sm:$0xf]  ;;  %v3383_v0 = vor.u32 %v3762_v25, %v3380_v51 }
 0x2cb   :  { %1864 = vmatpush.bf16.msra.mxu3 %v3182_v41  ;;  %v3403_v41 = vor.u32 %v3769_v13, %v3402_v11  ;;  %v3751_v13 = vld [vmem:[%s5686_s2 + $0x6c] sm:$0xf]  ;;  %v3322_v25 = vld [vmem:[%s5686_s2 + $0x48] sm:$0xf] }
 0x2cd   :  { %1826 = vmatpush.bf16.msra.mxu0 %v3154_v2  ;;  %2108 = vmatpush.bf16.msrb.mxu1 %v3399_v54  ;;  %v3378_v2 = vld [vmem:[%s5686_s2 + $0xc0] sm:$0xf]  ;;  %v3340_v54 = vld [vmem:[%s5686_s2 + $0x78] sm:$0xf0] }
 0x2ce   :  { %2121 = vmatpush.bf16.msrb.mxu2 %v3403_v41  ;;  %v3379_v46 = vor.u32 %v3764_v18, %v3378_v2  ;;  %v3343_v41 = vor.u32 %v3751_v13, %v3340_v54  ;;  %v3315_v2 = vor.u32 %v3748_v3, %v3314_v63  ;;  %v3316_v18 = vld [vmem:[%s5686_s2 + $0x50] sm:$0xf0] }
 0x2cf   :  { %1865 = vmatpush.bf16.msra.mxu3 %v3166_v7  ;;  %v3387_v7 = vor.u32 %v3765_v20, %v3386_v58  ;;  %v3747_v20 = vld [vmem:[%s5686_s2 + $0x4c] sm:$0xf] }
 0x2d1   :  { %2109 = vmatpush.bf16.msrb.mxu1 %v3383_v0  ;;  %v3324_v0 = vld [vmem:[%s5686_s2 + $0x58] sm:$0xf0] }
 0x2d2   :  { %2122 = vmatpush.bf16.msrb.mxu2 %v3387_v7  ;;  %v3327_v7 = vor.u32 %v3747_v20, %v3324_v0 }
 0x2d3   :  { %2134 = vmatpush.bf16.msrb.mxu3 %v3407_v5  ;;  %v3746_v5 = vld [vmem:[%s5686_s2 + $0x44] sm:$0xf] }
 0x2d4   :  { %v3319_v51 = vor.u32 %v3746_v5, %v3316_v18 }
 0x338   :  { %v1552_v10 = vpop.f32.mrf.mxu0  ;;  %v1565_v1 = vpop.f32.mrf.mxu1 }
 0x339   :  { %v1595_v6 = vadd.f32 %v1552_v10, %v4227_v26  ;;  %v1596_v12 = vadd.f32 %v1565_v1, %v4236_v32  ;;  %v3763_v10 = vld [vmem:[%s5686_s2 + $0xcc] sm:$0xf]  ;;  %v3388_v1 = vld [vmem:[%s5686_s2 + $0xd8] sm:$0xf0] }
 0x33b   :  { %v1599_v14 = vmul.f32 0.5, %v1595_v6  ;;  %v1603_v44 = vmul.f32 0.5, %v1596_v12  ;;  %v3391_v6 = vor.u32 %v3763_v10, %v3388_v1  ;;  %v3362_v12 = vld [vmem:[%s5686_s2 + $0xa0] sm:$0xf]  ;;  %v3744_v1 = vld [vmem:[%s5686_s2 + $0x2c] sm:$0xf0] }
 0x33c   :  { %v3298_v10 = vld [vmem:[%s5686_s2 + $0x20] sm:$0xf] }
 0x33d   :  { %3843 = vtanh.f32 %v1599_v14  ;;  %v3760_v14 = vld [vmem:[%s5686_s2 + $0xac] sm:$0xf0]  ;;  %2135 = vmatpush.bf16.msrb.mxu3 %v3391_v6  ;;  %v3742_v6 = vld [vmem:[%s5686_s2 + $0x24] sm:$0xf] }
 0x33e   :  { %3845 = vtanh.f32 %v1603_v44  ;;  %v3758_v44 = vld [vmem:[%s5686_s2 + $0xa4] sm:$0xf] }
 0x33f   :  { %v1578_v15 = vpop.f32.mrf.mxu2  ;;  %v1591_v53 = vpop.f32.mrf.mxu3 }
 0x340   :  { %v1597_v60 = vadd.f32 %v1578_v15, %v4272_v56  ;;  %v1598_v16 = vadd.f32 %v1591_v53, %v4284_v8  ;;  %v1554_v17 = vpop.f32.mrf.mxu0  ;;  %v1567_v55 = vpop.f32.mrf.mxu1  ;;  %v3363_v15 = vor.u32 %v3760_v14, %v3362_v12  ;;  %v3364_v53 = vld [vmem:[%s5686_s2 + $0xb0] sm:$0xf0]  ;;  %v3299_v12 = vor.u32 %v3744_v1, %v3298_v10  ;;  %v3800_v10 = vld [vmem:[%s5686_s2 + $0xec] sm:$0xf0]  ;;  %v3798_v1 = vld [vmem:[%s5686_s2 + $0xe4] sm:$0xf] }
 0x341   :  { %v3367_v17 = vor.u32 %v3758_v44, %v3364_v53  ;;  %v3300_v14 = vld [vmem:[%s5686_s2 + $0x30] sm:$0xf0]  ;;  %v3306_v44 = vld [vmem:[%s5686_s2 + $0x28] sm:$0xf] }
 0x342   :  { %3847 = vtanh.f32 %v1597_v60  ;;  %v1608_v61 = vmul.f32 0.5, %v1598_v16  ;;  %v3370_v60 = vld [vmem:[%s5686_s2 + $0xa8] sm:$0xf]  ;;  %v3761_v16 = vld [vmem:[%s5686_s2 + $0xb4] sm:$0xf0]  ;;  %v3303_v53 = vor.u32 %v3742_v6, %v3300_v14 }
 0x343   :  { %v3844_v21 = vpop.eup %3843  ;;  %v3371_v55 = vor.u32 %v3761_v16, %v3370_v60  ;;  %2110 = vmatpush.bf16.msrb.mxu1 %v3367_v17  ;;  %v3743_v16 = vld [vmem:[%s5686_s2 + $0x2c] sm:$0xf]  ;;  %v3308_v17 = vld [vmem:[%s5686_s2 + $0x38] sm:$0xf0]  ;;  %v3531_v14 = vld [vmem:[%s5686_s2 + $0xe8] sm:$0xf] }
 0x344   :  { %v3846_v22 = vpop.eup %3845  ;;  %v1601_v23 = vmul.f32 0.5, %v3844_v21  ;;  %3849 = vtanh.f32 %v1608_v61  ;;  %v3759_v61 = vld [vmem:[%s5686_s2 + $0xac] sm:$0xf]  ;;  %v3372_v21 = vld [vmem:[%s5686_s2 + $0xb8] sm:$0xf0] }
 0x345   :  { %v1605_v26 = vmul.f32 0.5, %v3846_v22  ;;  %v3375_v22 = vor.u32 %v3759_v61, %v3372_v21  ;;  %2123 = vmatpush.bf16.msrb.mxu2 %v3371_v55  ;;  %v3311_v55 = vor.u32 %v3743_v16, %v3308_v17  ;;  %v3282_v61 = vld [vmem:[%s5686_s2] sm:$0xf]  ;;  %v3740_v21 = vld [vmem:[%s5686_s2 + $0xc] sm:$0xf0] }
 0x346   :  { %v1602_v32 = vadd.f32 0.5, %v1601_v23  ;;  %v3346_v23 = vld [vmem:[%s5686_s2 + $0x80] sm:$0xf]  ;;  %v3533_v16 = vld [vmem:[%s5686_s2 + $0xf8] sm:$0xf0] }
 0x347   :  { %v1606_v24 = vadd.f32 0.5, %v1605_v26  ;;  %v1580_v27 = vpop.f32.mrf.mxu2  ;;  %v1593_v28 = vpop.f32.mrf.mxu3  ;;  %v3756_v26 = vld [vmem:[%s5686_s2 + $0x8c] sm:$0xf0]  ;;  %2136 = vmatpush.bf16.msrb.mxu3 %v3375_v22  ;;  %v3738_v22 = vld [vmem:[%s5686_s2 + $0x4] sm:$0xf] }
 0x348   :  { %v3848_v29 = vpop.eup %3847  ;;  %v3348_v27 = vld [vmem:[%s5686_s2 + $0x90] sm:$0xf0]  ;;  %v3354_v28 = vld [vmem:[%s5686_s2 + $0x88] sm:$0xf] }
 0x349   :  { %v1612_v31 = vmul.f32 %v1606_v24, %v5065_v45  ;;  %v1613_v33 = vmul.f32 %v3848_v29, %v1602_v32  ;;  %v3394_v45 = vld [vmem:[%s5686_s2 + $0xe0] sm:$0xf]  ;;  %v3754_v32 = vld [vmem:[%s5686_s2 + $0x84] sm:$0xf]  ;;  %v3347_v24 = vor.u32 %v3756_v26, %v3346_v23  ;;  %v3757_v29 = vld [vmem:[%s5686_s2 + $0x94] sm:$0xf0]  ;;  %v3283_v23 = vor.u32 %v3740_v21, %v3282_v61 }
 0x34a   :  { %v3850_v56 = vpop.eup %3849  ;;  %v3395_v52 = vor.u32 %v3768_v39, %v3394_v45  ;;  %v3332_v39 = vld [vmem:[%s5686_s2 + $0x70] sm:$0xf0]  ;;  %v3796_v61 = vld [vmem:[%s5686_s2 + $0xcc] sm:$0xf0]  ;;  %v3794_v21 = vld [vmem:[%s5686_s2 + $0xc4] sm:$0xf] }
 0x34b   :  { %v5268_v36 = vadd.f32 %v1613_v33, %v1612_v31  ;;  %v1610_v8 = vmul.f32 0.5, %v3850_v56  ;;  %v3351_v31 = vor.u32 %v3754_v32, %v3348_v27  ;;  %v3355_v33 = vor.u32 %v3757_v29, %v3354_v28  ;;  %v3755_v56 = vld [vmem:[%s5686_s2 + $0x8c] sm:$0xf]  ;;  %v3284_v26 = vld [vmem:[%s5686_s2 + $0x10] sm:$0xf0] }
 0x34c   :  { %2095 = vmatpush.bf16.msrb.mxu0 %v3395_v52  ;;  %v3753_v52 = vld [vmem:[%s5686_s2 + $0x74] sm:$0xf0]  ;;  %v3290_v32 = vld [vmem:[%s5686_s2 + $0x8] sm:$0xf]  ;;  %v3287_v27 = vor.u32 %v3738_v22, %v3284_v26  ;;  %v3739_v29 = vld [vmem:[%s5686_s2 + $0xc] sm:$0xf] }
 0x34d   :  { %3851 = vtanh.f32 %v5268_v36  ;;  %v1611_v37 = vadd.f32 0.5, %v1610_v8  ;;  %v3356_v8 = vld [vmem:[%s5686_s2 + $0x98] sm:$0xf0]  ;;  %2111 = vmatpush.bf16.msrb.mxu1 %v3351_v31  ;;  %2124 = vmatpush.bf16.msrb.mxu2 %v3355_v33  ;;  %v3339_v11 = vor.u32 %v3753_v52, %v3338_v49  ;;  %v3515_v26 = vld [vmem:[%s5686_s2 + $0xc8] sm:$0xf] }
 0x34e   :  { %v3292_v31 = vld [vmem:[%s5686_s2 + $0x18] sm:$0xf0] }
 0x34f   :  { %v3295_v33 = vor.u32 %v3739_v29, %v3292_v31  ;;  %v3517_v29 = vld [vmem:[%s5686_s2 + $0xd8] sm:$0xf0] }
 0x350   :  { %2096 = vmatpush.bf16.msrb.mxu0 %v3379_v46  ;;  %v3749_v46 = vld [vmem:[%s5686_s2 + $0x54] sm:$0xf0] }
 0x351   :  { %2125 = vmatpush.bf16.msrb.mxu2 %v3339_v11  ;;  %v3323_v58 = vor.u32 %v3749_v46, %v3322_v25 }
 0x353   :  { %v3852_v38 = vpop.eup %3851 }
 0x354   :  { %v1616_v57 = vmul.f32 %v3852_v38, %v1611_v37  ;;  %2097 = vmatpush.bf16.msrb.mxu0 %v3363_v15  ;;  %v3359_v37 = vor.u32 %v3755_v56, %v3356_v8  ;;  %v3330_v38 = vld [vmem:[%s5686_s2 + $0x60] sm:$0xf]  ;;  %v3745_v15 = vld [vmem:[%s5686_s2 + $0x34] sm:$0xf0] }
 0x355   :  { %2126 = vmatpush.bf16.msrb.mxu2 %v3323_v58  ;;  %v3307_v60 = vor.u32 %v3745_v15, %v3306_v44  ;;  %v3801_v44 = vld [vmem:[%s5686_s2 + $0xf4] sm:$0xf0] }
 0x356   :  { %v1617_v59 = vpack.c.bf16 %v1616_v57, %v1616_v57  ;;  %v3752_v57 = vld [vmem:[%s5686_s2 + $0x6c] sm:$0xf0]  ;;  %2137 = vmatpush.bf16.msrb.mxu3 %v3359_v37 }
 0x357   :  { %v3331_v45 = vor.u32 %v3752_v57, %v3330_v38 }
 0x358   :  { %3150 = vst [vmem:[%s5688_s4 + $0x10] sm:$0xf] %v1617_v59  ;;  %1827 = vmatmul.bf16.vlgmr.msra.gmra.mxu0 %v1617_v59  ;;  %1840 = vmatmul.bf16.vlgmr.msra.gmra.mxu1 %v1617_v59 }
 0x359   :  { %1853 = vmatmul.bf16.vlgmr.msra.gmra.mxu2 %v1617_v59  ;;  %1866 = vmatmul.bf16.vlgmr.msra.gmra.mxu3 %v1617_v59  ;;  %v3750_v59 = vld [vmem:[%s5686_s2 + $0x64] sm:$0xf] }
 0x35a   :  { %2098 = vmatpush.bf16.msrb.mxu0 %v3347_v24  ;;  %v3335_v50 = vor.u32 %v3750_v59, %v3332_v39  ;;  %2138 = vmatpush.bf16.msrb.mxu3 %v3343_v41  ;;  %v3741_v24 = vld [vmem:[%s5686_s2 + $0x14] sm:$0xf0] }
 0x35b   :  { %2127 = vmatpush.bf16.msrb.mxu2 %v3307_v60  ;;  %v3291_v28 = vor.u32 %v3741_v24, %v3290_v32  ;;  %v3799_v60 = vld [vmem:[%s5686_s2 + $0xec] sm:$0xf]  ;;  %v3797_v32 = vld [vmem:[%s5686_s2 + $0xd4] sm:$0xf0] }
 0x35c   :  { %2112 = vmatpush.bf16.msrb.mxu1 %v3335_v50  ;;  %v3536_v17 = vor.u32 %v3799_v60, %v3533_v16  ;;  %v3445_v60 = vld [vmem:[%s5686_s2 + $0x50] sm:$0xf0]  ;;  %v3451_v16 = vld [vmem:[%s5686_s2 + $0x48] sm:$0xf] }
 0x35e   :  { %2099 = vmatpush.bf16.msrb.mxu0 %v3331_v45  ;;  %2139 = vmatpush.bf16.msrb.mxu3 %v3327_v7 }
 0x35f   :  { %2128 = vmatpush.bf16.msrb.mxu2 %v3291_v28  ;;  %v3795_v28 = vld [vmem:[%s5686_s2 + $0xcc] sm:$0xf] }
 0x360   :  { %2113 = vmatpush.bf16.msrb.mxu1 %v3319_v51  ;;  %v3520_v31 = vor.u32 %v3795_v28, %v3517_v29  ;;  %v3429_v28 = vld [vmem:[%s5686_s2 + $0x30] sm:$0xf0]  ;;  %v3435_v29 = vld [vmem:[%s5686_s2 + $0x28] sm:$0xf] }
 0x362   :  { %2100 = vmatpush.bf16.msrb.mxu0 %v3315_v2  ;;  %2140 = vmatpush.bf16.msrb.mxu3 %v3311_v55  ;;  %v3507_v55 = vld [vmem:[%s5686_s2 + $0xc0] sm:$0xf] }
 0x363   :  { %v3508_v22 = vor.u32 %v3796_v61, %v3507_v55 }
 0x364   :  { %2114 = vmatpush.bf16.msrb.mxu1 %v3303_v53  ;;  %v3532_v53 = vor.u32 %v3801_v44, %v3531_v14  ;;  %v3443_v14 = vld [vmem:[%s5686_s2 + $0x40] sm:$0xf]  ;;  %v3780_v44 = vld [vmem:[%s5686_s2 + $0x4c] sm:$0xf0] }
 0x366   :  { %2101 = vmatpush.bf16.msrb.mxu0 %v3299_v12  ;;  %2141 = vmatpush.bf16.msrb.mxu3 %v3295_v33  ;;  %v3525_v12 = vld [vmem:[%s5686_s2 + $0xf0] sm:$0xf0]  ;;  %v3491_v33 = vld [vmem:[%s5686_s2 + $0xa0] sm:$0xf] }
 0x367   :  { %v3528_v15 = vor.u32 %v3798_v1, %v3525_v12  ;;  %2397 = vmatpush.bf16.msra.mxu2 %v3532_v53  ;;  %v3783_v1 = vld [vmem:[%s5686_s2 + $0x6c] sm:$0xf]  ;;  %v3444_v53 = vor.u32 %v3780_v44, %v3443_v14 }
 0x368   :  { %2115 = vmatpush.bf16.msrb.mxu1 %v3287_v27  ;;  %v3516_v27 = vor.u32 %v3797_v32, %v3515_v26  ;;  %v3427_v26 = vld [vmem:[%s5686_s2 + $0x20] sm:$0xf]  ;;  %v3776_v32 = vld [vmem:[%s5686_s2 + $0x2c] sm:$0xf0] }
 0x36a   :  { %2102 = vmatpush.bf16.msrb.mxu0 %v3283_v23  ;;  %2410 = vmatpush.bf16.msra.mxu3 %v3536_v17  ;;  %v3509_v23 = vld [vmem:[%s5686_s2 + $0xd0] sm:$0xf0]  ;;  %v3781_v17 = vld [vmem:[%s5686_s2 + $0x54] sm:$0xf0] }
 0x36b   :  { %v3512_v24 = vor.u32 %v3794_v21, %v3509_v23  ;;  %2398 = vmatpush.bf16.msra.mxu2 %v3516_v27  ;;  %v3452_v61 = vor.u32 %v3781_v17, %v3451_v16  ;;  %v3779_v21 = vld [vmem:[%s5686_s2 + $0x4c] sm:$0xf]  ;;  %v3428_v27 = vor.u32 %v3776_v32, %v3427_v26 }
 0x36c   :  { %2384 = vmatpush.bf16.msra.mxu1 %v3528_v15  ;;  %v3778_v15 = vld [vmem:[%s5686_s2 + $0x44] sm:$0xf] }
 0x36d   :  { %v3448_v55 = vor.u32 %v3778_v15, %v3445_v60 }
 0x36e   :  { %2411 = vmatpush.bf16.msra.mxu3 %v3520_v31  ;;  %v3777_v31 = vld [vmem:[%s5686_s2 + $0x34] sm:$0xf0] }
 0x370   :  { %2385 = vmatpush.bf16.msra.mxu1 %v3512_v24  ;;  %v3774_v24 = vld [vmem:[%s5686_s2 + $0x24] sm:$0xf] }
 0x3d5   :  { %v1828_v56 = vpop.f32.mrf.mxu0  ;;  %v1841_v8 = vpop.f32.mrf.mxu1 }
 0x3d6   :  { %v1871_v37 = vadd.f32 %v1828_v56, %v4287_v9  ;;  %v1872_v38 = vadd.f32 %v1841_v8, %v4296_v19  ;;  %v3792_v56 = vld [vmem:[%s5686_s2 + $0xac] sm:$0xf0]  ;;  %v3790_v8 = vld [vmem:[%s5686_s2 + $0xa4] sm:$0xf] }
 0x3d8   :  { %v1875_v57 = vmul.f32 0.5, %v1871_v37  ;;  %v1879_v59 = vmul.f32 0.5, %v1872_v38  ;;  %v3492_v37 = vor.u32 %v3792_v56, %v3491_v33  ;;  %v3493_v38 = vld [vmem:[%s5686_s2 + $0xb0] sm:$0xf0]  ;;  %v3432_v33 = vor.u32 %v3774_v24, %v3429_v28 }
 0x3d9   :  { %v3436_v56 = vor.u32 %v3777_v31, %v3435_v29 }
 0x3da   :  { %3853 = vtanh.f32 %v1875_v57  ;;  %v3499_v57 = vld [vmem:[%s5686_s2 + $0xa8] sm:$0xf] }
 0x3db   :  { %3855 = vtanh.f32 %v1879_v59  ;;  %v3793_v59 = vld [vmem:[%s5686_s2 + $0xb4] sm:$0xf0] }
 0x3dc   :  { %v1854_v45 = vpop.f32.mrf.mxu2  ;;  %v1867_v39 = vpop.f32.mrf.mxu3 }
 0x3dd   :  { %v1873_v49 = vadd.f32 %v1854_v45, %v4332_v40  ;;  %v1874_v52 = vadd.f32 %v1867_v39, %v4344_v47  ;;  %v1830_v50 = vpop.f32.mrf.mxu0  ;;  %v1843_v11 = vpop.f32.mrf.mxu1  ;;  %v3496_v45 = vor.u32 %v3790_v8, %v3493_v38  ;;  %v3500_v39 = vor.u32 %v3793_v59, %v3499_v57  ;;  %v3775_v8 = vld [vmem:[%s5686_s2 + $0x2c] sm:$0xf]  ;;  %v3411_v57 = vld [vmem:[%s5686_s2] sm:$0xf]  ;;  %v3772_v59 = vld [vmem:[%s5686_s2 + $0xc] sm:$0xf0] }
 0x3de   :  { %v3475_v11 = vld [vmem:[%s5686_s2 + $0x80] sm:$0xf] }
 0x3df   :  { %3857 = vtanh.f32 %v1873_v49  ;;  %v1884_v13 = vmul.f32 0.5, %v1874_v52  ;;  %v3791_v49 = vld [vmem:[%s5686_s2 + $0xac] sm:$0xf]  ;;  %v3501_v52 = vld [vmem:[%s5686_s2 + $0xb8] sm:$0xf0]  ;;  %2386 = vmatpush.bf16.msra.mxu1 %v3496_v45  ;;  %2399 = vmatpush.bf16.msra.mxu2 %v3500_v39  ;;  %v3412_v39 = vor.u32 %v3772_v59, %v3411_v57 }
 0x3e0   :  { %v3854_v54 = vpop.eup %3853  ;;  %v3504_v50 = vor.u32 %v3791_v49, %v3501_v52  ;;  %v3770_v45 = vld [vmem:[%s5686_s2 + $0x4] sm:$0xf]  ;;  %v3413_v49 = vld [vmem:[%s5686_s2 + $0x10] sm:$0xf0]  ;;  %v3419_v52 = vld [vmem:[%s5686_s2 + $0x8] sm:$0xf] }
 0x3e1   :  { %v3856_v41 = vpop.eup %3855  ;;  %v1877_v63 = vmul.f32 0.5, %v3854_v54  ;;  %3859 = vtanh.f32 %v1884_v13  ;;  %v3788_v13 = vld [vmem:[%s5686_s2 + $0x8c] sm:$0xf0]  ;;  %v3786_v54 = vld [vmem:[%s5686_s2 + $0x84] sm:$0xf] }
 0x3e2   :  { %v1881_v9 = vmul.f32 0.5, %v3856_v41  ;;  %2412 = vmatpush.bf16.msra.mxu3 %v3504_v50  ;;  %v3476_v41 = vor.u32 %v3788_v13, %v3475_v11  ;;  %v3773_v50 = vld [vmem:[%s5686_s2 + $0x14] sm:$0xf0]  ;;  %v3416_v11 = vor.u32 %v3770_v45, %v3413_v49 }
 0x3e3   :  { %v1878_v19 = vadd.f32 0.5, %v1877_v63  ;;  %v3477_v63 = vld [vmem:[%s5686_s2 + $0x90] sm:$0xf0]  ;;  %v3420_v13 = vor.u32 %v3773_v50, %v3419_v52 }
 0x3e4   :  { %v1882_v3 = vadd.f32 0.5, %v1881_v9  ;;  %v1856_v5 = vpop.f32.mrf.mxu2  ;;  %v1869_v2 = vpop.f32.mrf.mxu3  ;;  %v3483_v9 = vld [vmem:[%s5686_s2 + $0x88] sm:$0xf] }
 0x3e5   :  { %v3858_v18 = vpop.eup %3857  ;;  %v3787_v2 = vld [vmem:[%s5686_s2 + $0x8c] sm:$0xf] }
 0x3e6   :  { %v1888_v25 = vmul.f32 %v1882_v3, %v5268_v36  ;;  %v1889_v46 = vmul.f32 %v3858_v18, %v1878_v19  ;;  %v3523_v36 = vld [vmem:[%s5686_s2 + $0xe0] sm:$0xf]  ;;  %v3789_v19 = vld [vmem:[%s5686_s2 + $0x94] sm:$0xf0]  ;;  %v3480_v3 = vor.u32 %v3786_v54, %v3477_v63  ;;  %v3485_v18 = vld [vmem:[%s5686_s2 + $0x98] sm:$0xf0] }
 0x3e7   :  { %v3860_v40 = vpop.eup %3859  ;;  %v3524_v6 = vor.u32 %v3800_v10, %v3523_v36  ;;  %v3484_v5 = vor.u32 %v3789_v19, %v3483_v9  ;;  %v3771_v54 = vld [vmem:[%s5686_s2 + $0xc] sm:$0xf] }
 0x3e8   :  { %v5471_v51 = vadd.f32 %v1889_v46, %v1888_v25  ;;  %v1886_v47 = vmul.f32 0.5, %v3860_v40  ;;  %v3488_v25 = vor.u32 %v3787_v2, %v3485_v18  ;;  %2387 = vmatpush.bf16.msra.mxu1 %v3480_v3  ;;  %v3459_v46 = vld [vmem:[%s5686_s2 + $0x60] sm:$0xf]  ;;  %v3784_v40 = vld [vmem:[%s5686_s2 + $0x6c] sm:$0xf0] }
 0x3e9   :  { %2371 = vmatpush.bf16.msra.mxu0 %v3524_v6  ;;  %2400 = vmatpush.bf16.msra.mxu2 %v3484_v5  ;;  %v3469_v6 = vld [vmem:[%s5686_s2 + $0x78] sm:$0xf0] }
 0x3ea   :  { %3861 = vtanh.f32 %v5471_v51  ;;  %v1887_v58 = vadd.f32 0.5, %v1886_v47  ;;  %v3782_v47 = vld [vmem:[%s5686_s2 + $0x64] sm:$0xf]  ;;  %2413 = vmatpush.bf16.msra.mxu3 %v3488_v25  ;;  %v3472_v12 = vor.u32 %v3783_v1, %v3469_v6 }
 0x3ed   :  { %2372 = vmatpush.bf16.msra.mxu0 %v3508_v22  ;;  %v3453_v22 = vld [vmem:[%s5686_s2 + $0x58] sm:$0xf0] }
 0x3ee   :  { %2414 = vmatpush.bf16.msra.mxu3 %v3472_v12  ;;  %v3456_v23 = vor.u32 %v3779_v21, %v3453_v22 }
 0x3f0   :  { %v3862_v20 = vpop.eup %3861 }
 0x3f1   :  { %v1892_v0 = vmul.f32 %v3862_v20, %v1887_v58  ;;  %2373 = vmatpush.bf16.msra.mxu0 %v3492_v37  ;;  %v3460_v58 = vor.u32 %v3784_v40, %v3459_v46  ;;  %v3461_v20 = vld [vmem:[%s5686_s2 + $0x70] sm:$0xf0]  ;;  %v3437_v37 = vld [vmem:[%s5686_s2 + $0x38] sm:$0xf0] }
 0x3f2   :  { %v3464_v36 = vor.u32 %v3782_v47, %v3461_v20  ;;  %2415 = vmatpush.bf16.msra.mxu3 %v3456_v23  ;;  %v3440_v38 = vor.u32 %v3775_v8, %v3437_v37 }
 0x3f3   :  { %v1893_v7 = vpack.c.bf16 %v1892_v0, %v1892_v0  ;;  %v3467_v0 = vld [vmem:[%s5686_s2 + $0x68] sm:$0xf] }
 0x3f4   :  { %2388 = vmatpush.bf16.msra.mxu1 %v3464_v36 }
 0x3f5   :  { %3279 = vst [vmem:[%s5688_s4 + $0x14] sm:$0xf] %v1893_v7  ;;  %2103 = vmatmul.bf16.vlgmr.msrb.gmra.mxu0 %v1893_v7  ;;  %2116 = vmatmul.bf16.vlgmr.msrb.gmra.mxu1 %v1893_v7 }
 0x3f6   :  { %2129 = vmatmul.bf16.vlgmr.msrb.gmra.mxu2 %v1893_v7  ;;  %2142 = vmatmul.bf16.vlgmr.msrb.gmra.mxu3 %v1893_v7  ;;  %v3785_v7 = vld [vmem:[%s5686_s2 + $0x74] sm:$0xf0] }
 0x3f7   :  { %2374 = vmatpush.bf16.msra.mxu0 %v3476_v41  ;;  %v3468_v10 = vor.u32 %v3785_v7, %v3467_v0  ;;  %2416 = vmatpush.bf16.msra.mxu3 %v3440_v38  ;;  %v3421_v41 = vld [vmem:[%s5686_s2 + $0x18] sm:$0xf0] }
 0x3f8   :  { %2389 = vmatpush.bf16.msra.mxu1 %v3448_v55  ;;  %v3424_v63 = vor.u32 %v3771_v54, %v3421_v41 }
 0x3f9   :  { %2401 = vmatpush.bf16.msra.mxu2 %v3468_v10 }
 0x3fb   :  { %2375 = vmatpush.bf16.msra.mxu0 %v3460_v58  ;;  %2417 = vmatpush.bf16.msra.mxu3 %v3424_v63 }
 0x3fc   :  { %2390 = vmatpush.bf16.msra.mxu1 %v3432_v33 }
 0x3fd   :  { %2402 = vmatpush.bf16.msra.mxu2 %v3452_v61 }
 0x3ff   :  { %2376 = vmatpush.bf16.msra.mxu0 %v3444_v53 }
 0x400   :  { %2391 = vmatpush.bf16.msra.mxu1 %v3416_v11 }
 0x401   :  { %2403 = vmatpush.bf16.msra.mxu2 %v3436_v56 }
 0x403   :  { %2377 = vmatpush.bf16.msra.mxu0 %v3428_v27 }
 0x405   :  { %2404 = vmatpush.bf16.msra.mxu2 %v3420_v13 }
 0x407   :  { %2378 = vmatpush.bf16.msra.mxu0 %v3412_v39 }
 0x472   :  { %v2104_v9 = vpop.f32.mrf.mxu0  ;;  %v2117_v19 = vpop.f32.mrf.mxu1 }
 0x473   :  { %v2147_v3 = vadd.f32 %v2104_v9, %v4347_v48  ;;  %v2148_v5 = vadd.f32 %v2117_v19, %v4356_v4 }
 0x475   :  { %v2151_v2 = vmul.f32 0.5, %v2147_v3  ;;  %v2155_v18 = vmul.f32 0.5, %v2148_v5 }
 0x477   :  { %3863 = vtanh.f32 %v2151_v2 }
 0x478   :  { %3865 = vtanh.f32 %v2155_v18 }
 0x479   :  { %v2130_v25 = vpop.f32.mrf.mxu2  ;;  %v2143_v46 = vpop.f32.mrf.mxu3 }
 0x47a   :  { %v2149_v40 = vadd.f32 %v2130_v25, %v4392_v34  ;;  %v2150_v47 = vadd.f32 %v2143_v46, %v4404_v42  ;;  %v2106_v58 = vpop.f32.mrf.mxu0  ;;  %v2119_v20 = vpop.f32.mrf.mxu1 }
 0x47c   :  { %3867 = vtanh.f32 %v2149_v40  ;;  %v2160_v0 = vmul.f32 0.5, %v2150_v47 }
 0x47d   :  { %v3864_v7 = vpop.eup %3863 }
 0x47e   :  { %v3866_v36 = vpop.eup %3865  ;;  %v2153_v10 = vmul.f32 0.5, %v3864_v7  ;;  %3869 = vtanh.f32 %v2160_v0 }
 0x47f   :  { %v2157_v48 = vmul.f32 0.5, %v3866_v36 }
 0x480   :  { %v2154_v4 = vadd.f32 0.5, %v2153_v10 }
 0x481   :  { %v2158_v1 = vadd.f32 0.5, %v2157_v48  ;;  %v2132_v6 = vpop.f32.mrf.mxu2  ;;  %v2145_v12 = vpop.f32.mrf.mxu3 }
 0x482   :  { %v3868_v14 = vpop.eup %3867 }
 0x483   :  { %v2164_v44 = vmul.f32 %v2158_v1, %v5471_v51  ;;  %v2165_v15 = vmul.f32 %v3868_v14, %v2154_v4 }
 0x484   :  { %v3870_v34 = vpop.eup %3869 }
 0x485   :  { %v2166_v53 = vadd.f32 %v2165_v15, %v2164_v44  ;;  %v2162_v42 = vmul.f32 0.5, %v3870_v34 }
 0x487   :  { %3871 = vtanh.f32 %v2166_v53  ;;  %v2163_v60 = vadd.f32 0.5, %v2162_v42 }
 0x48d   :  { %v3872_v16 = vpop.eup %3871 }
 0x48e   :  { %v2168_v17 = vmul.f32 %v3872_v16, %v2163_v60 }
 0x490   :  { %v2169_v55 = vpack.c.bf16 %v2168_v17, %v2168_v17 }
 0x492   :  { %3408 = vst [vmem:[%s5688_s4 + $0x18] sm:$0xf] %v2169_v55  ;;  %2379 = vmatmul.bf16.vlgmr.msra.gmra.mxu0 %v2169_v55  ;;  %2392 = vmatmul.bf16.vlgmr.msra.gmra.mxu1 %v2169_v55 }
 0x493   :  { %2405 = vmatmul.bf16.vlgmr.msra.gmra.mxu2 %v2169_v55  ;;  %2418 = vmatmul.bf16.vlgmr.msra.gmra.mxu3 %v2169_v55 }
 0x50f   :  { %v2380_v61 = vpop.f32.mrf.mxu0  ;;  %v2393_v21 = vpop.f32.mrf.mxu1 }
 0x510   :  { %v2423_v51 = vadd.f32 %v2380_v61, %v4407_v43  ;;  %v2424_v22 = vadd.f32 %v2393_v21, %v4416_v62 }
 0x512   :  { %v2427_v23 = vmul.f32 0.5, %v2423_v51  ;;  %v2431_v26 = vmul.f32 0.5, %v2424_v22 }
 0x514   :  { %3873 = vtanh.f32 %v2427_v23 }
 0x515   :  { %3875 = vtanh.f32 %v2431_v26 }
 0x516   :  { %v2406_v32 = vpop.f32.mrf.mxu2  ;;  %v2419_v24 = vpop.f32.mrf.mxu3 }
 0x517   :  { %v2425_v27 = vadd.f32 %v2406_v32, %v4447_v30  ;;  %v2426_v28 = vadd.f32 %v2419_v24, %v4450_v35  ;;  %v2382_v29 = vpop.f32.mrf.mxu0  ;;  %v2395_v31 = vpop.f32.mrf.mxu1 }
 0x519   :  { %3877 = vtanh.f32 %v2425_v27  ;;  %v2436_v33 = vmul.f32 0.5, %v2426_v28 }
 0x51a   :  { %v3874_v56 = vpop.eup %3873 }
 0x51b   :  { %v3876_v8 = vpop.eup %3875  ;;  %v2429_v37 = vmul.f32 0.5, %v3874_v56  ;;  %3879 = vtanh.f32 %v2436_v33 }
 0x51c   :  { %v2433_v43 = vmul.f32 0.5, %v3876_v8 }
 0x51d   :  { %v2430_v62 = vadd.f32 0.5, %v2429_v37 }
 0x51e   :  { %v2434_v38 = vadd.f32 0.5, %v2433_v43  ;;  %v2408_v57 = vpop.f32.mrf.mxu2  ;;  %v2421_v59 = vpop.f32.mrf.mxu3 }
 0x51f   :  { %v3878_v45 = vpop.eup %3877 }
 0x520   :  { %v2440_v39 = vmul.f32 %v2434_v38, %v2166_v53  ;;  %v2441_v49 = vmul.f32 %v3878_v45, %v2430_v62 }
 0x521   :  { %v3880_v52 = vpop.eup %3879 }
 0x522   :  { %v2442_v30 = vadd.f32 %v2441_v49, %v2440_v39  ;;  %v2438_v35 = vmul.f32 0.5, %v3880_v52 }
 0x524   :  { %3881 = vtanh.f32 %v2442_v30  ;;  %v2439_v50 = vadd.f32 0.5, %v2438_v35 }
 0x52a   :  { %v3882_v11 = vpop.eup %3881 }
 0x52b   :  { %v2444_v13 = vmul.f32 %v3882_v11, %v2439_v50 }
 0x52d   :  { %v2445_v54 = vpack.c.bf16 %v2444_v13, %v2444_v13 }
 0x52f   :  { %3537 = vst [vmem:[%s5688_s4 + $0x1c] sm:$0xf] %v2445_v54 }

</bundles_post_ra>
